<compile_context>
chip_gen: v6e
topology: v6e:2x2x1
jax: 0.10.0
libtpu: 0.0.40
codegen_flags: <defaults>
</compile_context>

<pallas_src>
import numpy as np
import jax
import jax.numpy as jnp
from jax.experimental import pallas as pl
from jax.experimental.pallas import tpu as pltpu


def _bilstm_kernel(x2d_ref, len_ref, wi_ref, wh_ref, b_ref, wfc_ref, bfc_ref,
                   out_ref, gx_ref, gxt_ref, mask_ref, h_ref):
    """Fused bidirectional LSTM + linear head; whole problem VMEM-resident.

    Inputs
      x2d_ref:  (T*B, D)  f32  time-major padded input, flattened (row t*B+b)
      len_ref:  (B, 1)    i32  sequence lengths
      wi_ref:   (D, 8H)   f32  input->gate weights, both dirs, columns ordered
                               [i_f,i_b | f_f,f_b | o_f,o_b | g_f,g_b]
      wh_ref:   (2H, 8H)  f32  block-diagonal recurrent weights (rows 0:H act
                               on fwd hidden lanes, rows H:2H on bwd), same
                               column order as wi_ref
      b_ref:    (1, 8H)   f32  b_ih + b_hh for both directions, same order
      wfc_ref:  (2H, 2)   f32  fc weight (rows 0:H fwd h, H:2H bwd h)
      bfc_ref:  (1, 2)    f32  fc bias
    Output
      out_ref:  (T*B, 2)  f32  fc(padded LSTM output), row t*B+b
    Scratch (VMEM)
      gx_ref:   (T*B, 8H) raw input projection
      gxt_ref:  (T*B, 8H) direction-merged per-step gate inputs
      mask_ref: (T*B, 2H) per-step packed-sequence validity mask (1.0 / 0.0)
      h_ref:    (T*B, 2H) per-time hidden outputs [fwd | bwd] for the fc
    """
    TB, _ = x2d_ref.shape
    H2 = wh_ref.shape[0]       # 2H
    H = H2 // 2
    B = len_ref.shape[0]
    T = TB // B

    lengths = len_ref[...]                      # (B, 1) int32
    wi = wi_ref[...]
    wh = wh_ref[...]
    bias = b_ref[...]

    # Lane maps for the interleaved [fwd | bwd] packing (blocks of H lanes).
    lane_h = jax.lax.broadcasted_iota(jnp.int32, (1, H2), 1)
    is_fwd_h = lane_h < H                               # (1, 2H)
    is_fwd_g = jnp.concatenate([is_fwd_h] * 4, axis=1)  # (1, 8H) same pattern

    # ---- hoisted input projection: ONE (T*B, D) @ (D, 8H) MXU matmul -------
    gx_ref[...] = jnp.dot(x2d_ref[...], wi,
                          preferred_element_type=jnp.float32) + bias

    # ---- precompute direction-merged gate inputs + packed-seq masks --------
    # (off the serial critical path; depends only on step index and lengths)
    for s in range(T):
        t_f, t_b = s, T - 1 - s
        gxt_ref[pl.ds(s * B, B), :] = jnp.where(
            is_fwd_g,
            gx_ref[pl.ds(t_f * B, B), :],
            gx_ref[pl.ds(t_b * B, B), :])
        t_lane = jnp.where(is_fwd_h, t_f, t_b)                  # (1, 2H)
        mask_ref[pl.ds(s * B, B), :] = (t_lane < lengths).astype(jnp.float32)

    # Combined per-direction state: lanes 0:H forward, lanes H:2H backward.
    h = jnp.zeros((B, H2), jnp.float32)
    c = jnp.zeros((B, H2), jnp.float32)

    # ---- fused, fully-unrolled recurrence (fwd at t=s, bwd at t=T-1-s) -----
    # TODO(synk): on v7x, wh could be held resident in MXU staging regs
    # (pltpu.matmul_push_rhs once, matmul_acc_lhs/matmul_pop per step) to avoid
    # re-streaming the (2H, 8H) RHS on every serial step.
    for s in range(T):
        off = s * B
        gates = gxt_ref[pl.ds(off, B), :] + jnp.dot(
            h, wh, preferred_element_type=jnp.float32)           # (B, 8H)

        # [i|f|o] sigmoids batched into one 3*2H-lane EUP op; tanh group last.
        sig = jax.nn.sigmoid(gates[:, 0:3 * H2])
        g_g = jnp.tanh(gates[:, 3 * H2:4 * H2])
        i_g = sig[:, 0 * H2:1 * H2]
        f_g = sig[:, 1 * H2:2 * H2]
        o_g = sig[:, 2 * H2:3 * H2]
        c_new = f_g * c + i_g * g_g
        h_new = o_g * jnp.tanh(c_new)

        # Packed-sequence masking (forward lanes at t=s, backward at t=T-1-s).
        valid = mask_ref[pl.ds(off, B), :] > 0.0                 # (B, 2H)
        h_out = jnp.where(valid, h_new, 0.0)   # padded outputs are zero
        h = jnp.where(valid, h_new, h)         # state frozen past the length
        c = jnp.where(valid, c_new, c)

        # Scatter hidden outputs to their time-indexed rows; fc happens once
        # after the loop instead of 2 tiny N=2 matmuls per step.
        h_ref[pl.ds(s * B, B), pl.ds(0, H)] = h_out[:, 0:H]            # t = s
        h_ref[pl.ds((T - 1 - s) * B, B), pl.ds(H, H)] = h_out[:, H:H2]  # t = T-1-s

    # ---- single fc matmul + single consolidated output store ---------------
    out_ref[...] = (jnp.dot(h_ref[...], wfc_ref[...],
                            preferred_element_type=jnp.float32) + bfc_ref[...])


def init_params(key, input_size=39, hidden_size=64):
    """Deterministic parameter init, torch nn.LSTM/Linear-style uniform(-k, k)."""
    H, D = hidden_size, input_size
    k_lstm = 1.0 / jnp.sqrt(H)
    k_fc = 1.0 / jnp.sqrt(2 * H)
    keys = jax.random.split(key, 10)

    def u(k, shape, bound):
        return jax.random.uniform(k, shape, jnp.float32, -bound, bound)

    return {
        # stored already transposed (torch weight.T); gate order i, f, g, o
        "wi_f": u(keys[0], (D, 4 * H), k_lstm),
        "wh_f": u(keys[1], (H, 4 * H), k_lstm),
        "b_f": u(keys[2], (1, 4 * H), k_lstm) + u(keys[3], (1, 4 * H), k_lstm),
        "wi_b": u(keys[4], (D, 4 * H), k_lstm),
        "wh_b": u(keys[5], (H, 4 * H), k_lstm),
        "b_b": u(keys[6], (1, 4 * H), k_lstm) + u(keys[7], (1, 4 * H), k_lstm),
        "w_fc": u(keys[8], (2 * H, 2), k_fc),
        "b_fc": u(keys[9], (1, 2), k_fc),
    }


def _pack_params(params):
    """Pack per-direction LSTM weights into the kernel's fused layout."""
    H = params["wh_f"].shape[0]
    # torch column order per direction is [i, f, g, o]; the kernel wants the
    # sigmoid groups contiguous and tanh last: [i | f | o | g], each group laid
    # out [fwd H lanes | bwd H lanes].
    perm = np.concatenate(
        [np.concatenate([np.arange(g * H, (g + 1) * H),
                         4 * H + np.arange(g * H, (g + 1) * H)])
         for g in (0, 1, 3, 2)])
    wi = jnp.concatenate([params["wi_f"], params["wi_b"]], axis=1)[:, perm]
    zero = jnp.zeros((H, 4 * H), jnp.float32)
    wh = jnp.concatenate(
        [jnp.concatenate([params["wh_f"], zero], axis=1),
         jnp.concatenate([zero, params["wh_b"]], axis=1)], axis=0)[:, perm]
    b = jnp.concatenate([params["b_f"], params["b_b"]], axis=1)[:, perm]
    return wi, wh, b


def bilstm_forward(x, lengths, params, max_len=None):
    """x: (B, T, D) f32 batch-first; lengths: (B,) i32; max_len: static python
    int = max(lengths) (pad_packed_sequence output length). Returns (B, max_len, 2)."""
    B, T, D = x.shape
    if max_len is None:
        max_len = T
    H = params["wh_f"].shape[0]
    wi_p, wh_p, b_p = _pack_params(params)

    # Time-major, flattened over (time, batch): the kernel does a single input
    # projection matmul and slices per-step rows with pl.ds(s*B, B).
    x2d = jnp.transpose(x.astype(jnp.float32), (1, 0, 2)).reshape(T * B, D)
    len2d = lengths.astype(jnp.int32).reshape(B, 1)

    # TODO(synk): scaling levers (not needed at B=3, T=8, fully VMEM-resident):
    #  * v6e/v7x: cast x2d / wi / wh matmul operands to bf16 (keep f32 accum &
    #    activations); loosen the 1e-4 tolerance accordingly.
    #  * large B/T: add a batch grid axis with dimension_semantics=("parallel",),
    #    time-chunk the gx precompute (pltpu.emit_pipeline) so the (T*B, 8H)
    #    scratch fits v7x's 64 MiB VMEM, and raise vmem_limit_bytes on v5e/v6e.
    #  * at scale, emit a lane-dense output layout instead of last-dim 2.
    out2d = pl.pallas_call(
        _bilstm_kernel,
        out_shape=jax.ShapeDtypeStruct((T * B, 2), jnp.float32),
        scratch_shapes=[
            pltpu.VMEM((T * B, 8 * H), jnp.float32),   # gx  (input projection)
            pltpu.VMEM((T * B, 8 * H), jnp.float32),   # gxt (direction-merged)
            pltpu.VMEM((T * B, 2 * H), jnp.float32),   # packed-seq masks
            pltpu.VMEM((T * B, 2 * H), jnp.float32),   # per-time hidden outputs
        ],
    )(x2d, len2d, wi_p, wh_p, b_p, params["w_fc"], params["b_fc"])

    out = jnp.transpose(out2d.reshape(T, B, 2), (1, 0, 2))    # (B, T, 2), tiny
    return out[:, :max_len, :]


def bilstm_reference(x, lengths, params, max_len):
    """Pure-JAX reference with identical packed-sequence semantics."""
    B, T, D = x.shape
    H = params["wh_f"].shape[0]
    len2d = lengths.astype(jnp.int32).reshape(B, 1)

    def run(direction):
        wi = params["wi_" + direction]
        wh = params["wh_" + direction]
        b = params["b_" + direction]

        def step(carry, t):
            h, c = carry
            x_t = x[:, t, :]
            gates = x_t @ wi + h @ wh + b
            i_g = jax.nn.sigmoid(gates[:, 0:H])
            f_g = jax.nn.sigmoid(gates[:, H:2 * H])
            g_g = jnp.tanh(gates[:, 2 * H:3 * H])
            o_g = jax.nn.sigmoid(gates[:, 3 * H:4 * H])
            c_new = f_g * c + i_g * g_g
            h_new = o_g * jnp.tanh(c_new)
            mask = t < len2d
            h_out = jnp.where(mask, h_new, 0.0)
            return (jnp.where(mask, h_new, h), jnp.where(mask, c_new, c)), h_out

        ts = jnp.arange(T) if direction == "f" else jnp.arange(T - 1, -1, -1)
        init = (jnp.zeros((B, H), jnp.float32), jnp.zeros((B, H), jnp.float32))
        _, outs = jax.lax.scan(step, init, ts)               # (T, B, H)
        if direction == "b":
            outs = outs[::-1]
        return jnp.transpose(outs, (1, 0, 2))                # (B, T, H)

    h_all = jnp.concatenate([run("f"), run("b")], axis=-1)   # (B, T, 2H)
    out = h_all @ params["w_fc"] + params["b_fc"]
    return out[:, :max_len, :]


if __name__ == "__main__":
    key = jax.random.PRNGKey(0)
    k_param, k_x = jax.random.split(key)

    B, T, D, H = 3, 8, 39, 64
    params = init_params(k_param, input_size=D, hidden_size=H)

    x = jax.random.normal(k_x, (B, T, D), dtype=jnp.float32)
    lengths_py = [8, 5, 3]
    lengths = jnp.array(lengths_py, dtype=jnp.int32)
    max_len = max(lengths_py)            # static, no device sync

    fwd = jax.jit(bilstm_forward, static_argnums=(3,))
    out = jax.block_until_ready(fwd(x, lengths, params, max_len))
    ref = jax.block_until_ready(bilstm_reference(x, lengths, params, max_len))

    assert out.shape == (B, max_len, 2), out.shape
    err = float(jnp.max(jnp.abs(out - ref)))
    assert err < 1e-4, err

    print("KERNEL_OK")
</pallas_src>

<mosaic_0001>
module attributes {stable_mosaic.version = 11 : i64} {
  func.func @_bilstm_kernel(%arg0: memref<24x39xf32, #tpu.memory_space<vmem>>, %arg1: memref<3x1xi32, #tpu.memory_space<vmem>>, %arg2: memref<39x512xf32, #tpu.memory_space<vmem>>, %arg3: memref<128x512xf32, #tpu.memory_space<vmem>>, %arg4: memref<1x512xf32, #tpu.memory_space<vmem>>, %arg5: memref<128x2xf32, #tpu.memory_space<vmem>>, %arg6: memref<1x2xf32, #tpu.memory_space<vmem>>, %arg7: memref<24x2xf32, #tpu.memory_space<vmem>>, %arg8: memref<24x512xf32, #tpu.memory_space<vmem>>, %arg9: memref<24x512xf32, #tpu.memory_space<vmem>>, %arg10: memref<24x128xf32, #tpu.memory_space<vmem>>, %arg11: memref<24x128xf32, #tpu.memory_space<vmem>>) attributes {dimension_semantics = [], scalar_prefetch = 0 : i64, scratch_operands = 4 : i64, tpu.core_type = #tpu.core_type<tc>} {
    %c0 = arith.constant 0 : index
    %c0_0 = arith.constant 0 : index
    %0 = vector.load %arg1[%c0, %c0_0] : memref<3x1xi32, #tpu.memory_space<vmem>>, vector<3x1xi32>
    %c0_1 = arith.constant 0 : index
    %c0_2 = arith.constant 0 : index
    %1 = vector.load %arg2[%c0_1, %c0_2] : memref<39x512xf32, #tpu.memory_space<vmem>>, vector<39x512xf32>
    %c0_3 = arith.constant 0 : index
    %c0_4 = arith.constant 0 : index
    %2 = vector.load %arg3[%c0_3, %c0_4] : memref<128x512xf32, #tpu.memory_space<vmem>>, vector<128x512xf32>
    %c0_5 = arith.constant 0 : index
    %c0_6 = arith.constant 0 : index
    %3 = vector.load %arg4[%c0_5, %c0_6] : memref<1x512xf32, #tpu.memory_space<vmem>>, vector<1x512xf32>
    %4 = tpu.iota {dimensions = array<i32: 1>} : vector<1x128xi32>
    %c64_i32 = arith.constant 64 : i32
    %5 = vector.broadcast %c64_i32 : i32 to vector<1x128xi32>
    %6 = arith.cmpi slt, %4, %5 : vector<1x128xi32>
    %7 = tpu.concatenate %6, %6, %6, %6 in 1 : vector<1x128xi1>, vector<1x128xi1>, vector<1x128xi1>, vector<1x128xi1> -> vector<1x512xi1>
    %c0_7 = arith.constant 0 : index
    %c0_8 = arith.constant 0 : index
    %8 = vector.load %arg0[%c0_7, %c0_8] : memref<24x39xf32, #tpu.memory_space<vmem>>, vector<24x39xf32>
    %cst = arith.constant dense<0.000000e+00> : vector<24x512xf32>
    %9 = tpu.matmul %8, %1, %cst {dimension_numbers = #tpu.dot_dimension_numbers<[1], [0], [0], [1], [0, 0, 1, 1], [], []>} : vector<24x39xf32>, vector<39x512xf32>, vector<24x512xf32> -> vector<24x512xf32>
    %10 = vector.broadcast %3 : vector<1x512xf32> to vector<24x512xf32>
    %11 = arith.addf %9, %10 : vector<24x512xf32>
    %c0_9 = arith.constant 0 : index
    %c0_10 = arith.constant 0 : index
    %12 = vector.load %arg8[%c0_9, %c0_10] : memref<24x512xf32, #tpu.memory_space<vmem>>, vector<24x512xf32>
    tpu.vector_store %arg8[%c0_9, %c0_10], %11 {strides = array<i32>} : memref<24x512xf32, #tpu.memory_space<vmem>>, vector<24x512xf32>,
    %c0_11 = arith.constant 0 : index
    %c0_12 = arith.constant 0 : index
    %13 = vector.load %arg8[%c0_11, %c0_12] : memref<24x512xf32, #tpu.memory_space<vmem>>, vector<3x512xf32>
    %c21 = arith.constant 21 : index
    %c0_13 = arith.constant 0 : index
    %14 = vector.load %arg8[%c21, %c0_13] : memref<24x512xf32, #tpu.memory_space<vmem>>, vector<3x512xf32>
    %15 = vector.shape_cast %7 : vector<1x512xi1> to vector<1x512xi1>
    %16 = vector.broadcast %15 : vector<1x512xi1> to vector<3x512xi1>
    %17 = arith.select %16, %13, %14 : vector<3x512xi1>, vector<3x512xf32>
    %c0_14 = arith.constant 0 : index
    %c0_15 = arith.constant 0 : index
    %18 = vector.load %arg9[%c0_14, %c0_15] : memref<24x512xf32, #tpu.memory_space<vmem>>, vector<3x512xf32>
    tpu.vector_store %arg9[%c0_14, %c0_15], %17 {strides = array<i32>} : memref<24x512xf32, #tpu.memory_space<vmem>>, vector<3x512xf32>,
    %c0_i32 = arith.constant 0 : i32
    %c7_i32 = arith.constant 7 : i32
    %19 = vector.broadcast %c0_i32 : i32 to vector<1x128xi32>
    %20 = vector.broadcast %c7_i32 : i32 to vector<1x128xi32>
    %21 = arith.select %6, %19, %20 : vector<1x128xi1>, vector<1x128xi32>
    %22 = vector.broadcast %21 : vector<1x128xi32> to vector<3x128xi32>
    %23 = vector.broadcast %0 : vector<3x1xi32> to vector<3x128xi32>
    %24 = arith.cmpi slt, %22, %23 : vector<3x128xi32>
    %25 = arith.extui %24 : vector<3x128xi1> to vector<3x128xi32>
    %26 = arith.sitofp %25 : vector<3x128xi32> to vector<3x128xf32>
    %c0_16 = arith.constant 0 : index
    %c0_17 = arith.constant 0 : index
    %27 = vector.load %arg10[%c0_16, %c0_17] : memref<24x128xf32, #tpu.memory_space<vmem>>, vector<3x128xf32>
    tpu.vector_store %arg10[%c0_16, %c0_17], %26 {strides = array<i32>} : memref<24x128xf32, #tpu.memory_space<vmem>>, vector<3x128xf32>,
    %c3 = arith.constant 3 : index
    %c0_18 = arith.constant 0 : index
    %28 = vector.load %arg8[%c3, %c0_18] : memref<24x512xf32, #tpu.memory_space<vmem>>, vector<3x512xf32>
    %c18 = arith.constant 18 : index
    %c0_19 = arith.constant 0 : index
    %29 = vector.load %arg8[%c18, %c0_19] : memref<24x512xf32, #tpu.memory_space<vmem>>, vector<3x512xf32>
    %30 = vector.shape_cast %7 : vector<1x512xi1> to vector<1x512xi1>
    %31 = vector.broadcast %30 : vector<1x512xi1> to vector<3x512xi1>
    %32 = arith.select %31, %28, %29 : vector<3x512xi1>, vector<3x512xf32>
    %c3_20 = arith.constant 3 : index
    %c0_21 = arith.constant 0 : index
    %33 = vector.load %arg9[%c3_20, %c0_21] : memref<24x512xf32, #tpu.memory_space<vmem>>, vector<3x512xf32>
    tpu.vector_store %arg9[%c3_20, %c0_21], %32 {strides = array<i32>} : memref<24x512xf32, #tpu.memory_space<vmem>>, vector<3x512xf32>,
    %c1_i32 = arith.constant 1 : i32
    %c6_i32 = arith.constant 6 : i32
    %34 = vector.broadcast %c1_i32 : i32 to vector<1x128xi32>
    %35 = vector.broadcast %c6_i32 : i32 to vector<1x128xi32>
    %36 = arith.select %6, %34, %35 : vector<1x128xi1>, vector<1x128xi32>
    %37 = vector.broadcast %36 : vector<1x128xi32> to vector<3x128xi32>
    %38 = vector.broadcast %0 : vector<3x1xi32> to vector<3x128xi32>
    %39 = arith.cmpi slt, %37, %38 : vector<3x128xi32>
    %40 = arith.extui %39 : vector<3x128xi1> to vector<3x128xi32>
    %41 = arith.sitofp %40 : vector<3x128xi32> to vector<3x128xf32>
    %c3_22 = arith.constant 3 : index
    %c0_23 = arith.constant 0 : index
    %42 = vector.load %arg10[%c3_22, %c0_23] : memref<24x128xf32, #tpu.memory_space<vmem>>, vector<3x128xf32>
    tpu.vector_store %arg10[%c3_22, %c0_23], %41 {strides = array<i32>} : memref<24x128xf32, #tpu.memory_space<vmem>>, vector<3x128xf32>,
    %c6 = arith.constant 6 : index
    %c0_24 = arith.constant 0 : index
    %43 = vector.load %arg8[%c6, %c0_24] : memref<24x512xf32, #tpu.memory_space<vmem>>, vector<3x512xf32>
    %c15 = arith.constant 15 : index
    %c0_25 = arith.constant 0 : index
    %44 = vector.load %arg8[%c15, %c0_25] : memref<24x512xf32, #tpu.memory_space<vmem>>, vector<3x512xf32>
    %45 = vector.shape_cast %7 : vector<1x512xi1> to vector<1x512xi1>
    %46 = vector.broadcast %45 : vector<1x512xi1> to vector<3x512xi1>
    %47 = arith.select %46, %43, %44 : vector<3x512xi1>, vector<3x512xf32>
    %c6_26 = arith.constant 6 : index
    %c0_27 = arith.constant 0 : index
    %48 = vector.load %arg9[%c6_26, %c0_27] : memref<24x512xf32, #tpu.memory_space<vmem>>, vector<3x512xf32>
    tpu.vector_store %arg9[%c6_26, %c0_27], %47 {strides = array<i32>} : memref<24x512xf32, #tpu.memory_space<vmem>>, vector<3x512xf32>,
    %c2_i32 = arith.constant 2 : i32
    %c5_i32 = arith.constant 5 : i32
    %49 = vector.broadcast %c2_i32 : i32 to vector<1x128xi32>
    %50 = vector.broadcast %c5_i32 : i32 to vector<1x128xi32>
    %51 = arith.select %6, %49, %50 : vector<1x128xi1>, vector<1x128xi32>
    %52 = vector.broadcast %51 : vector<1x128xi32> to vector<3x128xi32>
    %53 = vector.broadcast %0 : vector<3x1xi32> to vector<3x128xi32>
    %54 = arith.cmpi slt, %52, %53 : vector<3x128xi32>
    %55 = arith.extui %54 : vector<3x128xi1> to vector<3x128xi32>
    %56 = arith.sitofp %55 : vector<3x128xi32> to vector<3x128xf32>
    %c6_28 = arith.constant 6 : index
    %c0_29 = arith.constant 0 : index
    %57 = vector.load %arg10[%c6_28, %c0_29] : memref<24x128xf32, #tpu.memory_space<vmem>>, vector<3x128xf32>
    tpu.vector_store %arg10[%c6_28, %c0_29], %56 {strides = array<i32>} : memref<24x128xf32, #tpu.memory_space<vmem>>, vector<3x128xf32>,
    %c9 = arith.constant 9 : index
    %c0_30 = arith.constant 0 : index
    %58 = vector.load %arg8[%c9, %c0_30] : memref<24x512xf32, #tpu.memory_space<vmem>>, vector<3x512xf32>
    %c12 = arith.constant 12 : index
    %c0_31 = arith.constant 0 : index
    %59 = vector.load %arg8[%c12, %c0_31] : memref<24x512xf32, #tpu.memory_space<vmem>>, vector<3x512xf32>
    %60 = vector.shape_cast %7 : vector<1x512xi1> to vector<1x512xi1>
    %61 = vector.broadcast %60 : vector<1x512xi1> to vector<3x512xi1>
    %62 = arith.select %61, %58, %59 : vector<3x512xi1>, vector<3x512xf32>
    %c9_32 = arith.constant 9 : index
    %c0_33 = arith.constant 0 : index
    %63 = vector.load %arg9[%c9_32, %c0_33] : memref<24x512xf32, #tpu.memory_space<vmem>>, vector<3x512xf32>
    tpu.vector_store %arg9[%c9_32, %c0_33], %62 {strides = array<i32>} : memref<24x512xf32, #tpu.memory_space<vmem>>, vector<3x512xf32>,
    %c3_i32 = arith.constant 3 : i32
    %c4_i32 = arith.constant 4 : i32
    %64 = vector.broadcast %c3_i32 : i32 to vector<1x128xi32>
    %65 = vector.broadcast %c4_i32 : i32 to vector<1x128xi32>
    %66 = arith.select %6, %64, %65 : vector<1x128xi1>, vector<1x128xi32>
    %67 = vector.broadcast %66 : vector<1x128xi32> to vector<3x128xi32>
    %68 = vector.broadcast %0 : vector<3x1xi32> to vector<3x128xi32>
    %69 = arith.cmpi slt, %67, %68 : vector<3x128xi32>
    %70 = arith.extui %69 : vector<3x128xi1> to vector<3x128xi32>
    %71 = arith.sitofp %70 : vector<3x128xi32> to vector<3x128xf32>
    %c9_34 = arith.constant 9 : index
    %c0_35 = arith.constant 0 : index
    %72 = vector.load %arg10[%c9_34, %c0_35] : memref<24x128xf32, #tpu.memory_space<vmem>>, vector<3x128xf32>
    tpu.vector_store %arg10[%c9_34, %c0_35], %71 {strides = array<i32>} : memref<24x128xf32, #tpu.memory_space<vmem>>, vector<3x128xf32>,
    %c12_36 = arith.constant 12 : index
    %c0_37 = arith.constant 0 : index
    %73 = vector.load %arg8[%c12_36, %c0_37] : memref<24x512xf32, #tpu.memory_space<vmem>>, vector<3x512xf32>
    %c9_38 = arith.constant 9 : index
    %c0_39 = arith.constant 0 : index
    %74 = vector.load %arg8[%c9_38, %c0_39] : memref<24x512xf32, #tpu.memory_space<vmem>>, vector<3x512xf32>
    %75 = vector.shape_cast %7 : vector<1x512xi1> to vector<1x512xi1>
    %76 = vector.broadcast %75 : vector<1x512xi1> to vector<3x512xi1>
    %77 = arith.select %76, %73, %74 : vector<3x512xi1>, vector<3x512xf32>
    %c12_40 = arith.constant 12 : index
    %c0_41 = arith.constant 0 : index
    %78 = vector.load %arg9[%c12_40, %c0_41] : memref<24x512xf32, #tpu.memory_space<vmem>>, vector<3x512xf32>
    tpu.vector_store %arg9[%c12_40, %c0_41], %77 {strides = array<i32>} : memref<24x512xf32, #tpu.memory_space<vmem>>, vector<3x512xf32>,
    %c4_i32_42 = arith.constant 4 : i32
    %c3_i32_43 = arith.constant 3 : i32
    %79 = vector.broadcast %c4_i32_42 : i32 to vector<1x128xi32>
    %80 = vector.broadcast %c3_i32_43 : i32 to vector<1x128xi32>
    %81 = arith.select %6, %79, %80 : vector<1x128xi1>, vector<1x128xi32>
    %82 = vector.broadcast %81 : vector<1x128xi32> to vector<3x128xi32>
    %83 = vector.broadcast %0 : vector<3x1xi32> to vector<3x128xi32>
    %84 = arith.cmpi slt, %82, %83 : vector<3x128xi32>
    %85 = arith.extui %84 : vector<3x128xi1> to vector<3x128xi32>
    %86 = arith.sitofp %85 : vector<3x128xi32> to vector<3x128xf32>
    %c12_44 = arith.constant 12 : index
    %c0_45 = arith.constant 0 : index
    %87 = vector.load %arg10[%c12_44, %c0_45] : memref<24x128xf32, #tpu.memory_space<vmem>>, vector<3x128xf32>
    tpu.vector_store %arg10[%c12_44, %c0_45], %86 {strides = array<i32>} : memref<24x128xf32, #tpu.memory_space<vmem>>, vector<3x128xf32>,
    %c15_46 = arith.constant 15 : index
    %c0_47 = arith.constant 0 : index
    %88 = vector.load %arg8[%c15_46, %c0_47] : memref<24x512xf32, #tpu.memory_space<vmem>>, vector<3x512xf32>
    %c6_48 = arith.constant 6 : index
    %c0_49 = arith.constant 0 : index
    %89 = vector.load %arg8[%c6_48, %c0_49] : memref<24x512xf32, #tpu.memory_space<vmem>>, vector<3x512xf32>
    %90 = vector.shape_cast %7 : vector<1x512xi1> to vector<1x512xi1>
    %91 = vector.broadcast %90 : vector<1x512xi1> to vector<3x512xi1>
    %92 = arith.select %91, %88, %89 : vector<3x512xi1>, vector<3x512xf32>
    %c15_50 = arith.constant 15 : index
    %c0_51 = arith.constant 0 : index
    %93 = vector.load %arg9[%c15_50, %c0_51] : memref<24x512xf32, #tpu.memory_space<vmem>>, vector<3x512xf32>
    tpu.vector_store %arg9[%c15_50, %c0_51], %92 {strides = array<i32>} : memref<24x512xf32, #tpu.memory_space<vmem>>, vector<3x512xf32>,
    %c5_i32_52 = arith.constant 5 : i32
    %c2_i32_53 = arith.constant 2 : i32
    %94 = vector.broadcast %c5_i32_52 : i32 to vector<1x128xi32>
    %95 = vector.broadcast %c2_i32_53 : i32 to vector<1x128xi32>
    %96 = arith.select %6, %94, %95 : vector<1x128xi1>, vector<1x128xi32>
    %97 = vector.broadcast %96 : vector<1x128xi32> to vector<3x128xi32>
    %98 = vector.broadcast %0 : vector<3x1xi32> to vector<3x128xi32>
    %99 = arith.cmpi slt, %97, %98 : vector<3x128xi32>
    %100 = arith.extui %99 : vector<3x128xi1> to vector<3x128xi32>
    %101 = arith.sitofp %100 : vector<3x128xi32> to vector<3x128xf32>
    %c15_54 = arith.constant 15 : index
    %c0_55 = arith.constant 0 : index
    %102 = vector.load %arg10[%c15_54, %c0_55] : memref<24x128xf32, #tpu.memory_space<vmem>>, vector<3x128xf32>
    tpu.vector_store %arg10[%c15_54, %c0_55], %101 {strides = array<i32>} : memref<24x128xf32, #tpu.memory_space<vmem>>, vector<3x128xf32>,
    %c18_56 = arith.constant 18 : index
    %c0_57 = arith.constant 0 : index
    %103 = vector.load %arg8[%c18_56, %c0_57] : memref<24x512xf32, #tpu.memory_space<vmem>>, vector<3x512xf32>
    %c3_58 = arith.constant 3 : index
    %c0_59 = arith.constant 0 : index
    %104 = vector.load %arg8[%c3_58, %c0_59] : memref<24x512xf32, #tpu.memory_space<vmem>>, vector<3x512xf32>
    %105 = vector.shape_cast %7 : vector<1x512xi1> to vector<1x512xi1>
    %106 = vector.broadcast %105 : vector<1x512xi1> to vector<3x512xi1>
    %107 = arith.select %106, %103, %104 : vector<3x512xi1>, vector<3x512xf32>
    %c18_60 = arith.constant 18 : index
    %c0_61 = arith.constant 0 : index
    %108 = vector.load %arg9[%c18_60, %c0_61] : memref<24x512xf32, #tpu.memory_space<vmem>>, vector<3x512xf32>
    tpu.vector_store %arg9[%c18_60, %c0_61], %107 {strides = array<i32>} : memref<24x512xf32, #tpu.memory_space<vmem>>, vector<3x512xf32>,
    %c6_i32_62 = arith.constant 6 : i32
    %c1_i32_63 = arith.constant 1 : i32
    %109 = vector.broadcast %c6_i32_62 : i32 to vector<1x128xi32>
    %110 = vector.broadcast %c1_i32_63 : i32 to vector<1x128xi32>
    %111 = arith.select %6, %109, %110 : vector<1x128xi1>, vector<1x128xi32>
    %112 = vector.broadcast %111 : vector<1x128xi32> to vector<3x128xi32>
    %113 = vector.broadcast %0 : vector<3x1xi32> to vector<3x128xi32>
    %114 = arith.cmpi slt, %112, %113 : vector<3x128xi32>
    %115 = arith.extui %114 : vector<3x128xi1> to vector<3x128xi32>
    %116 = arith.sitofp %115 : vector<3x128xi32> to vector<3x128xf32>
    %c18_64 = arith.constant 18 : index
    %c0_65 = arith.constant 0 : index
    %117 = vector.load %arg10[%c18_64, %c0_65] : memref<24x128xf32, #tpu.memory_space<vmem>>, vector<3x128xf32>
    tpu.vector_store %arg10[%c18_64, %c0_65], %116 {strides = array<i32>} : memref<24x128xf32, #tpu.memory_space<vmem>>, vector<3x128xf32>,
    %c21_66 = arith.constant 21 : index
    %c0_67 = arith.constant 0 : index
    %118 = vector.load %arg8[%c21_66, %c0_67] : memref<24x512xf32, #tpu.memory_space<vmem>>, vector<3x512xf32>
    %c0_68 = arith.constant 0 : index
    %c0_69 = arith.constant 0 : index
    %119 = vector.load %arg8[%c0_68, %c0_69] : memref<24x512xf32, #tpu.memory_space<vmem>>, vector<3x512xf32>
    %120 = vector.shape_cast %7 : vector<1x512xi1> to vector<1x512xi1>
    %121 = vector.broadcast %120 : vector<1x512xi1> to vector<3x512xi1>
    %122 = arith.select %121, %118, %119 : vector<3x512xi1>, vector<3x512xf32>
    %c21_70 = arith.constant 21 : index
    %c0_71 = arith.constant 0 : index
    %123 = vector.load %arg9[%c21_70, %c0_71] : memref<24x512xf32, #tpu.memory_space<vmem>>, vector<3x512xf32>
    tpu.vector_store %arg9[%c21_70, %c0_71], %122 {strides = array<i32>} : memref<24x512xf32, #tpu.memory_space<vmem>>, vector<3x512xf32>,
    %c7_i32_72 = arith.constant 7 : i32
    %c0_i32_73 = arith.constant 0 : i32
    %124 = vector.broadcast %c7_i32_72 : i32 to vector<1x128xi32>
    %125 = vector.broadcast %c0_i32_73 : i32 to vector<1x128xi32>
    %126 = arith.select %6, %124, %125 : vector<1x128xi1>, vector<1x128xi32>
    %127 = vector.broadcast %126 : vector<1x128xi32> to vector<3x128xi32>
    %128 = vector.broadcast %0 : vector<3x1xi32> to vector<3x128xi32>
    %129 = arith.cmpi slt, %127, %128 : vector<3x128xi32>
    %130 = arith.extui %129 : vector<3x128xi1> to vector<3x128xi32>
    %131 = arith.sitofp %130 : vector<3x128xi32> to vector<3x128xf32>
    %c21_74 = arith.constant 21 : index
    %c0_75 = arith.constant 0 : index
    %132 = vector.load %arg10[%c21_74, %c0_75] : memref<24x128xf32, #tpu.memory_space<vmem>>, vector<3x128xf32>
    tpu.vector_store %arg10[%c21_74, %c0_75], %131 {strides = array<i32>} : memref<24x128xf32, #tpu.memory_space<vmem>>, vector<3x128xf32>,
    %cst_76 = arith.constant 0.000000e+00 : f32
    %133 = vector.broadcast %cst_76 : f32 to vector<3x128xf32>
    %cst_77 = arith.constant 0.000000e+00 : f32
    %134 = vector.broadcast %cst_77 : f32 to vector<3x128xf32>
    %c0_78 = arith.constant 0 : index
    %c0_79 = arith.constant 0 : index
    %135 = vector.load %arg9[%c0_78, %c0_79] : memref<24x512xf32, #tpu.memory_space<vmem>>, vector<3x512xf32>
    %cst_80 = arith.constant dense<0.000000e+00> : vector<3x512xf32>
    %136 = tpu.matmul %133, %2, %cst_80 {dimension_numbers = #tpu.dot_dimension_numbers<[1], [0], [0], [1], [0, 0, 1, 1], [], []>} : vector<3x128xf32>, vector<128x512xf32>, vector<3x512xf32> -> vector<3x512xf32>
    %137 = arith.addf %135, %136 : vector<3x512xf32>
    %138 = vector.extract_strided_slice %137 {offsets = [0, 0], sizes = [3, 384], strides = [1, 1]} : vector<3x512xf32> to vector<3x384xf32>
    %139 = arith.negf %138 : vector<3x384xf32>
    %140 = math.exp %139 : vector<3x384xf32>
    %cst_81 = arith.constant 1.000000e+00 : f32
    %141 = vector.broadcast %cst_81 : f32 to vector<3x384xf32>
    %142 = arith.addf %141, %140 : vector<3x384xf32>
    %143 = arith.divf %141, %142 : vector<3x384xf32>
    %144 = vector.extract_strided_slice %137 {offsets = [0, 384], sizes = [3, 128], strides = [1, 1]} : vector<3x512xf32> to vector<3x128xf32>
    %145 = math.tanh %144 : vector<3x128xf32>
    %146 = vector.extract_strided_slice %143 {offsets = [0, 0], sizes = [3, 128], strides = [1, 1]} : vector<3x384xf32> to vector<3x128xf32>
    %147 = vector.extract_strided_slice %143 {offsets = [0, 128], sizes = [3, 128], strides = [1, 1]} : vector<3x384xf32> to vector<3x128xf32>
    %148 = vector.extract_strided_slice %143 {offsets = [0, 256], sizes = [3, 128], strides = [1, 1]} : vector<3x384xf32> to vector<3x128xf32>
    %149 = arith.mulf %147, %134 : vector<3x128xf32>
    %150 = arith.mulf %146, %145 : vector<3x128xf32>
    %151 = arith.addf %149, %150 : vector<3x128xf32>
    %152 = math.tanh %151 : vector<3x128xf32>
    %153 = arith.mulf %148, %152 : vector<3x128xf32>
    %c0_82 = arith.constant 0 : index
    %c0_83 = arith.constant 0 : index
    %154 = vector.load %arg10[%c0_82, %c0_83] : memref<24x128xf32, #tpu.memory_space<vmem>>, vector<3x128xf32>
    %cst_84 = arith.constant 0.000000e+00 : f32
    %155 = vector.broadcast %cst_84 : f32 to vector<3x128xf32>
    %156 = arith.cmpf ogt, %154, %155 : vector<3x128xf32>
    %cst_85 = arith.constant 0.000000e+00 : f32
    %157 = vector.broadcast %cst_85 : f32 to vector<3x128xf32>
    %158 = arith.select %156, %153, %157 : vector<3x128xi1>, vector<3x128xf32>
    %159 = arith.select %156, %153, %133 : vector<3x128xi1>, vector<3x128xf32>
    %160 = arith.select %156, %151, %134 : vector<3x128xi1>, vector<3x128xf32>
    %161 = vector.extract_strided_slice %158 {offsets = [0, 0], sizes = [3, 64], strides = [1, 1]} : vector<3x128xf32> to vector<3x64xf32>
    %c0_86 = arith.constant 0 : index
    %c0_87 = arith.constant 0 : index
    %162 = vector.load %arg11[%c0_86, %c0_87] : memref<24x128xf32, #tpu.memory_space<vmem>>, vector<3x64xf32>
    tpu.vector_store %arg11[%c0_86, %c0_87], %161 {strides = array<i32>} : memref<24x128xf32, #tpu.memory_space<vmem>>, vector<3x64xf32>,
    %163 = vector.extract_strided_slice %158 {offsets = [0, 64], sizes = [3, 64], strides = [1, 1]} : vector<3x128xf32> to vector<3x64xf32>
    %c21_88 = arith.constant 21 : index
    %c64 = arith.constant 64 : index
    %164 = vector.load %arg11[%c21_88, %c64] : memref<24x128xf32, #tpu.memory_space<vmem>>, vector<3x64xf32>
    tpu.vector_store %arg11[%c21_88, %c64], %163 {strides = array<i32>} : memref<24x128xf32, #tpu.memory_space<vmem>>, vector<3x64xf32>,
    %c3_89 = arith.constant 3 : index
    %c0_90 = arith.constant 0 : index
    %165 = vector.load %arg9[%c3_89, %c0_90] : memref<24x512xf32, #tpu.memory_space<vmem>>, vector<3x512xf32>
    %cst_91 = arith.constant dense<0.000000e+00> : vector<3x512xf32>
    %166 = tpu.matmul %159, %2, %cst_91 {dimension_numbers = #tpu.dot_dimension_numbers<[1], [0], [0], [1], [0, 0, 1, 1], [], []>} : vector<3x128xf32>, vector<128x512xf32>, vector<3x512xf32> -> vector<3x512xf32>
    %167 = arith.addf %165, %166 : vector<3x512xf32>
    %168 = vector.extract_strided_slice %167 {offsets = [0, 0], sizes = [3, 384], strides = [1, 1]} : vector<3x512xf32> to vector<3x384xf32>
    %169 = arith.negf %168 : vector<3x384xf32>
    %170 = math.exp %169 : vector<3x384xf32>
    %cst_92 = arith.constant 1.000000e+00 : f32
    %171 = vector.broadcast %cst_92 : f32 to vector<3x384xf32>
    %172 = arith.addf %171, %170 : vector<3x384xf32>
    %173 = arith.divf %171, %172 : vector<3x384xf32>
    %174 = vector.extract_strided_slice %167 {offsets = [0, 384], sizes = [3, 128], strides = [1, 1]} : vector<3x512xf32> to vector<3x128xf32>
    %175 = math.tanh %174 : vector<3x128xf32>
    %176 = vector.extract_strided_slice %173 {offsets = [0, 0], sizes = [3, 128], strides = [1, 1]} : vector<3x384xf32> to vector<3x128xf32>
    %177 = vector.extract_strided_slice %173 {offsets = [0, 128], sizes = [3, 128], strides = [1, 1]} : vector<3x384xf32> to vector<3x128xf32>
    %178 = vector.extract_strided_slice %173 {offsets = [0, 256], sizes = [3, 128], strides = [1, 1]} : vector<3x384xf32> to vector<3x128xf32>
    %179 = arith.mulf %177, %160 : vector<3x128xf32>
    %180 = arith.mulf %176, %175 : vector<3x128xf32>
    %181 = arith.addf %179, %180 : vector<3x128xf32>
    %182 = math.tanh %181 : vector<3x128xf32>
    %183 = arith.mulf %178, %182 : vector<3x128xf32>
    %c3_93 = arith.constant 3 : index
    %c0_94 = arith.constant 0 : index
    %184 = vector.load %arg10[%c3_93, %c0_94] : memref<24x128xf32, #tpu.memory_space<vmem>>, vector<3x128xf32>
    %cst_95 = arith.constant 0.000000e+00 : f32
    %185 = vector.broadcast %cst_95 : f32 to vector<3x128xf32>
    %186 = arith.cmpf ogt, %184, %185 : vector<3x128xf32>
    %cst_96 = arith.constant 0.000000e+00 : f32
    %187 = vector.broadcast %cst_96 : f32 to vector<3x128xf32>
    %188 = arith.select %186, %183, %187 : vector<3x128xi1>, vector<3x128xf32>
    %189 = arith.select %186, %183, %159 : vector<3x128xi1>, vector<3x128xf32>
    %190 = arith.select %186, %181, %160 : vector<3x128xi1>, vector<3x128xf32>
    %191 = vector.extract_strided_slice %188 {offsets = [0, 0], sizes = [3, 64], strides = [1, 1]} : vector<3x128xf32> to vector<3x64xf32>
    %c3_97 = arith.constant 3 : index
    %c0_98 = arith.constant 0 : index
    %192 = vector.load %arg11[%c3_97, %c0_98] : memref<24x128xf32, #tpu.memory_space<vmem>>, vector<3x64xf32>
    tpu.vector_store %arg11[%c3_97, %c0_98], %191 {strides = array<i32>} : memref<24x128xf32, #tpu.memory_space<vmem>>, vector<3x64xf32>,
    %193 = vector.extract_strided_slice %188 {offsets = [0, 64], sizes = [3, 64], strides = [1, 1]} : vector<3x128xf32> to vector<3x64xf32>
    %c18_99 = arith.constant 18 : index
    %c64_100 = arith.constant 64 : index
    %194 = vector.load %arg11[%c18_99, %c64_100] : memref<24x128xf32, #tpu.memory_space<vmem>>, vector<3x64xf32>
    tpu.vector_store %arg11[%c18_99, %c64_100], %193 {strides = array<i32>} : memref<24x128xf32, #tpu.memory_space<vmem>>, vector<3x64xf32>,
    %c6_101 = arith.constant 6 : index
    %c0_102 = arith.constant 0 : index
    %195 = vector.load %arg9[%c6_101, %c0_102] : memref<24x512xf32, #tpu.memory_space<vmem>>, vector<3x512xf32>
    %cst_103 = arith.constant dense<0.000000e+00> : vector<3x512xf32>
    %196 = tpu.matmul %189, %2, %cst_103 {dimension_numbers = #tpu.dot_dimension_numbers<[1], [0], [0], [1], [0, 0, 1, 1], [], []>} : vector<3x128xf32>, vector<128x512xf32>, vector<3x512xf32> -> vector<3x512xf32>
    %197 = arith.addf %195, %196 : vector<3x512xf32>
    %198 = vector.extract_strided_slice %197 {offsets = [0, 0], sizes = [3, 384], strides = [1, 1]} : vector<3x512xf32> to vector<3x384xf32>
    %199 = arith.negf %198 : vector<3x384xf32>
    %200 = math.exp %199 : vector<3x384xf32>
    %cst_104 = arith.constant 1.000000e+00 : f32
    %201 = vector.broadcast %cst_104 : f32 to vector<3x384xf32>
    %202 = arith.addf %201, %200 : vector<3x384xf32>
    %203 = arith.divf %201, %202 : vector<3x384xf32>
    %204 = vector.extract_strided_slice %197 {offsets = [0, 384], sizes = [3, 128], strides = [1, 1]} : vector<3x512xf32> to vector<3x128xf32>
    %205 = math.tanh %204 : vector<3x128xf32>
    %206 = vector.extract_strided_slice %203 {offsets = [0, 0], sizes = [3, 128], strides = [1, 1]} : vector<3x384xf32> to vector<3x128xf32>
    %207 = vector.extract_strided_slice %203 {offsets = [0, 128], sizes = [3, 128], strides = [1, 1]} : vector<3x384xf32> to vector<3x128xf32>
    %208 = vector.extract_strided_slice %203 {offsets = [0, 256], sizes = [3, 128], strides = [1, 1]} : vector<3x384xf32> to vector<3x128xf32>
    %209 = arith.mulf %207, %190 : vector<3x128xf32>
    %210 = arith.mulf %206, %205 : vector<3x128xf32>
    %211 = arith.addf %209, %210 : vector<3x128xf32>
    %212 = math.tanh %211 : vector<3x128xf32>
    %213 = arith.mulf %208, %212 : vector<3x128xf32>
    %c6_105 = arith.constant 6 : index
    %c0_106 = arith.constant 0 : index
    %214 = vector.load %arg10[%c6_105, %c0_106] : memref<24x128xf32, #tpu.memory_space<vmem>>, vector<3x128xf32>
    %cst_107 = arith.constant 0.000000e+00 : f32
    %215 = vector.broadcast %cst_107 : f32 to vector<3x128xf32>
    %216 = arith.cmpf ogt, %214, %215 : vector<3x128xf32>
    %cst_108 = arith.constant 0.000000e+00 : f32
    %217 = vector.broadcast %cst_108 : f32 to vector<3x128xf32>
    %218 = arith.select %216, %213, %217 : vector<3x128xi1>, vector<3x128xf32>
    %219 = arith.select %216, %213, %189 : vector<3x128xi1>, vector<3x128xf32>
    %220 = arith.select %216, %211, %190 : vector<3x128xi1>, vector<3x128xf32>
    %221 = vector.extract_strided_slice %218 {offsets = [0, 0], sizes = [3, 64], strides = [1, 1]} : vector<3x128xf32> to vector<3x64xf32>
    %c6_109 = arith.constant 6 : index
    %c0_110 = arith.constant 0 : index
    %222 = vector.load %arg11[%c6_109, %c0_110] : memref<24x128xf32, #tpu.memory_space<vmem>>, vector<3x64xf32>
    tpu.vector_store %arg11[%c6_109, %c0_110], %221 {strides = array<i32>} : memref<24x128xf32, #tpu.memory_space<vmem>>, vector<3x64xf32>,
    %223 = vector.extract_strided_slice %218 {offsets = [0, 64], sizes = [3, 64], strides = [1, 1]} : vector<3x128xf32> to vector<3x64xf32>
    %c15_111 = arith.constant 15 : index
    %c64_112 = arith.constant 64 : index
    %224 = vector.load %arg11[%c15_111, %c64_112] : memref<24x128xf32, #tpu.memory_space<vmem>>, vector<3x64xf32>
    tpu.vector_store %arg11[%c15_111, %c64_112], %223 {strides = array<i32>} : memref<24x128xf32, #tpu.memory_space<vmem>>, vector<3x64xf32>,
    %c9_113 = arith.constant 9 : index
    %c0_114 = arith.constant 0 : index
    %225 = vector.load %arg9[%c9_113, %c0_114] : memref<24x512xf32, #tpu.memory_space<vmem>>, vector<3x512xf32>
    %cst_115 = arith.constant dense<0.000000e+00> : vector<3x512xf32>
    %226 = tpu.matmul %219, %2, %cst_115 {dimension_numbers = #tpu.dot_dimension_numbers<[1], [0], [0], [1], [0, 0, 1, 1], [], []>} : vector<3x128xf32>, vector<128x512xf32>, vector<3x512xf32> -> vector<3x512xf32>
    %227 = arith.addf %225, %226 : vector<3x512xf32>
    %228 = vector.extract_strided_slice %227 {offsets = [0, 0], sizes = [3, 384], strides = [1, 1]} : vector<3x512xf32> to vector<3x384xf32>
    %229 = arith.negf %228 : vector<3x384xf32>
    %230 = math.exp %229 : vector<3x384xf32>
    %cst_116 = arith.constant 1.000000e+00 : f32
    %231 = vector.broadcast %cst_116 : f32 to vector<3x384xf32>
    %232 = arith.addf %231, %230 : vector<3x384xf32>
    %233 = arith.divf %231, %232 : vector<3x384xf32>
    %234 = vector.extract_strided_slice %227 {offsets = [0, 384], sizes = [3, 128], strides = [1, 1]} : vector<3x512xf32> to vector<3x128xf32>
    %235 = math.tanh %234 : vector<3x128xf32>
    %236 = vector.extract_strided_slice %233 {offsets = [0, 0], sizes = [3, 128], strides = [1, 1]} : vector<3x384xf32> to vector<3x128xf32>
    %237 = vector.extract_strided_slice %233 {offsets = [0, 128], sizes = [3, 128], strides = [1, 1]} : vector<3x384xf32> to vector<3x128xf32>
    %238 = vector.extract_strided_slice %233 {offsets = [0, 256], sizes = [3, 128], strides = [1, 1]} : vector<3x384xf32> to vector<3x128xf32>
    %239 = arith.mulf %237, %220 : vector<3x128xf32>
    %240 = arith.mulf %236, %235 : vector<3x128xf32>
    %241 = arith.addf %239, %240 : vector<3x128xf32>
    %242 = math.tanh %241 : vector<3x128xf32>
    %243 = arith.mulf %238, %242 : vector<3x128xf32>
    %c9_117 = arith.constant 9 : index
    %c0_118 = arith.constant 0 : index
    %244 = vector.load %arg10[%c9_117, %c0_118] : memref<24x128xf32, #tpu.memory_space<vmem>>, vector<3x128xf32>
    %cst_119 = arith.constant 0.000000e+00 : f32
    %245 = vector.broadcast %cst_119 : f32 to vector<3x128xf32>
    %246 = arith.cmpf ogt, %244, %245 : vector<3x128xf32>
    %cst_120 = arith.constant 0.000000e+00 : f32
    %247 = vector.broadcast %cst_120 : f32 to vector<3x128xf32>
    %248 = arith.select %246, %243, %247 : vector<3x128xi1>, vector<3x128xf32>
    %249 = arith.select %246, %243, %219 : vector<3x128xi1>, vector<3x128xf32>
    %250 = arith.select %246, %241, %220 : vector<3x128xi1>, vector<3x128xf32>
    %251 = vector.extract_strided_slice %248 {offsets = [0, 0], sizes = [3, 64], strides = [1, 1]} : vector<3x128xf32> to vector<3x64xf32>
    %c9_121 = arith.constant 9 : index
    %c0_122 = arith.constant 0 : index
    %252 = vector.load %arg11[%c9_121, %c0_122] : memref<24x128xf32, #tpu.memory_space<vmem>>, vector<3x64xf32>
    tpu.vector_store %arg11[%c9_121, %c0_122], %251 {strides = array<i32>} : memref<24x128xf32, #tpu.memory_space<vmem>>, vector<3x64xf32>,
    %253 = vector.extract_strided_slice %248 {offsets = [0, 64], sizes = [3, 64], strides = [1, 1]} : vector<3x128xf32> to vector<3x64xf32>
    %c12_123 = arith.constant 12 : index
    %c64_124 = arith.constant 64 : index
    %254 = vector.load %arg11[%c12_123, %c64_124] : memref<24x128xf32, #tpu.memory_space<vmem>>, vector<3x64xf32>
    tpu.vector_store %arg11[%c12_123, %c64_124], %253 {strides = array<i32>} : memref<24x128xf32, #tpu.memory_space<vmem>>, vector<3x64xf32>,
    %c12_125 = arith.constant 12 : index
    %c0_126 = arith.constant 0 : index
    %255 = vector.load %arg9[%c12_125, %c0_126] : memref<24x512xf32, #tpu.memory_space<vmem>>, vector<3x512xf32>
    %cst_127 = arith.constant dense<0.000000e+00> : vector<3x512xf32>
    %256 = tpu.matmul %249, %2, %cst_127 {dimension_numbers = #tpu.dot_dimension_numbers<[1], [0], [0], [1], [0, 0, 1, 1], [], []>} : vector<3x128xf32>, vector<128x512xf32>, vector<3x512xf32> -> vector<3x512xf32>
    %257 = arith.addf %255, %256 : vector<3x512xf32>
    %258 = vector.extract_strided_slice %257 {offsets = [0, 0], sizes = [3, 384], strides = [1, 1]} : vector<3x512xf32> to vector<3x384xf32>
    %259 = arith.negf %258 : vector<3x384xf32>
    %260 = math.exp %259 : vector<3x384xf32>
    %cst_128 = arith.constant 1.000000e+00 : f32
    %261 = vector.broadcast %cst_128 : f32 to vector<3x384xf32>
    %262 = arith.addf %261, %260 : vector<3x384xf32>
    %263 = arith.divf %261, %262 : vector<3x384xf32>
    %264 = vector.extract_strided_slice %257 {offsets = [0, 384], sizes = [3, 128], strides = [1, 1]} : vector<3x512xf32> to vector<3x128xf32>
    %265 = math.tanh %264 : vector<3x128xf32>
    %266 = vector.extract_strided_slice %263 {offsets = [0, 0], sizes = [3, 128], strides = [1, 1]} : vector<3x384xf32> to vector<3x128xf32>
    %267 = vector.extract_strided_slice %263 {offsets = [0, 128], sizes = [3, 128], strides = [1, 1]} : vector<3x384xf32> to vector<3x128xf32>
    %268 = vector.extract_strided_slice %263 {offsets = [0, 256], sizes = [3, 128], strides = [1, 1]} : vector<3x384xf32> to vector<3x128xf32>
    %269 = arith.mulf %267, %250 : vector<3x128xf32>
    %270 = arith.mulf %266, %265 : vector<3x128xf32>
    %271 = arith.addf %269, %270 : vector<3x128xf32>
    %272 = math.tanh %271 : vector<3x128xf32>
    %273 = arith.mulf %268, %272 : vector<3x128xf32>
    %c12_129 = arith.constant 12 : index
    %c0_130 = arith.constant 0 : index
    %274 = vector.load %arg10[%c12_129, %c0_130] : memref<24x128xf32, #tpu.memory_space<vmem>>, vector<3x128xf32>
    %cst_131 = arith.constant 0.000000e+00 : f32
    %275 = vector.broadcast %cst_131 : f32 to vector<3x128xf32>
    %276 = arith.cmpf ogt, %274, %275 : vector<3x128xf32>
    %cst_132 = arith.constant 0.000000e+00 : f32
    %277 = vector.broadcast %cst_132 : f32 to vector<3x128xf32>
    %278 = arith.select %276, %273, %277 : vector<3x128xi1>, vector<3x128xf32>
    %279 = arith.select %276, %273, %249 : vector<3x128xi1>, vector<3x128xf32>
    %280 = arith.select %276, %271, %250 : vector<3x128xi1>, vector<3x128xf32>
    %281 = vector.extract_strided_slice %278 {offsets = [0, 0], sizes = [3, 64], strides = [1, 1]} : vector<3x128xf32> to vector<3x64xf32>
    %c12_133 = arith.constant 12 : index
    %c0_134 = arith.constant 0 : index
    %282 = vector.load %arg11[%c12_133, %c0_134] : memref<24x128xf32, #tpu.memory_space<vmem>>, vector<3x64xf32>
    tpu.vector_store %arg11[%c12_133, %c0_134], %281 {strides = array<i32>} : memref<24x128xf32, #tpu.memory_space<vmem>>, vector<3x64xf32>,
    %283 = vector.extract_strided_slice %278 {offsets = [0, 64], sizes = [3, 64], strides = [1, 1]} : vector<3x128xf32> to vector<3x64xf32>
    %c9_135 = arith.constant 9 : index
    %c64_136 = arith.constant 64 : index
    %284 = vector.load %arg11[%c9_135, %c64_136] : memref<24x128xf32, #tpu.memory_space<vmem>>, vector<3x64xf32>
    tpu.vector_store %arg11[%c9_135, %c64_136], %283 {strides = array<i32>} : memref<24x128xf32, #tpu.memory_space<vmem>>, vector<3x64xf32>,
    %c15_137 = arith.constant 15 : index
    %c0_138 = arith.constant 0 : index
    %285 = vector.load %arg9[%c15_137, %c0_138] : memref<24x512xf32, #tpu.memory_space<vmem>>, vector<3x512xf32>
    %cst_139 = arith.constant dense<0.000000e+00> : vector<3x512xf32>
    %286 = tpu.matmul %279, %2, %cst_139 {dimension_numbers = #tpu.dot_dimension_numbers<[1], [0], [0], [1], [0, 0, 1, 1], [], []>} : vector<3x128xf32>, vector<128x512xf32>, vector<3x512xf32> -> vector<3x512xf32>
    %287 = arith.addf %285, %286 : vector<3x512xf32>
    %288 = vector.extract_strided_slice %287 {offsets = [0, 0], sizes = [3, 384], strides = [1, 1]} : vector<3x512xf32> to vector<3x384xf32>
    %289 = arith.negf %288 : vector<3x384xf32>
    %290 = math.exp %289 : vector<3x384xf32>
    %cst_140 = arith.constant 1.000000e+00 : f32
    %291 = vector.broadcast %cst_140 : f32 to vector<3x384xf32>
    %292 = arith.addf %291, %290 : vector<3x384xf32>
    %293 = arith.divf %291, %292 : vector<3x384xf32>
    %294 = vector.extract_strided_slice %287 {offsets = [0, 384], sizes = [3, 128], strides = [1, 1]} : vector<3x512xf32> to vector<3x128xf32>
    %295 = math.tanh %294 : vector<3x128xf32>
    %296 = vector.extract_strided_slice %293 {offsets = [0, 0], sizes = [3, 128], strides = [1, 1]} : vector<3x384xf32> to vector<3x128xf32>
    %297 = vector.extract_strided_slice %293 {offsets = [0, 128], sizes = [3, 128], strides = [1, 1]} : vector<3x384xf32> to vector<3x128xf32>
    %298 = vector.extract_strided_slice %293 {offsets = [0, 256], sizes = [3, 128], strides = [1, 1]} : vector<3x384xf32> to vector<3x128xf32>
    %299 = arith.mulf %297, %280 : vector<3x128xf32>
    %300 = arith.mulf %296, %295 : vector<3x128xf32>
    %301 = arith.addf %299, %300 : vector<3x128xf32>
    %302 = math.tanh %301 : vector<3x128xf32>
    %303 = arith.mulf %298, %302 : vector<3x128xf32>
    %c15_141 = arith.constant 15 : index
    %c0_142 = arith.constant 0 : index
    %304 = vector.load %arg10[%c15_141, %c0_142] : memref<24x128xf32, #tpu.memory_space<vmem>>, vector<3x128xf32>
    %cst_143 = arith.constant 0.000000e+00 : f32
    %305 = vector.broadcast %cst_143 : f32 to vector<3x128xf32>
    %306 = arith.cmpf ogt, %304, %305 : vector<3x128xf32>
    %cst_144 = arith.constant 0.000000e+00 : f32
    %307 = vector.broadcast %cst_144 : f32 to vector<3x128xf32>
    %308 = arith.select %306, %303, %307 : vector<3x128xi1>, vector<3x128xf32>
    %309 = arith.select %306, %303, %279 : vector<3x128xi1>, vector<3x128xf32>
    %310 = arith.select %306, %301, %280 : vector<3x128xi1>, vector<3x128xf32>
    %311 = vector.extract_strided_slice %308 {offsets = [0, 0], sizes = [3, 64], strides = [1, 1]} : vector<3x128xf32> to vector<3x64xf32>
    %c15_145 = arith.constant 15 : index
    %c0_146 = arith.constant 0 : index
    %312 = vector.load %arg11[%c15_145, %c0_146] : memref<24x128xf32, #tpu.memory_space<vmem>>, vector<3x64xf32>
    tpu.vector_store %arg11[%c15_145, %c0_146], %311 {strides = array<i32>} : memref<24x128xf32, #tpu.memory_space<vmem>>, vector<3x64xf32>,
    %313 = vector.extract_strided_slice %308 {offsets = [0, 64], sizes = [3, 64], strides = [1, 1]} : vector<3x128xf32> to vector<3x64xf32>
    %c6_147 = arith.constant 6 : index
    %c64_148 = arith.constant 64 : index
    %314 = vector.load %arg11[%c6_147, %c64_148] : memref<24x128xf32, #tpu.memory_space<vmem>>, vector<3x64xf32>
    tpu.vector_store %arg11[%c6_147, %c64_148], %313 {strides = array<i32>} : memref<24x128xf32, #tpu.memory_space<vmem>>, vector<3x64xf32>,
    %c18_149 = arith.constant 18 : index
    %c0_150 = arith.constant 0 : index
    %315 = vector.load %arg9[%c18_149, %c0_150] : memref<24x512xf32, #tpu.memory_space<vmem>>, vector<3x512xf32>
    %cst_151 = arith.constant dense<0.000000e+00> : vector<3x512xf32>
    %316 = tpu.matmul %309, %2, %cst_151 {dimension_numbers = #tpu.dot_dimension_numbers<[1], [0], [0], [1], [0, 0, 1, 1], [], []>} : vector<3x128xf32>, vector<128x512xf32>, vector<3x512xf32> -> vector<3x512xf32>
    %317 = arith.addf %315, %316 : vector<3x512xf32>
    %318 = vector.extract_strided_slice %317 {offsets = [0, 0], sizes = [3, 384], strides = [1, 1]} : vector<3x512xf32> to vector<3x384xf32>
    %319 = arith.negf %318 : vector<3x384xf32>
    %320 = math.exp %319 : vector<3x384xf32>
    %cst_152 = arith.constant 1.000000e+00 : f32
    %321 = vector.broadcast %cst_152 : f32 to vector<3x384xf32>
    %322 = arith.addf %321, %320 : vector<3x384xf32>
    %323 = arith.divf %321, %322 : vector<3x384xf32>
    %324 = vector.extract_strided_slice %317 {offsets = [0, 384], sizes = [3, 128], strides = [1, 1]} : vector<3x512xf32> to vector<3x128xf32>
    %325 = math.tanh %324 : vector<3x128xf32>
    %326 = vector.extract_strided_slice %323 {offsets = [0, 0], sizes = [3, 128], strides = [1, 1]} : vector<3x384xf32> to vector<3x128xf32>
    %327 = vector.extract_strided_slice %323 {offsets = [0, 128], sizes = [3, 128], strides = [1, 1]} : vector<3x384xf32> to vector<3x128xf32>
    %328 = vector.extract_strided_slice %323 {offsets = [0, 256], sizes = [3, 128], strides = [1, 1]} : vector<3x384xf32> to vector<3x128xf32>
    %329 = arith.mulf %327, %310 : vector<3x128xf32>
    %330 = arith.mulf %326, %325 : vector<3x128xf32>
    %331 = arith.addf %329, %330 : vector<3x128xf32>
    %332 = math.tanh %331 : vector<3x128xf32>
    %333 = arith.mulf %328, %332 : vector<3x128xf32>
    %c18_153 = arith.constant 18 : index
    %c0_154 = arith.constant 0 : index
    %334 = vector.load %arg10[%c18_153, %c0_154] : memref<24x128xf32, #tpu.memory_space<vmem>>, vector<3x128xf32>
    %cst_155 = arith.constant 0.000000e+00 : f32
    %335 = vector.broadcast %cst_155 : f32 to vector<3x128xf32>
    %336 = arith.cmpf ogt, %334, %335 : vector<3x128xf32>
    %cst_156 = arith.constant 0.000000e+00 : f32
    %337 = vector.broadcast %cst_156 : f32 to vector<3x128xf32>
    %338 = arith.select %336, %333, %337 : vector<3x128xi1>, vector<3x128xf32>
    %339 = arith.select %336, %333, %309 : vector<3x128xi1>, vector<3x128xf32>
    %340 = arith.select %336, %331, %310 : vector<3x128xi1>, vector<3x128xf32>
    %341 = vector.extract_strided_slice %338 {offsets = [0, 0], sizes = [3, 64], strides = [1, 1]} : vector<3x128xf32> to vector<3x64xf32>
    %c18_157 = arith.constant 18 : index
    %c0_158 = arith.constant 0 : index
    %342 = vector.load %arg11[%c18_157, %c0_158] : memref<24x128xf32, #tpu.memory_space<vmem>>, vector<3x64xf32>
    tpu.vector_store %arg11[%c18_157, %c0_158], %341 {strides = array<i32>} : memref<24x128xf32, #tpu.memory_space<vmem>>, vector<3x64xf32>,
    %343 = vector.extract_strided_slice %338 {offsets = [0, 64], sizes = [3, 64], strides = [1, 1]} : vector<3x128xf32> to vector<3x64xf32>
    %c3_159 = arith.constant 3 : index
    %c64_160 = arith.constant 64 : index
    %344 = vector.load %arg11[%c3_159, %c64_160] : memref<24x128xf32, #tpu.memory_space<vmem>>, vector<3x64xf32>
    tpu.vector_store %arg11[%c3_159, %c64_160], %343 {strides = array<i32>} : memref<24x128xf32, #tpu.memory_space<vmem>>, vector<3x64xf32>,
    %c21_161 = arith.constant 21 : index
    %c0_162 = arith.constant 0 : index
    %345 = vector.load %arg9[%c21_161, %c0_162] : memref<24x512xf32, #tpu.memory_space<vmem>>, vector<3x512xf32>
    %cst_163 = arith.constant dense<0.000000e+00> : vector<3x512xf32>
    %346 = tpu.matmul %339, %2, %cst_163 {dimension_numbers = #tpu.dot_dimension_numbers<[1], [0], [0], [1], [0, 0, 1, 1], [], []>} : vector<3x128xf32>, vector<128x512xf32>, vector<3x512xf32> -> vector<3x512xf32>
    %347 = arith.addf %345, %346 : vector<3x512xf32>
    %348 = vector.extract_strided_slice %347 {offsets = [0, 0], sizes = [3, 384], strides = [1, 1]} : vector<3x512xf32> to vector<3x384xf32>
    %349 = arith.negf %348 : vector<3x384xf32>
    %350 = math.exp %349 : vector<3x384xf32>
    %cst_164 = arith.constant 1.000000e+00 : f32
    %351 = vector.broadcast %cst_164 : f32 to vector<3x384xf32>
    %352 = arith.addf %351, %350 : vector<3x384xf32>
    %353 = arith.divf %351, %352 : vector<3x384xf32>
    %354 = vector.extract_strided_slice %347 {offsets = [0, 384], sizes = [3, 128], strides = [1, 1]} : vector<3x512xf32> to vector<3x128xf32>
    %355 = math.tanh %354 : vector<3x128xf32>
    %356 = vector.extract_strided_slice %353 {offsets = [0, 0], sizes = [3, 128], strides = [1, 1]} : vector<3x384xf32> to vector<3x128xf32>
    %357 = vector.extract_strided_slice %353 {offsets = [0, 128], sizes = [3, 128], strides = [1, 1]} : vector<3x384xf32> to vector<3x128xf32>
    %358 = vector.extract_strided_slice %353 {offsets = [0, 256], sizes = [3, 128], strides = [1, 1]} : vector<3x384xf32> to vector<3x128xf32>
    %359 = arith.mulf %357, %340 : vector<3x128xf32>
    %360 = arith.mulf %356, %355 : vector<3x128xf32>
    %361 = arith.addf %359, %360 : vector<3x128xf32>
    %362 = math.tanh %361 : vector<3x128xf32>
    %363 = arith.mulf %358, %362 : vector<3x128xf32>
    %c21_165 = arith.constant 21 : index
    %c0_166 = arith.constant 0 : index
    %364 = vector.load %arg10[%c21_165, %c0_166] : memref<24x128xf32, #tpu.memory_space<vmem>>, vector<3x128xf32>
    %cst_167 = arith.constant 0.000000e+00 : f32
    %365 = vector.broadcast %cst_167 : f32 to vector<3x128xf32>
    %366 = arith.cmpf ogt, %364, %365 : vector<3x128xf32>
    %cst_168 = arith.constant 0.000000e+00 : f32
    %367 = vector.broadcast %cst_168 : f32 to vector<3x128xf32>
    %368 = arith.select %366, %363, %367 : vector<3x128xi1>, vector<3x128xf32>
    %369 = vector.extract_strided_slice %368 {offsets = [0, 0], sizes = [3, 64], strides = [1, 1]} : vector<3x128xf32> to vector<3x64xf32>
    %c21_169 = arith.constant 21 : index
    %c0_170 = arith.constant 0 : index
    %370 = vector.load %arg11[%c21_169, %c0_170] : memref<24x128xf32, #tpu.memory_space<vmem>>, vector<3x64xf32>
    tpu.vector_store %arg11[%c21_169, %c0_170], %369 {strides = array<i32>} : memref<24x128xf32, #tpu.memory_space<vmem>>, vector<3x64xf32>,
    %371 = vector.extract_strided_slice %368 {offsets = [0, 64], sizes = [3, 64], strides = [1, 1]} : vector<3x128xf32> to vector<3x64xf32>
    %c0_171 = arith.constant 0 : index
    %c64_172 = arith.constant 64 : index
    %372 = vector.load %arg11[%c0_171, %c64_172] : memref<24x128xf32, #tpu.memory_space<vmem>>, vector<3x64xf32>
    tpu.vector_store %arg11[%c0_171, %c64_172], %371 {strides = array<i32>} : memref<24x128xf32, #tpu.memory_space<vmem>>, vector<3x64xf32>,
    %c0_173 = arith.constant 0 : index
    %c0_174 = arith.constant 0 : index
    %373 = vector.load %arg11[%c0_173, %c0_174] : memref<24x128xf32, #tpu.memory_space<vmem>>, vector<24x128xf32>
    %c0_175 = arith.constant 0 : index
    %c0_176 = arith.constant 0 : index
    %374 = vector.load %arg5[%c0_175, %c0_176] : memref<128x2xf32, #tpu.memory_space<vmem>>, vector<128x2xf32>
    %cst_177 = arith.constant dense<0.000000e+00> : vector<24x2xf32>
    %375 = tpu.matmul %373, %374, %cst_177 {dimension_numbers = #tpu.dot_dimension_numbers<[1], [0], [0], [1], [0, 0, 1, 1], [], []>} : vector<24x128xf32>, vector<128x2xf32>, vector<24x2xf32> -> vector<24x2xf32>
    %c0_178 = arith.constant 0 : index
    %c0_179 = arith.constant 0 : index
    %376 = vector.load %arg6[%c0_178, %c0_179] : memref<1x2xf32, #tpu.memory_space<vmem>>, vector<1x2xf32>
    %377 = vector.broadcast %376 : vector<1x2xf32> to vector<24x2xf32>
    %378 = arith.addf %375, %377 : vector<24x2xf32>
    %c0_180 = arith.constant 0 : index
    %c0_181 = arith.constant 0 : index
    %379 = vector.load %arg7[%c0_180, %c0_181] : memref<24x2xf32, #tpu.memory_space<vmem>>, vector<24x2xf32>
    tpu.vector_store %arg7[%c0_180, %c0_181], %378 {strides = array<i32>} : memref<24x2xf32, #tpu.memory_space<vmem>>, vector<24x2xf32>,
    return
  }
}

</mosaic_0001>

<bundles_post_ra>
// kernel: bilstm_forward.1
= control target key start
LH: loop header
LB: loop body
LE: loop exit
PB: predicated region body
PF: predicated region fallthrough
CT: control target
= control target key end

     0   :  { %vm149_vm0 = vcmask 1046528   ;;  %v4758_v3 = vmov 0.0   ;;  %v2871_v5 = vmov 0   ;;  %vm139_vm1 = vcmask 318464   ;;  %s4750_s2 = inlined_call_operand.vmem [shape: f32[39,512], index: 2, kind: input, shape index: {}]   ;;  %s4751_s3 = inlined_call_operand.vmem [shape: f32[128,512], index: 3, kind: input, shape index: {}]   ;;  %s4752_s0 = inlined_call_operand.vmem [shape: f32[24,39], index: 0, kind: input, shape index: {}]   ;;  %s4753_s1 = inlined_call_operand.vmem [shape: s32[3,1], index: 1, kind: input, shape index: {}]   ;;  %s4754_s4 = inlined_call_operand.vmem [shape: f32[1,512], index: 4, kind: input, shape index: {}]   ;;  %s4755_s5 = inlined_call_operand.vmem [shape: f32[128,2], index: 5, kind: input, shape index: {}]   ;;  %s4756_s6 = inlined_call_operand.vmem [shape: f32[1,2], index: 6, kind: input, shape index: {}]   ;;  %s4757_s7 = inlined_call_operand.vmem [shape: f32[24,2], index: 7, kind: output, shape index: {}]  }
   0x1   :  { %v44_v0 = vld [vmem:[%s4750_s2 + $0x88] sm:$0x7f]  ;;  %v43_v1 = vld [vmem:[%s4750_s2 + $0x80] sm:$0x7f]  ;;  %226 = vmatprep.mubr.f32.mxu1 %v4758_v3  ;;  %746 = vmatprep.mubr.f32.mxu0 %v4758_v3  ;;  %v46_v21 = vld [vmem:[%s4750_s2 + $0x98] sm:$0x7f] }
   0x2   :  { %v40_v2 = vld [vmem:[%s4750_s2 + $0x68] sm:$0xff]  ;;  %2460 = vmatprep.subr.msk.mxu1 %vm149_vm0, %v44_v0  ;;  %v39_v4 = vld [vmem:[%s4750_s2 + $0x60] sm:$0xff]  ;;  %2581 = vset.pattern.permute.xlu0 %v2871_v5  ;;  %v45_v22 = vld [vmem:[%s4750_s2 + $0x90] sm:$0x7f]  ;;  %vm570_vm12 = vcmask 1040384   ;;  %vm856_vm14 = vcmask 518144  }
   0x3   :  { %2461 = vmatpush1.msk.msra.mxu1 %vm149_vm0, %v43_v1  ;;  %v36_v6 = vld [vmem:[%s4750_s2 + $0x48] sm:$0xff]  ;;  %v2948_v8 = vld [vmem:[%s4751_s3 + $0x1e0] sm:$0xff]  ;;  %v42_v23 = vld [vmem:[%s4750_s2 + $0x78] sm:$0xff]  ;;  %vm858_vm15 = vcmask 1042944  }
   0x4   :  { %v2943_v7 = vld [vmem:[%s4751_s3 + $0x1e8] sm:$0xff]  ;;  %186 = vmatprep.subr.mxu1 %v40_v2  ;;  %v35_v9 = vld [vmem:[%s4750_s2 + $0x40] sm:$0xff]  ;;  %v41_v25 = vld [vmem:[%s4750_s2 + $0x70] sm:$0xff] }
   0x5   :  { %682 = vmatprep.subr.mxu0 %v2943_v7  ;;  %v2957_v10 = vld [vmem:[%s4751_s3 + $0x1c8] sm:$0xff]  ;;  %187 = vmatpush1.msra.mxu1 %v39_v4  ;;  %v2966_v12 = vld [vmem:[%s4751_s3 + $0x1c0] sm:$0xff]  ;;  %v38_v28 = vld [vmem:[%s4750_s2 + $0x58] sm:$0xff] }
   0x6   :  { %v32_v11 = vld [vmem:[%s4750_s2 + $0x28] sm:$0xff]  ;;  %683 = vmatpush1.msra.mxu0 %v2948_v8  ;;  %188 = vmatprep.subr.mxu1 %v36_v6  ;;  %v31_v14 = vld [vmem:[%s4750_s2 + $0x20] sm:$0xff]  ;;  %v37_v30 = vld [vmem:[%s4750_s2 + $0x50] sm:$0xff] }
   0x7   :  { %v2971_v13 = vld [vmem:[%s4751_s3 + $0x1a8] sm:$0xff]  ;;  %684 = vmatprep.subr.mxu0 %v2957_v10  ;;  %v2980_v15 = vld [vmem:[%s4751_s3 + $0x1a0] sm:$0xff]  ;;  %189 = vmatpush1.msra.mxu1 %v35_v9  ;;  %v34_v32 = vld [vmem:[%s4750_s2 + $0x38] sm:$0xff] }
   0x8   :  { %v28_v16 = vld [vmem:[%s4750_s2 + $0x8] sm:$0xff]  ;;  %685 = vmatpush1.msra.mxu0 %v2966_v12  ;;  %190 = vmatprep.subr.mxu1 %v32_v11  ;;  %v27_v18 = vld [vmem:[%s4750_s2] sm:$0xff]  ;;  %v3066_v34 = vld [vmem:[%s4752_s0 + $0x10] sm:$0xff] }
   0x9   :  { %v2989_v17 = vld [vmem:[%s4751_s3 + $0x188] sm:$0xff]  ;;  %686 = vmatprep.subr.mxu0 %v2971_v13  ;;  %v2998_v19 = vld [vmem:[%s4751_s3 + $0x180] sm:$0xff]  ;;  %191 = vmatpush1.msra.mxu1 %v31_v14  ;;  %v33_v36 = vld [vmem:[%s4750_s2 + $0x30] sm:$0xff] }
   0xa   :  { %v115_v20 = vld [vmem:[%s4752_s0] sm:$0xff]  ;;  %687 = vmatpush1.msra.mxu0 %v2980_v15  ;;  %192 = vmatprep.subr.mxu1 %v28_v16  ;;  %v3018_v24 = vld [vmem:[%s4751_s3 + $0x168] sm:$0xff]  ;;  %v30_v38 = vld [vmem:[%s4750_s2 + $0x18] sm:$0xff] }
   0xb   :  { %688 = vmatprep.subr.mxu0 %v2989_v17  ;;  %193 = vmatpush1.msra.mxu1 %v27_v18  ;;  %v3028_v26 = vld [vmem:[%s4751_s3 + $0x160] sm:$0xff]  ;;  %v116_v27 = vld [vmem:[%s4752_s0 + $0x8] sm:$0xff]  ;;  %v29_v40 = vld [vmem:[%s4750_s2 + $0x10] sm:$0xff] }
   0xc   :  { %689 = vmatpush1.msra.mxu0 %v2998_v19  ;;  %2462 = vmatmul.mubr.msk.f32.vlgmr.msra.gmra.mxu1 %vm139_vm1, %v115_v20  ;;  %v3042_v29 = vld [vmem:[%s4751_s3 + $0x148] sm:$0xff]  ;;  %v3051_v31 = vld [vmem:[%s4751_s3 + $0x140] sm:$0xff]  ;;  %v3107_v42 = vld [vmem:[%s4751_s3 + $0x1f8] sm:$0xff] }
   0xd   :  { %2465 = vmatprep.subr.msk.mxu1 %vm149_vm0, %v46_v21  ;;  %232 = vmatprep.mubr.f32.mxu1 %v4758_v3  ;;  %v3060_v33 = vld [vmem:[%s4751_s3 + $0x128] sm:$0xff]  ;;  %v3071_v35 = vld [vmem:[%s4751_s3 + $0x120] sm:$0xff]  ;;  %v3119_v44 = vld [vmem:[%s4751_s3 + $0x1f0] sm:$0xff] }
   0xe   :  { %2466 = vmatpush1.msk.msra.mxu1 %vm149_vm0, %v45_v22  ;;  %690 = vmatprep.subr.mxu0 %v3018_v24  ;;  %v3081_v37 = vld [vmem:[%s4751_s3 + $0x108] sm:$0xff]  ;;  %v3090_v39 = vld [vmem:[%s4751_s3 + $0x100] sm:$0xff]  ;;  %v3131_v46 = vld [vmem:[%s4751_s3 + $0x1d8] sm:$0xff] }
   0xf   :  { %269 = vmatprep.subr.mxu1 %v42_v23  ;;  %691 = vmatpush1.msra.mxu0 %v3028_v26  ;;  %v3102_v41 = vld [vmem:[%s4751_s3 + $0xe8] sm:$0xff]  ;;  %v3113_v43 = vld [vmem:[%s4751_s3 + $0xe0] sm:$0xff]  ;;  %v3143_v48 = vld [vmem:[%s4751_s3 + $0x1d0] sm:$0xff] }
  0x10   :  { %270 = vmatpush1.msra.mxu1 %v41_v25  ;;  %692 = vmatprep.subr.mxu0 %v3042_v29  ;;  %v3124_v45 = vld [vmem:[%s4751_s3 + $0xc8] sm:$0xff]  ;;  %v3136_v47 = vld [vmem:[%s4751_s3 + $0xc0] sm:$0xff]  ;;  %v3155_v50 = vld [vmem:[%s4751_s3 + $0x1b8] sm:$0xff] }
  0x11   :  { %2463 = vmatmul.mubr.msk.f32.gmra.mxu1 %vm139_vm1, %v116_v27  ;;  %271 = vmatprep.subr.mxu1 %v38_v28  ;;  %v3150_v49 = vld [vmem:[%s4751_s3 + $0xa8] sm:$0xff]  ;;  %v3162_v51 = vld [vmem:[%s4751_s3 + $0xa0] sm:$0xff]  ;;  %v3169_v52 = vld [vmem:[%s4751_s3 + $0x1b0] sm:$0xff] }
  0x12   :  { %272 = vmatpush1.msra.mxu1 %v37_v30  ;;  %693 = vmatpush1.msra.mxu0 %v3051_v31  ;;  %v3174_v53 = vld [vmem:[%s4751_s3 + $0x88] sm:$0xff]  ;;  %v3181_v54 = vld [vmem:[%s4751_s3 + $0x198] sm:$0xff]  ;;  %v3186_v55 = vld [vmem:[%s4751_s3 + $0x80] sm:$0xff] }
  0x13   :  { %238 = vmatprep.mubr.f32.mxu1 %v4758_v3  ;;  %273 = vmatprep.subr.mxu1 %v34_v32  ;;  %v3193_v56 = vld [vmem:[%s4751_s3 + $0x190] sm:$0xff]  ;;  %v3200_v57 = vld [vmem:[%s4751_s3 + $0x68] sm:$0xff]  ;;  %v3205_v58 = vld [vmem:[%s4751_s3 + $0x178] sm:$0xff] }
  0x14   :  { %694 = vmatprep.subr.mxu0 %v3060_v33  ;;  %274 = vmatpush1.msra.mxu1 %v33_v36  ;;  %v3212_v59 = vld [vmem:[%s4751_s3 + $0x60] sm:$0xff]  ;;  %v3219_v60 = vld [vmem:[%s4751_s3 + $0x170] sm:$0xff]  ;;  %v3224_v61 = vld [vmem:[%s4751_s3 + $0x48] sm:$0xff]  ;;  %v2875_v36 = vmov 4  }
  0x15   :  { %2464 = vmatmul.mubr.msk.f32.gmra.mxu1 %vm139_vm1, %v3066_v34  ;;  %695 = vmatpush1.msra.mxu0 %v3071_v35  ;;  %v3231_v62 = vld [vmem:[%s4751_s3 + $0x158] sm:$0xff]  ;;  %v3236_v63 = vld [vmem:[%s4751_s3 + $0x40] sm:$0xff]  ;;  %v3244_v0 = vld [vmem:[%s4751_s3 + $0x150] sm:$0xff] }
  0x16   :  { %696 = vmatprep.subr.mxu0 %v3081_v37  ;;  %275 = vmatprep.subr.mxu1 %v30_v38  ;;  %v3249_v1 = vld [vmem:[%s4751_s3 + $0x28] sm:$0xff]  ;;  %v3256_v2 = vld [vmem:[%s4751_s3 + $0x138] sm:$0xff]  ;;  %v3261_v4 = vld [vmem:[%s4751_s3 + $0x20] sm:$0xff] }
  0x17   :  { %697 = vmatpush1.msra.mxu0 %v3090_v39  ;;  %276 = vmatpush1.msra.mxu1 %v29_v40  ;;  %v3268_v6 = vld [vmem:[%s4751_s3 + $0x130] sm:$0xff]  ;;  %v3273_v9 = vld [vmem:[%s4751_s3 + $0x8] sm:$0xff]  ;;  %v3280_v11 = vld [vmem:[%s4751_s3 + $0x118] sm:$0xff] }
  0x18   :  { %309 = vmatprep.mubr.f32.mxu1 %v4758_v3  ;;  %698 = vmatprep.subr.mxu0 %v3102_v41  ;;  %v3285_v14 = vld [vmem:[%s4751_s3] sm:$0xff]  ;;  %v3292_v16 = vld [vmem:[%s4751_s3 + $0x110] sm:$0xff]  ;;  %v3299_v18 = vld [vmem:[%s4751_s3 + $0xf8] sm:$0xff] }
  0x19   :  { %753 = vmatprep.subr.mxu1 %v3107_v42  ;;  %2467 = vmatmul.mubr.msk.f32.vlgmr.msra.gmra.mxu1 %vm139_vm1, %v115_v20  ;;  %v3306_v20 = vld [vmem:[%s4751_s3 + $0xf0] sm:$0xff]  ;;  %v26_v21 = vld [vmem:[%s4753_s1] sm:$0x7]  ;;  %v3316_v22 = vld [vmem:[%s4751_s3 + $0xd8] sm:$0xff] }
  0x1a   :  { %699 = vmatpush1.msra.mxu0 %v3113_v43  ;;  %754 = vmatpush1.msra.mxu1 %v3119_v44  ;;  %v3322_v23 = vld [vmem:[%s4751_s3 + $0xd0] sm:$0xff]  ;;  %v3329_v25 = vld [vmem:[%s4751_s3 + $0xb8] sm:$0xff] }
  0x1b   :  { %700 = vmatprep.subr.mxu0 %v3124_v45  ;;  %755 = vmatprep.subr.mxu1 %v3131_v46  ;;  %v3342_v28 = vld [vmem:[%s4751_s3 + $0x98] sm:$0xff]  ;;  %v3349_v30 = vld [vmem:[%s4751_s3 + $0x90] sm:$0xff] }
  0x1c   :  { %701 = vmatpush1.msra.mxu0 %v3136_v47  ;;  %756 = vmatpush1.msra.mxu1 %v3143_v48  ;;  %v3356_v32 = vld [vmem:[%s4751_s3 + $0x78] sm:$0xff] }
  0x1d   :  { %315 = vmatprep.mubr.f32.mxu1 %v4758_v3  ;;  %702 = vmatprep.subr.mxu0 %v3150_v49 }
  0x1e   :  { %757 = vmatprep.subr.mxu1 %v3155_v50  ;;  %2468 = vmatmul.mubr.msk.f32.gmra.mxu1 %vm139_vm1, %v116_v27  ;;  %v3335_v27 = vld [vmem:[%s4751_s3 + $0xb0] sm:$0xff] }
  0x1f   :  { %703 = vmatpush1.msra.mxu0 %v3162_v51  ;;  %758 = vmatpush1.msra.mxu1 %v3169_v52 }
  0x20   :  { %704 = vmatprep.subr.mxu0 %v3174_v53  ;;  %759 = vmatprep.subr.mxu1 %v3181_v54 }
  0x21   :  { %705 = vmatpush1.msra.mxu0 %v3186_v55  ;;  %760 = vmatpush1.msra.mxu1 %v3193_v56 }
  0x22   :  { %321 = vmatprep.mubr.f32.mxu1 %v4758_v3  ;;  %706 = vmatprep.subr.mxu0 %v3200_v57 }
  0x23   :  { %761 = vmatprep.subr.mxu1 %v3205_v58  ;;  %2469 = vmatmul.mubr.msk.f32.gmra.mxu1 %vm139_vm1, %v3066_v34  ;;  %v2874_v34 = vmov 5   ;;  %vm1287_vm1 = vcmask 1041408  }
  0x24   :  { %707 = vmatpush1.msra.mxu0 %v3212_v59  ;;  %762 = vmatpush1.msra.mxu1 %v3219_v60 }
  0x25   :  { %708 = vmatprep.subr.mxu0 %v3224_v61  ;;  %763 = vmatprep.subr.mxu1 %v3231_v62 }
  0x26   :  { %709 = vmatpush1.msra.mxu0 %v3236_v63  ;;  %764 = vmatpush1.msra.mxu1 %v3244_v0 }
  0x27   :  { %710 = vmatprep.subr.mxu0 %v3249_v1  ;;  %765 = vmatprep.subr.mxu1 %v3256_v2 }
  0x28   :  { %711 = vmatpush1.msra.mxu0 %v3261_v4  ;;  %766 = vmatpush1.msra.mxu1 %v3268_v6 }
  0x29   :  { %712 = vmatprep.subr.mxu0 %v3273_v9  ;;  %767 = vmatprep.subr.mxu1 %v3280_v11 }
  0x2a   :  { %713 = vmatpush1.msra.mxu0 %v3285_v14  ;;  %768 = vmatpush1.msra.mxu1 %v3292_v16 }
  0x2b   :  { %747 = vmatmul.mubr.f32.vlgmr.msra.gmra.mxu0 %v4758_v3  ;;  %769 = vmatprep.subr.mxu1 %v3299_v18 }
  0x2c   :  { %817 = vmatprep.mubr.f32.mxu1 %v4758_v3  ;;  %770 = vmatpush1.msra.mxu1 %v3306_v20 }
  0x2d   :  { %376 = vperm.xlu0 %2581, %v26_v21   ;;  %771 = vmatprep.subr.mxu1 %v3316_v22 }
  0x2e   :  { %864 = vmatprep.subr.mxu0 %v2943_v7  ;;  %772 = vmatpush1.msra.mxu1 %v3322_v23 }
  0x2f   :  { %865 = vmatpush1.msra.mxu0 %v2948_v8  ;;  %773 = vmatprep.subr.mxu1 %v3329_v25  ;;  %v3363_v8 = vld [vmem:[%s4751_s3 + $0x70] sm:$0xff] }
  0x30   :  { %866 = vmatprep.subr.mxu0 %v2957_v10  ;;  %774 = vmatpush1.msra.mxu1 %v3335_v27  ;;  %v3370_v10 = vld [vmem:[%s4751_s3 + $0x58] sm:$0xff] }
  0x31   :  { %867 = vmatpush1.msra.mxu0 %v2966_v12  ;;  %775 = vmatprep.subr.mxu1 %v3342_v28  ;;  %v3377_v12 = vld [vmem:[%s4751_s3 + $0x50] sm:$0xff] }
  0x32   :  { %868 = vmatprep.subr.mxu0 %v2971_v13  ;;  %776 = vmatpush1.msra.mxu1 %v3349_v30  ;;  %v3384_v13 = vld [vmem:[%s4751_s3 + $0x38] sm:$0xff] }
  0x33   :  { %869 = vmatpush1.msra.mxu0 %v2980_v15  ;;  %777 = vmatprep.subr.mxu1 %v3356_v32  ;;  %v3391_v15 = vld [vmem:[%s4751_s3 + $0x30] sm:$0xff] }
  0x34   :  { %870 = vmatprep.subr.mxu0 %v2989_v17  ;;  %778 = vmatpush1.msra.mxu1 %v3363_v8  ;;  %v3398_v17 = vld [vmem:[%s4751_s3 + $0x18] sm:$0xff] }
  0x35   :  { %871 = vmatpush1.msra.mxu0 %v2998_v19  ;;  %779 = vmatprep.subr.mxu1 %v3370_v10  ;;  %v3405_v19 = vld [vmem:[%s4751_s3 + $0x10] sm:$0xff] }
  0x36   :  { %872 = vmatprep.subr.mxu0 %v3018_v24  ;;  %780 = vmatpush1.msra.mxu1 %v3377_v12 }
  0x37   :  { %873 = vmatpush1.msra.mxu0 %v3028_v26  ;;  %781 = vmatprep.subr.mxu1 %v3384_v13  ;;  %v2872_v26 = vmov 7  }
  0x38   :  { %874 = vmatprep.subr.mxu0 %v3042_v29  ;;  %782 = vmatpush1.msra.mxu1 %v3391_v15 }
  0x39   :  { %875 = vmatpush1.msra.mxu0 %v3051_v31  ;;  %783 = vmatprep.subr.mxu1 %v3398_v17  ;;  %v2873_v31 = vmov 6  }
  0x3a   :  { %876 = vmatprep.subr.mxu0 %v3060_v33  ;;  %784 = vmatpush1.msra.mxu1 %v3405_v19 }
  0x3b   :  { %877 = vmatpush1.msra.mxu0 %v3071_v35  ;;  %818 = vmatmul.mubr.f32.vlgmr.msra.gmra.mxu1 %v4758_v3 }
  0x3c   :  { %935 = vmatprep.subr.mxu1 %v3107_v42  ;;  %878 = vmatprep.subr.mxu0 %v3081_v37 }
  0x3d   :  { %936 = vmatpush1.msra.mxu1 %v3119_v44  ;;  %879 = vmatpush1.msra.mxu0 %v3090_v39  ;;  %v2876_v39 = vmov 3  }
  0x3e   :  { %937 = vmatprep.subr.mxu1 %v3131_v46  ;;  %880 = vmatprep.subr.mxu0 %v3102_v41  ;;  %v2877_v41 = vmov 2  }
  0x3f   :  { %938 = vmatpush1.msra.mxu1 %v3143_v48  ;;  %881 = vmatpush1.msra.mxu0 %v3113_v43  ;;  %v2878_v43 = vmov 1  }
  0x40   :  { %939 = vmatprep.subr.mxu1 %v3155_v50  ;;  %882 = vmatprep.subr.mxu0 %v3124_v45 }
  0x41   :  { %940 = vmatpush1.msra.mxu1 %v3169_v52  ;;  %883 = vmatpush1.msra.mxu0 %v3136_v47 }
  0x42   :  { %941 = vmatprep.subr.mxu1 %v3181_v54  ;;  %884 = vmatprep.subr.mxu0 %v3150_v49 }
  0x43   :  { %942 = vmatpush1.msra.mxu1 %v3193_v56  ;;  %885 = vmatpush1.msra.mxu0 %v3162_v51 }
  0x44   :  { %943 = vmatprep.subr.mxu1 %v3205_v58  ;;  %886 = vmatprep.subr.mxu0 %v3174_v53 }
  0x45   :  { %944 = vmatpush1.msra.mxu1 %v3219_v60  ;;  %887 = vmatpush1.msra.mxu0 %v3186_v55 }
  0x46   :  { %945 = vmatprep.subr.mxu1 %v3231_v62  ;;  %888 = vmatprep.subr.mxu0 %v3200_v57 }
  0x47   :  { %946 = vmatpush1.msra.mxu1 %v3244_v0  ;;  %889 = vmatpush1.msra.mxu0 %v3212_v59  ;;  %v111_v59 = vld [vmem:[%s4754_s4] sm:$0xf] }
  0x48   :  { %947 = vmatprep.subr.mxu1 %v3256_v2  ;;  %890 = vmatprep.subr.mxu0 %v3224_v61 }
  0x49   :  { %948 = vmatpush1.msra.mxu1 %v3268_v6  ;;  %891 = vmatpush1.msra.mxu0 %v3236_v63 }
  0x4a   :  { %949 = vmatprep.subr.mxu1 %v3280_v11  ;;  %892 = vmatprep.subr.mxu0 %v3249_v1 }
  0x4b   :  { %950 = vmatpush1.msra.mxu1 %v3292_v16  ;;  %893 = vmatpush1.msra.mxu0 %v3261_v4 }
  0x4c   :  { %951 = vmatprep.subr.mxu1 %v3299_v18  ;;  %894 = vmatprep.subr.mxu0 %v3273_v9 }
  0x4d   :  { %952 = vmatpush1.msra.mxu1 %v3306_v20  ;;  %895 = vmatpush1.msra.mxu0 %v3285_v14 }
  0x4e   :  { %953 = vmatprep.subr.mxu1 %v3316_v22  ;;  %928 = vmatprep.mubr.f32.mxu0 %v4758_v3 }
  0x4f   :  { %954 = vmatpush1.msra.mxu1 %v3322_v23  ;;  %999 = vmatprep.mubr.f32.mxu1 %v4758_v3 }
  0x50   :  { %955 = vmatprep.subr.mxu1 %v3329_v25  ;;  %1070 = vmatprep.subr.mxu0 %v2943_v7  ;;  %v112_v7 = vlaneseq }
  0x51   :  { %956 = vmatpush1.msra.mxu1 %v3335_v27 }
  0x52   :  { %957 = vmatprep.subr.mxu1 %v3342_v28  ;;  %v113_v24 = vand.u32 127, %v112_v7  ;;  %v120_v55 = vshrl.u32 %v112_v7, 7 }
  0x53   :  { %958 = vmatpush1.msra.mxu1 %v3349_v30 }
  0x54   :  { %959 = vmatprep.subr.mxu1 %v3356_v32  ;;  %vm114_vm2 = vcmp.lt.s32.totalorder %v113_v24, 64  ;;  %v121_v57 = vsub.s32 0, %v120_v55  ;;  %v125_v61 = vsub.s32 1, %v120_v55 }
  0x55   :  { %960 = vmatpush1.msra.mxu1 %v3363_v8  ;;  %v374_v29 = vsel %vm114_vm2, 0, %v2872_v26  ;;  %v410_v33 = vsel %vm114_vm2, 1, %v2873_v31  ;;  %v475_v35 = vsel %vm114_vm2, 2, %v2874_v34  ;;  %v508_v37 = vsel %vm114_vm2, 3, %v2875_v36 }
  0x56   :  { %961 = vmatprep.subr.mxu1 %v3370_v10  ;;  %v673_v38 = vsel %vm114_vm2, 7, %v2871_v5  ;;  %v541_v40 = vsel %vm114_vm2, 4, %v2876_v39  ;;  %v640_v44 = vsel %vm114_vm2, 6, %v2878_v43  ;;  %v122_v63 = vrot.slane %v111_v59, %v121_v57 }
  0x57   :  { %962 = vmatpush1.msra.mxu1 %v3377_v12  ;;  %v126_v1 = vrot.slane %v111_v59, %v125_v61  ;;  %v348_v34 = vsel %vm114_vm2, 1, %v2871_v5  ;;  %v133_v36 = vsub.s32 3, %v120_v55 }
  0x58   :  { %963 = vmatprep.subr.mxu1 %v3384_v13 }
  0x59   :  { %964 = vmatpush1.msra.mxu1 %v3391_v15 }
  0x5a   :  { %965 = vmatprep.subr.mxu1 %v3398_v17 }
  0x5b   :  { %966 = vmatpush1.msra.mxu1 %v3405_v19 }
  0x5c   :  { %1141 = vmatprep.subr.mxu1 %v3107_v42  ;;  %v607_v42 = vsel %vm114_vm2, 5, %v2877_v41 }
  0xa8   :  { %v377_v45 = vpop.permute.xlu0 %376 }
  0xa9   :  { %vm378_vm3 = vcmp.lt.s32.totalorder %v374_v29, %v377_v45  ;;  %vm411_vm4 = vcmp.lt.s32.totalorder %v410_v33, %v377_v45  ;;  %vm476_vm5 = vcmp.lt.s32.totalorder %v475_v35, %v377_v45  ;;  %vm509_vm6 = vcmp.lt.s32.totalorder %v508_v37, %v377_v45 }
  0xaa   :  { %v2470_v46 = vsel %vm378_vm3, 1.0, %v4758_v3  ;;  %v2471_v47 = vsel %vm411_vm4, 1.0, %v4758_v3  ;;  %v2472_v48 = vsel %vm476_vm5, 1.0, %v4758_v3  ;;  %v2473_v49 = vsel %vm509_vm6, 1.0, %v4758_v3 }
  0xab   :  { %381 = vst [vmem:[#allocation4] sm:$0x7] %v2470_v46  ;;  %414 = vst [vmem:[#allocation4 + $0x3] sm:$0x7] %v2471_v47  ;;  %vm542_vm7 = vcmp.lt.s32.totalorder %v541_v40, %v377_v45  ;;  %vm608_vm8 = vcmp.lt.s32.totalorder %v607_v42, %v377_v45  ;;  %vm641_vm9 = vcmp.lt.s32.totalorder %v640_v44, %v377_v45  ;;  %v129_v33 = vsub.s32 2, %v120_v55 }
  0xac   :  { %479 = vst [vmem:[#allocation4 + $0x6] sm:$0x7] %v2472_v48  ;;  %512 = vst [vmem:[#allocation4 + $0x9] sm:$0x7] %v2473_v49  ;;  %vm674_vm10 = vcmp.lt.s32.totalorder %v673_v38, %v377_v45  ;;  %v2474_v50 = vsel %vm542_vm7, 1.0, %v4758_v3  ;;  %v2475_v51 = vsel %vm608_vm8, 1.0, %v4758_v3  ;;  %v3493_v40 = vrot.slane %v348_v34, %v121_v57 }
  0xad   :  { %v2476_v52 = vsel %vm641_vm9, 1.0, %v4758_v3  ;;  %v2477_v53 = vsel %vm674_vm10, 1.0, %v4758_v3  ;;  %545 = vst [vmem:[#allocation4 + $0xc] sm:$0x7] %v2474_v50  ;;  %611 = vst [vmem:[#allocation4 + $0xf] sm:$0x7] %v2475_v51  ;;  %v3491_v39 = vrot.slane %v111_v59, %v129_v33  ;;  %v3495_v42 = vrot.slane %v111_v59, %v133_v36 }
  0xae   :  { %644 = vst [vmem:[#allocation4 + $0x12] sm:$0x7] %v2476_v52  ;;  %677 = vst [vmem:[#allocation4 + $0x15] sm:$0x7] %v2477_v53  ;;  %vm353_vm11 = vcmp.eq.s32.totalorder %v3493_v40, 1  ;;  %vm2879_vm7 = vmmov 0  }
  0xaf   :  { %vm2452_vm9 = vcmask 15360  }
  0xcc   :  { %v228_v4 = vpop.f32.mrf.mxu1 }
  0xcd   :  { %v229_v9 = vadd.f32 %v228_v4, %v122_v63 }
  0xce   :  { %v230_v14 = vpop.f32.mrf.mxu1 }
  0xcf   :  { %328 = vst [vmem:[#allocation2 + $0x30] sm:$0xff] %v229_v9  ;;  %v231_v21 = vadd.f32 %v230_v14, %v126_v1 }
  0xd1   :  { %v234_v26 = vpop.f32.mrf.mxu1  ;;  %329 = vst [vmem:[#allocation2] sm:$0xff] %v231_v21 }
  0xd2   :  { %v235_v29 = vadd.f32 %v234_v26, %v122_v63 }
  0xd3   :  { %v236_v31 = vpop.f32.mrf.mxu1 }
  0xd4   :  { %332 = vst [vmem:[#allocation2 + $0x50] sm:$0xff] %v235_v29  ;;  %v237_v7 = vadd.f32 %v236_v31, %v126_v1 }
  0xd5   :  { %v240_v35 = vpop.f32.mrf.mxu1 }
  0xd6   :  { %333 = vst [vmem:[#allocation2 + $0x20] sm:$0xff] %v237_v7  ;;  %v241_v37 = vadd.f32 %v240_v35, %v122_v63  ;;  %v554_v43 = vld [vmem:[#allocation2 + $0x30] sm:$0xc0]  ;;  %v3497_v44 = vld [vmem:[#allocation2 + $0x30] sm:$0x38] }
  0xd7   :  { %v242_v38 = vpop.f32.mrf.mxu1  ;;  %v3499_v24 = vld [vmem:[#allocation2 + $0x30] sm:$0x7]  ;;  %v571_v48 = vrot.slane %v554_v43, 7  ;;  %v624_v49 = vrot.slane %v3497_v44, 1 }
  0xd8   :  { %336 = vst [vmem:[#allocation2 + $0x28] sm:$0xff] %v241_v37  ;;  %v243_v41 = vadd.f32 %v242_v38, %v126_v1  ;;  %v3503_v46 = vld [vmem:[#allocation2] sm:$0xc0]  ;;  %v3506_v50 = vld [vmem:[#allocation2] sm:$0x38]  ;;  %v657_v53 = vrot.slane %v3499_v24, 3 }
  0xd9   :  { %v311_v45 = vpop.f32.mrf.mxu1  ;;  %v3510_v55 = vld [vmem:[#allocation2] sm:$0x7]  ;;  %v572_v63 = vrot.slane %v3503_v46, 7 }
  0xda   :  { %337 = vst [vmem:[#allocation2 + $0x48] sm:$0xff] %v243_v41  ;;  %v312_v5 = vadd.f32 %v311_v45, %v3491_v39  ;;  %v625_v41 = vrot.slane %v3506_v50, 1 }
  0xdb   :  { %v313_v47 = vpop.f32.mrf.mxu1  ;;  %v484_v51 = vld [vmem:[#allocation2 + $0x50] sm:$0x70]  ;;  %v480_v57 = vld [vmem:[#allocation2 + $0x50] sm:$0xe]  ;;  %v546_v4 = vld [vmem:[#allocation2 + $0x50] sm:$0x80] }
  0xdc   :  { %330 = vst [vmem:[#allocation2 + $0x58] sm:$0xff] %v312_v5  ;;  %v314_v52 = vadd.f32 %v313_v47, %v3495_v42  ;;  %v492_v59 = vrot.slane %v484_v51, 3  ;;  %v517_v61 = vld [vmem:[#allocation2 + $0x50] sm:$0xe]  ;;  %v558_v9 = vld [vmem:[#allocation2 + $0x50] sm:$0x1]  ;;  %v591_v33 = vsel %vm353_vm11, %v546_v4, %v571_v48 }
  0xdd   :  { %v525_v1 = vrot.slane %v517_v61, 5  ;;  %v3513_v21 = vld [vmem:[#allocation2 + $0x50] sm:$0x80]  ;;  %v513_v29 = vld [vmem:[#allocation2 + $0x50] sm:$0x70]  ;;  %v575_v31 = vrot.slane %v558_v9, 7 }
  0xde   :  { %331 = vst [vmem:[#allocation2 + $0x18] sm:$0xff] %v314_v52  ;;  %v317_v14 = vpop.f32.mrf.mxu1  ;;  %v500_v26 = vsel %vm353_vm11, %v480_v57, %v492_v59  ;;  %599 = vst [vmem:[#allocation3 + $0x8] sm:$0x80] %v591_v33  ;;  %v3522_v35 = vld [vmem:[#allocation2 + $0x20] sm:$0x80]  ;;  %v658_v47 = vrot.slane %v3510_v55, 3 }
  0xdf   :  { %v318_v7 = vadd.f32 %v317_v14, %v3491_v39  ;;  %v533_v34 = vsel %vm353_vm11, %v513_v29, %v525_v1  ;;  %504 = vst [vmem:[#allocation3 + $0x8] sm:$0xe] %v500_v26  ;;  %v481_v36 = vld [vmem:[#allocation2 + $0x20] sm:$0xe]  ;;  %v485_v37 = vld [vmem:[#allocation2 + $0x20] sm:$0x70]  ;;  %v576_v59 = vsel %vm570_vm12, %v571_v48, %v575_v31 }
  0xe0   :  { %v319_v38 = vpop.f32.mrf.mxu1  ;;  %537 = vst [vmem:[#allocation3 + $0x8] sm:$0x70] %v533_v34  ;;  %v493_v43 = vrot.slane %v485_v37, 3  ;;  %v514_v45 = vld [vmem:[#allocation2 + $0x20] sm:$0x70]  ;;  %v439_v1 = vrot.slane %v3513_v21, 1 }
  0xe1   :  { %v518_v5 = vld [vmem:[#allocation2 + $0x20] sm:$0xe]  ;;  %334 = vst [vmem:[#allocation2 + $0x8] sm:$0xff] %v318_v7  ;;  %v320_v46 = vadd.f32 %v319_v38, %v3495_v42  ;;  %v547_v52 = vld [vmem:[#allocation2 + $0x20] sm:$0x80] }
  0xe2   :  { %v526_v51 = vrot.slane %v518_v5, 5  ;;  %v559_v57 = vld [vmem:[#allocation2 + $0x20] sm:$0x1]  ;;  %v340_v61 = vld [vmem:[#allocation2 + $0x30] sm:$0x7]  ;;  %v501_v4 = vsel %vm353_vm11, %v481_v36, %v493_v43  ;;  %v592_v14 = vsel %vm353_vm11, %v547_v52, %v572_v63  ;;  %v442_v5 = vrot.slane %v3522_v35, 1 }
  0xe3   :  { %v577_v9 = vrot.slane %v559_v57, 7  ;;  %v344_v26 = vld [vmem:[#allocation2 + $0x28] sm:$0xe0]  ;;  %v386_v29 = vld [vmem:[#allocation2 + $0x28] sm:$0x1c]  ;;  %335 = vst [vmem:[#allocation2 + $0x38] sm:$0xff] %v320_v46  ;;  %v323_v33 = vpop.f32.mrf.mxu1 }
  0xe4   :  { %v534_v7 = vsel %vm353_vm11, %v514_v45, %v526_v51  ;;  %505 = vst [vmem:[#allocation3 + $0x20] sm:$0xe] %v501_v4  ;;  %600 = vst [vmem:[#allocation3 + $0x20] sm:$0x80] %v592_v14  ;;  %v358_v48 = vrot.slane %v344_v26, 5  ;;  %v394_v31 = vrot.slane %v386_v29, 7  ;;  %v324_v37 = vadd.f32 %v323_v33, %v3491_v39 }
  0xe5   :  { %v427_v34 = vld [vmem:[#allocation2 + $0x28] sm:$0x3]  ;;  %v382_v36 = vld [vmem:[#allocation2 + $0x30] sm:$0x38]  ;;  %v415_v38 = vld [vmem:[#allocation2 + $0x30] sm:$0xc0]  ;;  %v325_v3 = vpop.f32.mrf.mxu1  ;;  %v578_v51 = vsel %vm570_vm12, %v572_v63, %v577_v9 }
  0xe6   :  { %v550_v21 = vld [vmem:[#allocation2 + $0x28] sm:$0x3]  ;;  %v419_v43 = vld [vmem:[#allocation2 + $0x50] sm:$0x1]  ;;  %538 = vst [vmem:[#allocation3 + $0x20] sm:$0x70] %v534_v7  ;;  %v326_v29 = vadd.f32 %v325_v3, %v3495_v42  ;;  %v402_v3 = vsel %vm353_vm11, %v382_v36, %v394_v31 }
  0xe7   :  { %v440_v52 = vrot.slane %v427_v34, 1  ;;  %v612_v46 = vld [vmem:[#allocation2 + $0x28] sm:$0x1c]  ;;  %v645_v57 = vld [vmem:[#allocation2 + $0x28] sm:$0xe0]  ;;  %v595_v45 = vsel %vm353_vm11, %v550_v21, %v576_v59  ;;  %338 = vst [vmem:[#allocation2 + $0x10] sm:$0xff] %v324_v37  ;;  %v366_v59 = vsel %vm353_vm11, %v340_v61, %v358_v48 }
  0xe8   :  { %v632_v39 = vsel %vm353_vm11, %v612_v46, %v624_v49  ;;  %v665_v35 = vsel %vm353_vm11, %v645_v57, %v657_v53  ;;  %v345_v4 = vld [vmem:[#allocation2 + $0x48] sm:$0xe0]  ;;  %v387_v14 = vld [vmem:[#allocation2 + $0x48] sm:$0x1c]  ;;  %v428_v26 = vld [vmem:[#allocation2 + $0x48] sm:$0x3] }
  0xe9   :  { %603 = vst [vmem:[#allocation3 + $0x38] sm:$0x3] %v595_v45  ;;  %v441_v44 = vsel %vm149_vm0, %v439_v1, %v440_v52  ;;  %636 = vst [vmem:[#allocation3 + $0x38] sm:$0x1c] %v632_v39  ;;  %v359_v49 = vrot.slane %v345_v4, 5  ;;  %v395_v63 = vrot.slane %v387_v14, 7  ;;  %v463_v61 = vsel %vm353_vm11, %v419_v43, %v440_v52 }
  0xea   :  { %669 = vst [vmem:[#allocation3 + $0x38] sm:$0xe0] %v665_v35  ;;  %v443_v24 = vrot.slane %v428_v26, 1  ;;  %v551_v9 = vld [vmem:[#allocation2 + $0x48] sm:$0x3]  ;;  %339 = vst [vmem:[#allocation2 + $0x40] sm:$0xff] %v326_v29  ;;  %v459_v42 = vsel %vm353_vm11, %v415_v38, %v441_v44 }
  0xeb   :  { %370 = vst [vmem:[#allocation3 + $0x48] sm:$0x7] %v366_v59  ;;  %v341_v53 = vld [vmem:[#allocation2] sm:$0x7]  ;;  %v613_v33 = vld [vmem:[#allocation2 + $0x48] sm:$0x1c]  ;;  %v596_v1 = vsel %vm353_vm11, %v551_v9, %v578_v51 }
  0xec   :  { %v646_v7 = vld [vmem:[#allocation2 + $0x48] sm:$0xe0]  ;;  %v383_v48 = vld [vmem:[#allocation2] sm:$0x38]  ;;  %v416_v34 = vld [vmem:[#allocation2] sm:$0xc0]  ;;  %v444_v37 = vsel %vm149_vm0, %v442_v5, %v443_v24  ;;  %v633_v46 = vsel %vm353_vm11, %v613_v33, %v625_v41  ;;  %v367_v36 = vsel %vm353_vm11, %v341_v53, %v359_v49 }
  0xed   :  { %v420_v21 = vld [vmem:[#allocation2 + $0x20] sm:$0x1]  ;;  %v666_v31 = vsel %vm353_vm11, %v646_v7, %v658_v47  ;;  %406 = vst [vmem:[#allocation3 + $0x48] sm:$0x38] %v402_v3  ;;  %467 = vst [vmem:[#allocation3 + $0x48] sm:$0xc0] %v459_v42  ;;  %v403_v50 = vsel %vm353_vm11, %v383_v48, %v395_v63  ;;  %v460_v55 = vsel %vm353_vm11, %v416_v34, %v444_v37 }
  0xee   :  { %471 = vst [vmem:[#allocation3 + $0x8] sm:$0x1] %v463_v61  ;;  %604 = vst [vmem:[#allocation3 + $0x28] sm:$0x3] %v596_v1  ;;  %v556_v38 = vld [vmem:[#allocation2 + $0x58] sm:$0xc0]  ;;  %v464_v41 = vsel %vm353_vm11, %v420_v21, %v443_v24 }
  0xef   :  { %637 = vst [vmem:[#allocation3 + $0x28] sm:$0x1c] %v633_v46  ;;  %670 = vst [vmem:[#allocation3 + $0x28] sm:$0xe0] %v666_v31  ;;  %v3571_v43 = vld [vmem:[#allocation2 + $0x58] sm:$0x38] }
  0xf0   :  { %371 = vst [vmem:[#allocation3] sm:$0x7] %v367_v36  ;;  %407 = vst [vmem:[#allocation3] sm:$0x38] %v403_v50  ;;  %v573_v47 = vrot.slane %v556_v38, 7  ;;  %v626_v5 = vrot.slane %v3571_v43, 1 }
  0xf1   :  { %468 = vst [vmem:[#allocation3] sm:$0xc0] %v460_v55  ;;  %472 = vst [vmem:[#allocation3 + $0x20] sm:$0x1] %v464_v41  ;;  %v3580_v52 = vld [vmem:[#allocation2 + $0x58] sm:$0x7] }
  0xf2   :  { %v3582_v57 = vld [vmem:[#allocation2 + $0x18] sm:$0xc0]  ;;  %v3584_v45 = vld [vmem:[#allocation2 + $0x18] sm:$0x38]  ;;  %v3586_v51 = vld [vmem:[#allocation2 + $0x18] sm:$0x7] }
  0xf3   :  { %v482_v39 = vld [vmem:[#allocation2 + $0x8] sm:$0xe]  ;;  %v486_v35 = vld [vmem:[#allocation2 + $0x8] sm:$0x70]  ;;  %v659_v14 = vrot.slane %v3580_v52, 3  ;;  %v574_v44 = vrot.slane %v3582_v57, 7 }
  0xf4   :  { %v515_v4 = vld [vmem:[#allocation2 + $0x8] sm:$0x70]  ;;  %v494_v26 = vrot.slane %v486_v35, 3  ;;  %v519_v29 = vld [vmem:[#allocation2 + $0x8] sm:$0xe]  ;;  %v627_v53 = vrot.slane %v3584_v45, 1 }
  0xf5   :  { %v548_v59 = vld [vmem:[#allocation2 + $0x8] sm:$0x80]  ;;  %v527_v63 = vrot.slane %v519_v29, 5  ;;  %v560_v24 = vld [vmem:[#allocation2 + $0x8] sm:$0x1]  ;;  %v660_v33 = vrot.slane %v3586_v51, 3 }
  0xf6   :  { %v425_v49 = vld [vmem:[#allocation2 + $0x8] sm:$0x80]  ;;  %v593_v9 = vsel %vm353_vm11, %v548_v59, %v573_v47  ;;  %v502_v7 = vsel %vm353_vm11, %v482_v39, %v494_v26  ;;  %v579_v3 = vrot.slane %v560_v24, 7  ;;  %v3596_v42 = vld [vmem:[#allocation2 + $0x38] sm:$0x80] }
  0xf7   :  { %601 = vst [vmem:[#allocation3 + $0x18] sm:$0x80] %v593_v9  ;;  %v535_v61 = vsel %vm353_vm11, %v515_v4, %v527_v63  ;;  %506 = vst [vmem:[#allocation3 + $0x18] sm:$0xe] %v502_v7  ;;  %v483_v1 = vld [vmem:[#allocation2 + $0x38] sm:$0xe] }
  0xf8   :  { %v487_v48 = vld [vmem:[#allocation2 + $0x38] sm:$0x70]  ;;  %v445_v21 = vrot.slane %v425_v49, 1  ;;  %539 = vst [vmem:[#allocation3 + $0x18] sm:$0x70] %v535_v61  ;;  %v448_v43 = vrot.slane %v3596_v42, 1  ;;  %v580_v57 = vsel %vm570_vm12, %v573_v47, %v579_v3  ;;  %v748_v61 = vpop.f32.mrf.mxu0 }
  0xf9   :  { %v516_v34 = vld [vmem:[#allocation2 + $0x38] sm:$0x70]  ;;  %v495_v37 = vrot.slane %v487_v48, 3  ;;  %v520_v46 = vld [vmem:[#allocation2 + $0x38] sm:$0xe] }
  0xfa   :  { %v549_v31 = vld [vmem:[#allocation2 + $0x38] sm:$0x80]  ;;  %v342_v36 = vld [vmem:[#allocation2 + $0x58] sm:$0x7]  ;;  %v421_v38 = vld [vmem:[#allocation2 + $0x8] sm:$0x1] }
  0xfb   :  { %v528_v50 = vrot.slane %v520_v46, 5  ;;  %v561_v55 = vld [vmem:[#allocation2 + $0x38] sm:$0x1]  ;;  %v594_v41 = vsel %vm353_vm11, %v549_v31, %v574_v44  ;;  %v346_v52 = vld [vmem:[#allocation2 + $0x10] sm:$0xe0]  ;;  %v503_v39 = vsel %vm353_vm11, %v483_v1, %v495_v37 }
  0xfc   :  { %v581_v35 = vrot.slane %v561_v55, 7  ;;  %602 = vst [vmem:[#allocation3 + $0x40] sm:$0x80] %v594_v41  ;;  %v360_v4 = vrot.slane %v346_v52, 5  ;;  %v388_v26 = vld [vmem:[#allocation2 + $0x10] sm:$0x1c] }
  0xfd   :  { %v429_v29 = vld [vmem:[#allocation2 + $0x10] sm:$0x3]  ;;  %v384_v59 = vld [vmem:[#allocation2 + $0x58] sm:$0x38]  ;;  %v417_v49 = vld [vmem:[#allocation2 + $0x58] sm:$0xc0]  ;;  %v536_v63 = vsel %vm353_vm11, %v516_v34, %v528_v50 }
  0xfe   :  { %507 = vst [vmem:[#allocation3 + $0x40] sm:$0xe] %v503_v39  ;;  %v396_v24 = vrot.slane %v388_v26, 7  ;;  %v446_v9 = vrot.slane %v429_v29, 1  ;;  %v552_v7 = vld [vmem:[#allocation2 + $0x10] sm:$0x3]  ;;  %v368_v31 = vsel %vm353_vm11, %v342_v36, %v360_v4  ;;  %v582_v50 = vsel %vm570_vm12, %v574_v44, %v581_v35 }
  0xff   :  { %v614_v42 = vld [vmem:[#allocation2 + $0x10] sm:$0x1c]  ;;  %v343_v47 = vld [vmem:[#allocation2 + $0x18] sm:$0x7]  ;;  %v385_v3 = vld [vmem:[#allocation2 + $0x18] sm:$0x38]  ;;  %v597_v34 = vsel %vm353_vm11, %v552_v7, %v580_v57 }
 0x100   :  { %540 = vst [vmem:[#allocation3 + $0x40] sm:$0x70] %v536_v63  ;;  %v634_v1 = vsel %vm353_vm11, %v614_v42, %v626_v5  ;;  %v647_v48 = vld [vmem:[#allocation2 + $0x10] sm:$0xe0]  ;;  %v347_v37 = vld [vmem:[#allocation2 + $0x40] sm:$0xe0]  ;;  %v447_v55 = vsel %vm149_vm0, %v445_v21, %v446_v9  ;;  %v404_v57 = vsel %vm353_vm11, %v384_v59, %v396_v24  ;;  %v750_v42 = vpop.f32.mrf.mxu0 }
 0x101   :  { %v389_v46 = vld [vmem:[#allocation2 + $0x40] sm:$0x1c]  ;;  %v667_v41 = vsel %vm353_vm11, %v647_v48, %v659_v14  ;;  %638 = vst [vmem:[#allocation3 + $0x58] sm:$0x1c] %v634_v1  ;;  %v361_v52 = vrot.slane %v347_v37, 5  ;;  %v461_v44 = vsel %vm353_vm11, %v417_v49, %v447_v55  ;;  %v465_v14 = vsel %vm353_vm11, %v421_v38, %v446_v9 }
 0x102   :  { %v397_v39 = vrot.slane %v389_v46, 7  ;;  %v430_v5 = vld [vmem:[#allocation2 + $0x40] sm:$0x3]  ;;  %372 = vst [vmem:[#allocation3 + $0x50] sm:$0x7] %v368_v31 }
 0x103   :  { %v553_v26 = vld [vmem:[#allocation2 + $0x40] sm:$0x3]  ;;  %605 = vst [vmem:[#allocation3 + $0x58] sm:$0x3] %v597_v34  ;;  %671 = vst [vmem:[#allocation3 + $0x58] sm:$0xe0] %v667_v41  ;;  %v369_v1 = vsel %vm353_vm11, %v343_v47, %v361_v52 }
 0x104   :  { %v449_v29 = vrot.slane %v430_v5, 1  ;;  %v615_v36 = vld [vmem:[#allocation2 + $0x40] sm:$0x1c]  ;;  %v648_v4 = vld [vmem:[#allocation2 + $0x40] sm:$0xe0]  ;;  %v405_v59 = vsel %vm353_vm11, %v385_v3, %v397_v39  ;;  %v598_v38 = vsel %vm353_vm11, %v553_v26, %v582_v50 }
 0x105   :  { %v422_v21 = vld [vmem:[#allocation2 + $0x38] sm:$0x1]  ;;  %v635_v35 = vsel %vm353_vm11, %v615_v36, %v627_v53  ;;  %v678_v63 = vld [vmem:[#allocation3 + $0x48] sm:$0x7]  ;;  %v679_v7 = vld [vmem:[#allocation3] sm:$0x7]  ;;  %v668_v3 = vsel %vm353_vm11, %v648_v4, %v660_v33 }
 0x106   :  { %408 = vst [vmem:[#allocation3 + $0x50] sm:$0x38] %v404_v57  ;;  %469 = vst [vmem:[#allocation3 + $0x50] sm:$0xc0] %v461_v44  ;;  %v418_v49 = vld [vmem:[#allocation2 + $0x18] sm:$0xc0]  ;;  %v450_v45 = vsel %vm149_vm0, %v448_v43, %v449_v29  ;;  %v824_v53 = vadd.f32 %v748_v61, %v678_v63  ;;  %v825_v24 = vadd.f32 %v750_v42, %v679_v7  ;;  %v819_v61 = vpop.f32.mrf.mxu1 }
 0x107   :  { %473 = vst [vmem:[#allocation3 + $0x18] sm:$0x1] %v465_v14  ;;  %639 = vst [vmem:[#allocation3 + $0x10] sm:$0x1c] %v635_v35  ;;  %v466_v9 = vsel %vm353_vm11, %v422_v21, %v449_v29  ;;  %v462_v47 = vsel %vm353_vm11, %v418_v49, %v450_v45  ;;  %v852_v26 = vld [vmem:[#allocation4] sm:$0x7] }
 0x108   :  { %373 = vst [vmem:[#allocation3 + $0x30] sm:$0x7] %v369_v1  ;;  %409 = vst [vmem:[#allocation3 + $0x30] sm:$0x38] %v405_v59  ;;  %v2478_v48 = vmul.f32 -1.442695, %v824_v53  ;;  %v821_v31 = vpop.f32.mrf.mxu1 }
 0x109   :  { %606 = vst [vmem:[#allocation3 + $0x10] sm:$0x3] %v598_v38  ;;  %474 = vst [vmem:[#allocation3 + $0x40] sm:$0x1] %v466_v9  ;;  %v2479_v43 = vmul.f32 -1.442695, %v825_v24 }
 0x10a   :  { %470 = vst [vmem:[#allocation3 + $0x30] sm:$0xc0] %v462_v47  ;;  %672 = vst [vmem:[#allocation3 + $0x10] sm:$0xe0] %v668_v3  ;;  %2582 = vpow2.f32 %v2478_v48  ;;  %v680_v37 = vld [vmem:[#allocation3 + $0x50] sm:$0x7] }
 0x10b   :  { %2584 = vpow2.f32 %v2479_v43  ;;  %v826_v46 = vadd.f32 %v819_v61, %v680_v37  ;;  %vm853_vm13 = vcmp.gt.f32.partialorder %v852_v26, 0.0  ;;  %v3650_v42 = vld [vmem:[%s4751_s3 + $0x1e0] sm:$0xff]  ;;  %v3656_v1 = vld [vmem:[%s4751_s3 + $0x1f0] sm:$0xff]  ;;  %v3666_v59 = vld [vmem:[%s4751_s3 + $0x1c8] sm:$0xff]  ;;  %v4821_v61 = vmov 0.0  }
 0x10c   :  { %v3672_v38 = vld [vmem:[%s4751_s3 + $0x1d8] sm:$0xff]  ;;  %v3678_v49 = vld [vmem:[%s4751_s3 + $0x1c0] sm:$0xff]  ;;  %v3684_v45 = vld [vmem:[%s4751_s3 + $0x1d0] sm:$0xff] }
 0x10d   :  { %v2480_v34 = vmul.f32 -1.442695, %v826_v46  ;;  %v3690_v53 = vld [vmem:[%s4751_s3 + $0x1a8] sm:$0xff]  ;;  %v3696_v24 = vld [vmem:[%s4751_s3 + $0x1b8] sm:$0xff]  ;;  %v3702_v9 = vld [vmem:[%s4751_s3 + $0x1a0] sm:$0xff] }
 0x10e   :  { %v3708_v47 = vld [vmem:[%s4751_s3 + $0x1b0] sm:$0xff]  ;;  %v3714_v3 = vld [vmem:[%s4751_s3 + $0x188] sm:$0xff]  ;;  %v3721_v48 = vld [vmem:[%s4751_s3 + $0x180] sm:$0xff] }
 0x10f   :  { %v681_v50 = vld [vmem:[#allocation3 + $0x30] sm:$0x7]  ;;  %2586 = vpow2.f32 %v2480_v34  ;;  %v3728_v43 = vld [vmem:[%s4751_s3 + $0x168] sm:$0xff] }
 0x110   :  { %v827_v55 = vadd.f32 %v821_v31, %v681_v50  ;;  %v860_v31 = vld [vmem:[#allocation3 + $0x48] sm:$0x38] }
 0x112   :  { %2588 = vtanh.f32 %v827_v55  ;;  %v861_v55 = vld [vmem:[#allocation3] sm:$0x38] }
 0x117   :  { %v2583_v41 = vpop.eup %2582 }
 0x118   :  { %v2585_v52 = vpop.eup %2584  ;;  %v837_v39 = vadd.f32 1.0, %v2583_v41 }
 0x119   :  { %v838_v51 = vadd.f32 1.0, %v2585_v52 }
 0x11a   :  { %2590 = vrcp.f32 %v837_v39 }
 0x11b   :  { %2592 = vrcp.f32 %v838_v51 }
 0x11c   :  { %v2587_v40 = vpop.eup %2586 }
 0x11d   :  { %v839_v36 = vadd.f32 1.0, %v2587_v40 }
 0x11f   :  { %v2589_v33 = vpop.eup %2588  ;;  %2594 = vrcp.f32 %v839_v36 }
 0x127   :  { %v2591_v5 = vpop.eup %2590 }
 0x128   :  { %v2593_v29 = vpop.eup %2592  ;;  %v848_v57 = vmul.f32 %v2591_v5, %v2589_v33  ;;  %v862_v33 = vld [vmem:[#allocation3 + $0x50] sm:$0x38] }
 0x129   :  { %v847_v4 = vmul.f32 0.0, %v2593_v29 }
 0x12b   :  { %v849_v44 = vadd.f32 %v848_v57, %v847_v4  ;;  %v863_v4 = vld [vmem:[#allocation3 + $0x30] sm:$0x38] }
 0x12c   :  { %v2595_v21 = vpop.eup %2594 }
 0x12d   :  { %2596 = vtanh.f32 %v849_v44  ;;  %v3643_v14 = vsel %vm853_vm13, %v849_v44, 0.0 }
 0x13a   :  { %v2597_v35 = vpop.eup %2596 }
 0x13b   :  { %v851_v63 = vmul.f32 %v2597_v35, %v2595_v21 }
 0x13d   :  { %2481 = vmatmul.mubr.msk.f32.vlgmr.msra.gmra.mxu0 %vm853_vm13, %v851_v63  ;;  %2482 = vmatmul.mubr.msk.f32.vlgmr.msra.gmra.mxu1 %vm853_vm13, %v851_v63  ;;  %v3645_v7 = vsel %vm853_vm13, %v851_v63, 0.0 }
 0x13e   :  { %1071 = vmatpush1.msra.mxu0 %v3650_v42  ;;  %1142 = vmatpush1.msra.mxu1 %v3656_v1  ;;  %857 = vst.msk [vmem:[#allocation5] sm:$0x7] %vm856_vm14, %v3645_v7 }
 0x13f   :  { %859 = vst.msk [vmem:[#allocation5 + $0x15] sm:$0x7] %vm858_vm15, %v3645_v7  ;;  %1072 = vmatprep.subr.mxu0 %v3666_v59  ;;  %1143 = vmatprep.subr.mxu1 %v3672_v38 }
 0x140   :  { %1073 = vmatpush1.msra.mxu0 %v3678_v49  ;;  %1144 = vmatpush1.msra.mxu1 %v3684_v45 }
 0x141   :  { %1074 = vmatprep.subr.mxu0 %v3690_v53  ;;  %1145 = vmatprep.subr.mxu1 %v3696_v24 }
 0x142   :  { %1075 = vmatpush1.msra.mxu0 %v3702_v9  ;;  %1146 = vmatpush1.msra.mxu1 %v3708_v47 }
 0x143   :  { %1076 = vmatprep.subr.mxu0 %v3714_v3  ;;  %1147 = vmatprep.subr.mxu1 %v3181_v54  ;;  %v3735_v54 = vld [vmem:[%s4751_s3 + $0x160] sm:$0xff] }
 0x144   :  { %1077 = vmatpush1.msra.mxu0 %v3721_v48  ;;  %1148 = vmatpush1.msra.mxu1 %v3193_v56  ;;  %v3742_v56 = vld [vmem:[%s4751_s3 + $0x148] sm:$0xff] }
 0x145   :  { %1078 = vmatprep.subr.mxu0 %v3728_v43  ;;  %1149 = vmatprep.subr.mxu1 %v3205_v58  ;;  %v3749_v58 = vld [vmem:[%s4751_s3 + $0x140] sm:$0xff] }
 0x146   :  { %1079 = vmatpush1.msra.mxu0 %v3735_v54  ;;  %1150 = vmatpush1.msra.mxu1 %v3219_v60  ;;  %v3756_v60 = vld [vmem:[%s4751_s3 + $0x128] sm:$0xff] }
 0x147   :  { %1080 = vmatprep.subr.mxu0 %v3742_v56  ;;  %1151 = vmatprep.subr.mxu1 %v3231_v62  ;;  %v3763_v62 = vld [vmem:[%s4751_s3 + $0x120] sm:$0xff] }
 0x148   :  { %1081 = vmatpush1.msra.mxu0 %v3749_v58  ;;  %1152 = vmatpush1.msra.mxu1 %v3244_v0  ;;  %v3770_v0 = vld [vmem:[%s4751_s3 + $0x108] sm:$0xff] }
 0x149   :  { %1082 = vmatprep.subr.mxu0 %v3756_v60  ;;  %1153 = vmatprep.subr.mxu1 %v3256_v2  ;;  %v3777_v2 = vld [vmem:[%s4751_s3 + $0x100] sm:$0xff] }
 0x14a   :  { %1083 = vmatpush1.msra.mxu0 %v3763_v62  ;;  %1154 = vmatpush1.msra.mxu1 %v3268_v6  ;;  %v3784_v6 = vld [vmem:[%s4751_s3 + $0xe8] sm:$0xff] }
 0x14b   :  { %1084 = vmatprep.subr.mxu0 %v3770_v0  ;;  %1155 = vmatprep.subr.mxu1 %v3280_v11  ;;  %v3791_v11 = vld [vmem:[%s4751_s3 + $0xe0] sm:$0xff] }
 0x14c   :  { %1085 = vmatpush1.msra.mxu0 %v3777_v2  ;;  %1156 = vmatpush1.msra.mxu1 %v3292_v16  ;;  %v3798_v16 = vld [vmem:[%s4751_s3 + $0xc8] sm:$0xff] }
 0x14d   :  { %1086 = vmatprep.subr.mxu0 %v3784_v6  ;;  %1157 = vmatprep.subr.mxu1 %v3299_v18  ;;  %v3805_v18 = vld [vmem:[%s4751_s3 + $0xc0] sm:$0xff] }
 0x14e   :  { %1087 = vmatpush1.msra.mxu0 %v3791_v11  ;;  %1158 = vmatpush1.msra.mxu1 %v3306_v20  ;;  %v3812_v20 = vld [vmem:[%s4751_s3 + $0xa8] sm:$0xff] }
 0x14f   :  { %1088 = vmatprep.subr.mxu0 %v3798_v16  ;;  %1159 = vmatprep.subr.mxu1 %v3316_v22  ;;  %v3819_v22 = vld [vmem:[%s4751_s3 + $0xa0] sm:$0xff] }
 0x150   :  { %1089 = vmatpush1.msra.mxu0 %v3805_v18  ;;  %1160 = vmatpush1.msra.mxu1 %v3322_v23  ;;  %4810 = vst [vmem:[#allocation6_spill] sm:$0xff] %v3819_v22  ;;  %v3826_v23 = vld [vmem:[%s4751_s3 + $0x88] sm:$0xff] }
 0x151   :  { %1090 = vmatprep.subr.mxu0 %v3812_v20  ;;  %1161 = vmatprep.subr.mxu1 %v3329_v25  ;;  %4811 = vst [vmem:[#allocation7_spill] sm:$0xff] %v3826_v23  ;;  %v3833_v25 = vld [vmem:[%s4751_s3 + $0x80] sm:$0xff] }
 0x152   :  { %1091 = vmatpush1.msra.mxu0 %v3819_v22  ;;  %1162 = vmatpush1.msra.mxu1 %v3335_v27  ;;  %4812 = vst [vmem:[#allocation8_spill] sm:$0xff] %v3833_v25  ;;  %v3840_v27 = vld [vmem:[%s4751_s3 + $0x68] sm:$0xff] }
 0x153   :  { %1092 = vmatprep.subr.mxu0 %v3826_v23  ;;  %1163 = vmatprep.subr.mxu1 %v3342_v28  ;;  %4813 = vst [vmem:[#allocation9_spill] sm:$0xff] %v3840_v27  ;;  %v3847_v28 = vld [vmem:[%s4751_s3 + $0x60] sm:$0xff] }
 0x154   :  { %1093 = vmatpush1.msra.mxu0 %v3833_v25  ;;  %1164 = vmatpush1.msra.mxu1 %v3349_v30  ;;  %4814 = vst [vmem:[#allocation10_spill] sm:$0xff] %v3847_v28  ;;  %v3854_v30 = vld [vmem:[%s4751_s3 + $0x48] sm:$0xff] }
 0x155   :  { %1094 = vmatprep.subr.mxu0 %v3840_v27  ;;  %1165 = vmatprep.subr.mxu1 %v3356_v32  ;;  %4815 = vst [vmem:[#allocation11_spill] sm:$0xff] %v3854_v30  ;;  %v3861_v32 = vld [vmem:[%s4751_s3 + $0x40] sm:$0xff] }
 0x156   :  { %1095 = vmatpush1.msra.mxu0 %v3847_v28  ;;  %1166 = vmatpush1.msra.mxu1 %v3363_v8  ;;  %4816 = vst [vmem:[#allocation12_spill] sm:$0xff] %v3861_v32  ;;  %v3868_v8 = vld [vmem:[%s4751_s3 + $0x28] sm:$0xff] }
 0x157   :  { %1096 = vmatprep.subr.mxu0 %v3854_v30  ;;  %1167 = vmatprep.subr.mxu1 %v3370_v10  ;;  %4817 = vst [vmem:[#allocation13_spill] sm:$0xff] %v3868_v8  ;;  %v3875_v10 = vld [vmem:[%s4751_s3 + $0x20] sm:$0xff] }
 0x158   :  { %1097 = vmatpush1.msra.mxu0 %v3861_v32  ;;  %1168 = vmatpush1.msra.mxu1 %v3377_v12  ;;  %4818 = vst [vmem:[#allocation14_spill] sm:$0xff] %v3875_v10  ;;  %v3882_v12 = vld [vmem:[%s4751_s3 + $0x8] sm:$0xff] }
 0x159   :  { %1098 = vmatprep.subr.mxu0 %v3868_v8  ;;  %1169 = vmatprep.subr.mxu1 %v3384_v13  ;;  %4819 = vst [vmem:[#allocation15_spill] sm:$0xff] %v3882_v12  ;;  %v3889_v13 = vld [vmem:[%s4751_s3] sm:$0xff] }
 0x15a   :  { %1099 = vmatpush1.msra.mxu0 %v3875_v10  ;;  %1170 = vmatpush1.msra.mxu1 %v3391_v15  ;;  %4820 = vst [vmem:[#allocation16_spill] sm:$0xff] %v3889_v13  ;;  %v3898_v15 = vld [vmem:[%s4751_s3 + $0x1e8] sm:$0xff] }
 0x15b   :  { %1100 = vmatprep.subr.mxu0 %v3882_v12  ;;  %1171 = vmatprep.subr.mxu1 %v3398_v17  ;;  %4822 = vst [vmem:[#allocation17_spill] sm:$0xff] %v3898_v15  ;;  %v3904_v17 = vld [vmem:[%s4751_s3 + $0x1f8] sm:$0xff] }
 0x15c   :  { %1101 = vmatpush1.msra.mxu0 %v3889_v13  ;;  %1134 = vmatprep.mubr.f32.mxu0 %v4821_v61  ;;  %4823 = vst [vmem:[#allocation18_spill] sm:$0xff] %v3904_v17 }
 0x15d   :  { %1172 = vmatpush1.msra.mxu1 %v3405_v19  ;;  %1205 = vmatprep.mubr.f32.mxu1 %v4821_v61 }
 0x15e   :  { %1307 = vmatprep.subr.mxu0 %v3898_v15  ;;  %1378 = vmatprep.subr.mxu1 %v3904_v17 }
 0x1fd   :  { %v930_v37 = vpop.f32.mrf.mxu0  ;;  %v1001_v39 = vpop.f32.mrf.mxu1 }
 0x1fe   :  { %v1010_v46 = vrot.slane %v930_v37, 5  ;;  %v1012_v40 = vrot.slane %v1001_v39, 5  ;;  %v1049_v39 = vld [vmem:[#allocation4 + $0x3] sm:$0x7] }
 0x1ff   :  { %v932_v19 = vpop.f32.mrf.mxu0  ;;  %v1003_v5 = vpop.f32.mrf.mxu1  ;;  %vm1050_vm0 = vcmp.gt.f32.partialorder %v1049_v39, 0.0  ;;  %v4044_v39 = vld [vmem:[%s4751_s3 + $0x98] sm:$0xff] }
 0x200   :  { %v1018_v34 = vadd.f32 %v1010_v46, %v860_v31  ;;  %v1011_v50 = vrot.slane %v932_v19, 5  ;;  %v1020_v26 = vadd.f32 %v1012_v40, %v862_v33  ;;  %v1013_v29 = vrot.slane %v1003_v5, 5  ;;  %4825 = vst [vmem:[#allocation20_spill] sm:$0xff] %v4044_v39 }
 0x201   :  { %v1042_v19 = vrot.slane %v3643_v14, 5 }
 0x202   :  { %v2483_v41 = vmul.f32 -1.442695, %v1018_v34  ;;  %v1019_v52 = vadd.f32 %v1011_v50, %v861_v55  ;;  %v2485_v36 = vmul.f32 -1.442695, %v1020_v26  ;;  %v1021_v44 = vadd.f32 %v1013_v29, %v863_v4 }
 0x204   :  { %2598 = vpow2.f32 %v2483_v41  ;;  %v2484_v51 = vmul.f32 -1.442695, %v1019_v52 }
 0x206   :  { %2600 = vpow2.f32 %v2484_v51 }
 0x207   :  { %2602 = vpow2.f32 %v2485_v36 }
 0x211   :  { %v2599_v57 = vpop.eup %2598 }
 0x212   :  { %v1031_v21 = vadd.f32 1.0, %v2599_v57  ;;  %v3946_v57 = vld [vmem:[%s4751_s3 + $0x178] sm:$0xff] }
 0x213   :  { %v2601_v35 = vpop.eup %2600 }
 0x214   :  { %2604 = vrcp.f32 %v1031_v21  ;;  %v1032_v63 = vadd.f32 1.0, %v2601_v35  ;;  %v2603_v37 = vpop.eup %2602  ;;  %v3960_v21 = vld [vmem:[%s4751_s3 + $0x158] sm:$0xff]  ;;  %v3967_v35 = vld [vmem:[%s4751_s3 + $0x150] sm:$0xff] }
 0x215   :  { %2606 = vtanh.f32 %v1021_v44  ;;  %v1033_v50 = vadd.f32 1.0, %v2603_v37  ;;  %v3953_v44 = vld [vmem:[%s4751_s3 + $0x170] sm:$0xff] }
 0x216   :  { %2608 = vrcp.f32 %v1032_v63  ;;  %v3974_v63 = vld [vmem:[%s4751_s3 + $0x138] sm:$0xff]  ;;  %v3981_v37 = vld [vmem:[%s4751_s3 + $0x130] sm:$0xff] }
 0x217   :  { %2610 = vrcp.f32 %v1033_v50  ;;  %v4016_v50 = vld [vmem:[%s4751_s3 + $0xd8] sm:$0xff] }
 0x221   :  { %v2605_v46 = vpop.eup %2604 }
 0x222   :  { %v2607_v31 = vpop.eup %2606 }
 0x223   :  { %v2609_v34 = vpop.eup %2608  ;;  %v1045_v41 = vmul.f32 %v2607_v31, %v2605_v46  ;;  %v3988_v46 = vld [vmem:[%s4751_s3 + $0x118] sm:$0xff]  ;;  %v3995_v31 = vld [vmem:[%s4751_s3 + $0x110] sm:$0xff] }
 0x224   :  { %v1044_v55 = vmul.f32 %v2609_v34, %v1042_v19  ;;  %v2611_v33 = vpop.eup %2610  ;;  %v4002_v19 = vld [vmem:[%s4751_s3 + $0xf8] sm:$0xff]  ;;  %v4009_v34 = vld [vmem:[%s4751_s3 + $0xf0] sm:$0xff] }
 0x226   :  { %v1046_v52 = vadd.f32 %v1045_v41, %v1044_v55  ;;  %v4023_v55 = vld [vmem:[%s4751_s3 + $0xd0] sm:$0xff]  ;;  %v4030_v41 = vld [vmem:[%s4751_s3 + $0xb8] sm:$0xff] }
 0x228   :  { %2612 = vtanh.f32 %v1046_v52  ;;  %v1057_v51 = vrot.slane %v1046_v52, 3  ;;  %v4037_v52 = vld [vmem:[%s4751_s3 + $0xb0] sm:$0xff] }
 0x229   :  { %4824 = vst [vmem:[#allocation19_spill] sm:$0xff] %v4037_v52 }
 0x22a   :  { %v3909_v40 = vsel %vm1050_vm0, %v1057_v51, %v3643_v14  ;;  %v3932_v14 = vld [vmem:[%s4751_s3 + $0x198] sm:$0xff]  ;;  %v4051_v51 = vld [vmem:[%s4751_s3 + $0x90] sm:$0xff] }
 0x22b   :  { %4826 = vst [vmem:[#allocation21_spill] sm:$0xff] %v4051_v51 }
 0x235   :  { %v2613_v5 = vpop.eup %2612 }
 0x236   :  { %v1048_v26 = vmul.f32 %v2613_v5, %v2611_v33  ;;  %v4058_v33 = vld [vmem:[%s4751_s3 + $0x78] sm:$0xff]  ;;  %v4065_v5 = vld [vmem:[%s4751_s3 + $0x70] sm:$0xff] }
 0x237   :  { %4827 = vst [vmem:[#allocation22_spill] sm:$0xff] %v4058_v33  ;;  %4828 = vst [vmem:[#allocation23_spill] sm:$0xff] %v4065_v5 }
 0x238   :  { %v1052_v29 = vrot.slane %v1048_v26, 3  ;;  %v4072_v26 = vld [vmem:[%s4751_s3 + $0x58] sm:$0xff] }
 0x239   :  { %4829 = vst [vmem:[#allocation24_spill] sm:$0xff] %v4072_v26 }
 0x23a   :  { %v1054_v36 = vsel %vm1050_vm0, %v1052_v29, 0.0  ;;  %v3912_v4 = vsel %vm1050_vm0, %v1052_v29, %v3645_v7  ;;  %v3939_v7 = vld [vmem:[%s4751_s3 + $0x190] sm:$0xff] }
 0x23b   :  { %1060 = vst.msk [vmem:[#allocation5 + $0x3] sm:$0x7] %vm856_vm14, %v1054_v36  ;;  %1135 = vmatmul.mubr.f32.vlgmr.msra.gmra.mxu0 %v3912_v4  ;;  %1206 = vmatmul.mubr.f32.vlgmr.msra.gmra.mxu1 %v3912_v4  ;;  %v4079_v29 = vld [vmem:[%s4751_s3 + $0x50] sm:$0xff] }
 0x23c   :  { %1061 = vst.msk [vmem:[#allocation5 + $0x12] sm:$0x7] %vm858_vm15, %v1054_v36  ;;  %1308 = vmatpush1.msra.mxu0 %v3650_v42  ;;  %1379 = vmatpush1.msra.mxu1 %v3656_v1  ;;  %4830 = vst [vmem:[#allocation25_spill] sm:$0xff] %v4079_v29  ;;  %v4086_v36 = vld [vmem:[%s4751_s3 + $0x38] sm:$0xff] }
 0x23d   :  { %1309 = vmatprep.subr.mxu0 %v3666_v59  ;;  %1380 = vmatprep.subr.mxu1 %v3672_v38  ;;  %4831 = vst [vmem:[#allocation26_spill] sm:$0xff] %v4086_v36 }
 0x23e   :  { %1310 = vmatpush1.msra.mxu0 %v3678_v49  ;;  %1381 = vmatpush1.msra.mxu1 %v3684_v45 }
 0x23f   :  { %1311 = vmatprep.subr.mxu0 %v3690_v53  ;;  %1382 = vmatprep.subr.mxu1 %v3696_v24 }
 0x240   :  { %1312 = vmatpush1.msra.mxu0 %v3702_v9  ;;  %1383 = vmatpush1.msra.mxu1 %v3708_v47 }
 0x241   :  { %1313 = vmatprep.subr.mxu0 %v3714_v3  ;;  %1384 = vmatprep.subr.mxu1 %v3932_v14 }
 0x242   :  { %1314 = vmatpush1.msra.mxu0 %v3721_v48  ;;  %1385 = vmatpush1.msra.mxu1 %v3939_v7 }
 0x243   :  { %1315 = vmatprep.subr.mxu0 %v3728_v43  ;;  %1386 = vmatprep.subr.mxu1 %v3946_v57 }
 0x244   :  { %1316 = vmatpush1.msra.mxu0 %v3735_v54  ;;  %1387 = vmatpush1.msra.mxu1 %v3953_v44 }
 0x245   :  { %1317 = vmatprep.subr.mxu0 %v3742_v56  ;;  %1388 = vmatprep.subr.mxu1 %v3960_v21 }
 0x246   :  { %1318 = vmatpush1.msra.mxu0 %v3749_v58  ;;  %1389 = vmatpush1.msra.mxu1 %v3967_v35 }
 0x247   :  { %1319 = vmatprep.subr.mxu0 %v3756_v60  ;;  %1390 = vmatprep.subr.mxu1 %v3974_v63 }
 0x248   :  { %1320 = vmatpush1.msra.mxu0 %v3763_v62  ;;  %1391 = vmatpush1.msra.mxu1 %v3981_v37 }
 0x249   :  { %1321 = vmatprep.subr.mxu0 %v3770_v0  ;;  %1392 = vmatprep.subr.mxu1 %v3988_v46 }
 0x24a   :  { %1322 = vmatpush1.msra.mxu0 %v3777_v2  ;;  %1393 = vmatpush1.msra.mxu1 %v3995_v31 }
 0x24b   :  { %1323 = vmatprep.subr.mxu0 %v3784_v6  ;;  %1394 = vmatprep.subr.mxu1 %v4002_v19 }
 0x24c   :  { %1324 = vmatpush1.msra.mxu0 %v3791_v11  ;;  %1395 = vmatpush1.msra.mxu1 %v4009_v34 }
 0x24d   :  { %1325 = vmatprep.subr.mxu0 %v3798_v16  ;;  %1396 = vmatprep.subr.mxu1 %v4016_v50 }
 0x24e   :  { %1326 = vmatpush1.msra.mxu0 %v3805_v18  ;;  %1397 = vmatpush1.msra.mxu1 %v4023_v55 }
 0x24f   :  { %1327 = vmatprep.subr.mxu0 %v3812_v20  ;;  %1398 = vmatprep.subr.mxu1 %v4030_v41 }
 0x250   :  { %1328 = vmatpush1.msra.mxu0 %v3819_v22  ;;  %1399 = vmatpush1.msra.mxu1 %v4037_v52  ;;  %v1069_v52 = vld [vmem:[#allocation3 + $0x40] sm:$0x1] }
 0x251   :  { %1329 = vmatprep.subr.mxu0 %v3826_v23  ;;  %1400 = vmatprep.subr.mxu1 %v4044_v39  ;;  %v1068_v23 = vld [vmem:[#allocation3 + $0x18] sm:$0x1] }
 0x252   :  { %1330 = vmatpush1.msra.mxu0 %v3833_v25  ;;  %1401 = vmatpush1.msra.mxu1 %v4051_v51 }
 0x253   :  { %1331 = vmatprep.subr.mxu0 %v3840_v27  ;;  %1402 = vmatprep.subr.mxu1 %v4058_v33  ;;  %v1067_v27 = vld [vmem:[#allocation3 + $0x20] sm:$0x1] }
 0x254   :  { %1332 = vmatpush1.msra.mxu0 %v3847_v28  ;;  %1403 = vmatpush1.msra.mxu1 %v4065_v5 }
 0x255   :  { %1333 = vmatprep.subr.mxu0 %v3854_v30  ;;  %1404 = vmatprep.subr.mxu1 %v4072_v26  ;;  %v1063_v30 = vld [vmem:[#allocation3] sm:$0xc0] }
 0x256   :  { %1334 = vmatpush1.msra.mxu0 %v3861_v32  ;;  %1405 = vmatpush1.msra.mxu1 %v4079_v29  ;;  %v4093_v32 = vld [vmem:[%s4751_s3 + $0x30] sm:$0xff] }
 0x257   :  { %1335 = vmatprep.subr.mxu0 %v3868_v8  ;;  %1406 = vmatprep.subr.mxu1 %v4086_v36  ;;  %4832 = vst [vmem:[#allocation27_spill] sm:$0xff] %v4093_v32  ;;  %v4100_v8 = vld [vmem:[%s4751_s3 + $0x18] sm:$0xff]  ;;  %v1066_v36 = vld [vmem:[#allocation3 + $0x8] sm:$0x1] }
 0x258   :  { %1336 = vmatpush1.msra.mxu0 %v3875_v10  ;;  %1407 = vmatpush1.msra.mxu1 %v4093_v32  ;;  %4833 = vst [vmem:[#allocation28_spill] sm:$0xff] %v4100_v8  ;;  %v4108_v10 = vld [vmem:[%s4751_s3 + $0x10] sm:$0xff] }
 0x259   :  { %1337 = vmatprep.subr.mxu0 %v3882_v12  ;;  %1408 = vmatprep.subr.mxu1 %v4100_v8  ;;  %4834 = vst [vmem:[#allocation29_spill] sm:$0xff] %v4108_v10  ;;  %v1062_v8 = vld [vmem:[#allocation3 + $0x48] sm:$0xc0] }
 0x25a   :  { %1338 = vmatpush1.msra.mxu0 %v3889_v13  ;;  %1371 = vmatprep.mubr.f32.mxu0 %v4821_v61 }
 0x25b   :  { %1409 = vmatpush1.msra.mxu1 %v4108_v10  ;;  %1442 = vmatprep.mubr.f32.mxu1 %v4821_v61 }
 0x25c   :  { %1509 = vmatprep.subr.mxu0 %v3898_v15  ;;  %1580 = vmatprep.subr.mxu1 %v3904_v17 }
 0x2fb   :  { %v1136_v12 = vpop.f32.mrf.mxu0  ;;  %v1207_v51 = vpop.f32.mrf.mxu1 }
 0x2fc   :  { %v1216_v32 = vrot.slane %v1136_v12, 2  ;;  %v1218_v17 = vrot.slane %v1207_v51, 2  ;;  %v1064_v12 = vld [vmem:[#allocation3 + $0x50] sm:$0xc0] }
 0x2fd   :  { %v1138_v13 = vpop.f32.mrf.mxu0  ;;  %v1209_v39 = vpop.f32.mrf.mxu1 }
 0x2fe   :  { %v1224_v29 = vadd.f32 %v1216_v32, %v1062_v8  ;;  %v1228_v26 = vadd.f32 %v1216_v32, %v1066_v36  ;;  %v1217_v5 = vrot.slane %v1138_v13, 2  ;;  %v1226_v8 = vadd.f32 %v1218_v17, %v1064_v12 }
 0x2ff   :  { %v1230_v32 = vadd.f32 %v1218_v17, %v1068_v23  ;;  %v1219_v36 = vrot.slane %v1209_v39, 2 }
 0x300   :  { %v2486_v28 = vmul.f32 -1.442695, %v1224_v29  ;;  %v2489_v33 = vmul.f32 -1.442695, %v1228_v26  ;;  %v1225_v10 = vadd.f32 %v1217_v5, %v1063_v30  ;;  %v1229_v25 = vadd.f32 %v1217_v5, %v1067_v27  ;;  %v1065_v26 = vld [vmem:[#allocation3 + $0x30] sm:$0xc0] }
 0x301   :  { %v2488_v13 = vmul.f32 -1.442695, %v1226_v8  ;;  %v2491_v29 = vmul.f32 -1.442695, %v1230_v32  ;;  %v1227_v22 = vadd.f32 %v1219_v36, %v1065_v26  ;;  %v1231_v27 = vadd.f32 %v1219_v36, %v1069_v52 }
 0x302   :  { %2614 = vpow2.f32 %v2486_v28  ;;  %v2487_v15 = vmul.f32 -1.442695, %v1225_v10  ;;  %v2490_v61 = vmul.f32 -1.442695, %v1229_v25  ;;  %v1271_v8 = vrot.slane %v3909_v40, 2 }
 0x303   :  { %2616 = vpow2.f32 %v2489_v33 }
 0x304   :  { %2618 = vpow2.f32 %v2487_v15 }
 0x305   :  { %2620 = vpow2.f32 %v2490_v61 }
 0x306   :  { %2622 = vpow2.f32 %v2488_v13 }
 0x307   :  { %2624 = vpow2.f32 %v2491_v29 }
 0x308   :  { %2626 = vtanh.f32 %v1227_v22 }
 0x309   :  { %2628 = vtanh.f32 %v1231_v27 }
 0x30f   :  { %v2615_v30 = vpop.eup %2614 }
 0x310   :  { %v2617_v28 = vpop.eup %2616  ;;  %v1250_v33 = vadd.f32 1.0, %v2615_v30 }
 0x311   :  { %v1253_v25 = vadd.f32 1.0, %v2617_v28  ;;  %v2619_v10 = vpop.eup %2618 }
 0x312   :  { %v2621_v61 = vpop.eup %2620  ;;  %2630 = vrcp.f32 %v1250_v33  ;;  %v1251_v15 = vadd.f32 1.0, %v2619_v10 }
 0x313   :  { %2632 = vrcp.f32 %v1253_v25  ;;  %v1254_v23 = vadd.f32 1.0, %v2621_v61  ;;  %v2623_v17 = vpop.eup %2622  ;;  %v1283_v25 = vld [vmem:[#allocation4 + $0x6] sm:$0x7] }
 0x314   :  { %2634 = vrcp.f32 %v1251_v15  ;;  %v2625_v39 = vpop.eup %2624  ;;  %v1252_v32 = vadd.f32 1.0, %v2623_v17  ;;  %vm1284_vm2 = vcmp.gt.f32.partialorder %v1283_v25, 0.0  ;;  %v4843_v25 = vld [vmem:[#allocation10_spill] sm:$0xff] }
 0x315   :  { %2636 = vrcp.f32 %v1254_v23  ;;  %v2627_v51 = vpop.eup %2626  ;;  %v1255_v22 = vadd.f32 1.0, %v2625_v39 }
 0x316   :  { %v2629_v5 = vpop.eup %2628  ;;  %2638 = vrcp.f32 %v1252_v32 }
 0x317   :  { %2640 = vrcp.f32 %v1255_v22 }
 0x31f   :  { %v2631_v52 = vpop.eup %2630 }
 0x320   :  { %v2633_v12 = vpop.eup %2632  ;;  %v1275_v29 = vmul.f32 %v2631_v52, %v2627_v51 }
 0x321   :  { %v2635_v36 = vpop.eup %2634  ;;  %v1276_v30 = vmul.f32 %v2633_v12, %v2629_v5 }
 0x322   :  { %v2637_v13 = vpop.eup %2636  ;;  %v1273_v26 = vmul.f32 %v2635_v36, %v1271_v8 }
 0x323   :  { %v1274_v27 = vmul.f32 %v2637_v13, %v1271_v8  ;;  %v2639_v17 = vpop.eup %2638 }
 0x324   :  { %v1277_v28 = vadd.f32 %v1275_v29, %v1273_v26  ;;  %v2641_v39 = vpop.eup %2640  ;;  %v4837_v29 = vld [vmem:[#allocation7_spill] sm:$0xff]  ;;  %v4838_v26 = vld [vmem:[#allocation20_spill] sm:$0xff] }
 0x325   :  { %v1278_v33 = vadd.f32 %v1276_v30, %v1274_v27  ;;  %v4839_v30 = vld [vmem:[#allocation8_spill] sm:$0xff]  ;;  %v4840_v27 = vld [vmem:[#allocation21_spill] sm:$0xff] }
 0x326   :  { %2642 = vtanh.f32 %v1277_v28  ;;  %v1296_v10 = vrot.slane %v1277_v28, 6  ;;  %v4841_v28 = vld [vmem:[#allocation9_spill] sm:$0xff] }
 0x327   :  { %2644 = vtanh.f32 %v1278_v33  ;;  %v1297_v61 = vrot.slane %v1278_v33, 6  ;;  %v4842_v33 = vld [vmem:[#allocation22_spill] sm:$0xff] }
 0x329   :  { %v1298_v15 = vsel %vm1287_vm1, %v1296_v10, %v1297_v61  ;;  %v4844_v10 = vld [vmem:[#allocation23_spill] sm:$0xff] }
 0x32a   :  { %v4116_v23 = vsel %vm1284_vm2, %v1298_v15, %v3909_v40  ;;  %v4835_v40 = vld [vmem:[#allocation6_spill] sm:$0xff]  ;;  %v4845_v61 = vld [vmem:[#allocation11_spill] sm:$0xff]  ;;  %v4846_v15 = vld [vmem:[#allocation24_spill] sm:$0xff] }
 0x333   :  { %v2643_v51 = vpop.eup %2642 }
 0x334   :  { %v2645_v5 = vpop.eup %2644  ;;  %v1281_v52 = vmul.f32 %v2643_v51, %v2639_v17  ;;  %v4847_v17 = vld [vmem:[#allocation12_spill] sm:$0xff]  ;;  %v4849_v51 = vld [vmem:[#allocation13_spill] sm:$0xff] }
 0x335   :  { %v1282_v12 = vmul.f32 %v2645_v5, %v2641_v39  ;;  %v4848_v39 = vld [vmem:[#allocation25_spill] sm:$0xff]  ;;  %v4850_v5 = vld [vmem:[#allocation26_spill] sm:$0xff] }
 0x336   :  { %v1288_v8 = vrot.slane %v1281_v52, 6  ;;  %v4851_v52 = vld [vmem:[#allocation14_spill] sm:$0xff] }
 0x337   :  { %v1289_v32 = vrot.slane %v1282_v12, 6  ;;  %v4852_v12 = vld [vmem:[#allocation27_spill] sm:$0xff] }
 0x339   :  { %v1290_v36 = vsel %vm1287_vm1, %v1288_v8, %v1289_v32  ;;  %v4853_v8 = vld [vmem:[#allocation15_spill] sm:$0xff]  ;;  %v4854_v32 = vld [vmem:[#allocation28_spill] sm:$0xff] }
 0x33a   :  { %v1292_v22 = vsel %vm1284_vm2, %v1290_v36, 0.0  ;;  %v4119_v13 = vsel %vm1284_vm2, %v1290_v36, %v3912_v4  ;;  %v4836_v4 = vld [vmem:[#allocation19_spill] sm:$0xff]  ;;  %v4855_v36 = vld [vmem:[#allocation16_spill] sm:$0xff] }
 0x33b   :  { %1301 = vst.msk [vmem:[#allocation5 + $0x6] sm:$0x7] %vm856_vm14, %v1292_v22  ;;  %1372 = vmatmul.mubr.f32.vlgmr.msra.gmra.mxu0 %v4119_v13  ;;  %1443 = vmatmul.mubr.f32.vlgmr.msra.gmra.mxu1 %v4119_v13 }
 0x33c   :  { %1302 = vst.msk [vmem:[#allocation5 + $0xf] sm:$0x7] %vm858_vm15, %v1292_v22  ;;  %1510 = vmatpush1.msra.mxu0 %v3650_v42  ;;  %1581 = vmatpush1.msra.mxu1 %v3656_v1  ;;  %v4856_v22 = vmov 0.0  }
 0x33d   :  { %1511 = vmatprep.subr.mxu0 %v3666_v59  ;;  %1582 = vmatprep.subr.mxu1 %v3672_v38 }
 0x33e   :  { %1512 = vmatpush1.msra.mxu0 %v3678_v49  ;;  %1583 = vmatpush1.msra.mxu1 %v3684_v45 }
 0x33f   :  { %1513 = vmatprep.subr.mxu0 %v3690_v53  ;;  %1584 = vmatprep.subr.mxu1 %v3696_v24 }
 0x340   :  { %1514 = vmatpush1.msra.mxu0 %v3702_v9  ;;  %1585 = vmatpush1.msra.mxu1 %v3708_v47 }
 0x341   :  { %1515 = vmatprep.subr.mxu0 %v3714_v3  ;;  %1586 = vmatprep.subr.mxu1 %v3932_v14 }
 0x342   :  { %1516 = vmatpush1.msra.mxu0 %v3721_v48  ;;  %1587 = vmatpush1.msra.mxu1 %v3939_v7 }
 0x343   :  { %1517 = vmatprep.subr.mxu0 %v3728_v43  ;;  %1588 = vmatprep.subr.mxu1 %v3946_v57 }
 0x344   :  { %1518 = vmatpush1.msra.mxu0 %v3735_v54  ;;  %1589 = vmatpush1.msra.mxu1 %v3953_v44 }
 0x345   :  { %1519 = vmatprep.subr.mxu0 %v3742_v56  ;;  %1590 = vmatprep.subr.mxu1 %v3960_v21 }
 0x346   :  { %1520 = vmatpush1.msra.mxu0 %v3749_v58  ;;  %1591 = vmatpush1.msra.mxu1 %v3967_v35 }
 0x347   :  { %1521 = vmatprep.subr.mxu0 %v3756_v60  ;;  %1592 = vmatprep.subr.mxu1 %v3974_v63 }
 0x348   :  { %1522 = vmatpush1.msra.mxu0 %v3763_v62  ;;  %1593 = vmatpush1.msra.mxu1 %v3981_v37 }
 0x349   :  { %1523 = vmatprep.subr.mxu0 %v3770_v0  ;;  %1594 = vmatprep.subr.mxu1 %v3988_v46 }
 0x34a   :  { %1524 = vmatpush1.msra.mxu0 %v3777_v2  ;;  %1595 = vmatpush1.msra.mxu1 %v3995_v31 }
 0x34b   :  { %1525 = vmatprep.subr.mxu0 %v3784_v6  ;;  %1596 = vmatprep.subr.mxu1 %v4002_v19 }
 0x34c   :  { %1526 = vmatpush1.msra.mxu0 %v3791_v11  ;;  %1597 = vmatpush1.msra.mxu1 %v4009_v34 }
 0x34d   :  { %1527 = vmatprep.subr.mxu0 %v3798_v16  ;;  %1598 = vmatprep.subr.mxu1 %v4016_v50 }
 0x34e   :  { %1528 = vmatpush1.msra.mxu0 %v3805_v18  ;;  %1599 = vmatpush1.msra.mxu1 %v4023_v55 }
 0x34f   :  { %1529 = vmatprep.subr.mxu0 %v3812_v20  ;;  %1600 = vmatprep.subr.mxu1 %v4030_v41 }
 0x350   :  { %1530 = vmatpush1.msra.mxu0 %v4835_v40  ;;  %1601 = vmatpush1.msra.mxu1 %v4836_v4 }
 0x351   :  { %1531 = vmatprep.subr.mxu0 %v4837_v29  ;;  %1602 = vmatprep.subr.mxu1 %v4838_v26 }
 0x352   :  { %1532 = vmatpush1.msra.mxu0 %v4839_v30  ;;  %1603 = vmatpush1.msra.mxu1 %v4840_v27 }
 0x353   :  { %1533 = vmatprep.subr.mxu0 %v4841_v28  ;;  %1604 = vmatprep.subr.mxu1 %v4842_v33  ;;  %v1305_v28 = vld [vmem:[#allocation3 + $0x18] sm:$0xe] }
 0x354   :  { %1534 = vmatpush1.msra.mxu0 %v4843_v25  ;;  %1605 = vmatpush1.msra.mxu1 %v4844_v10  ;;  %v1304_v10 = vld [vmem:[#allocation3 + $0x20] sm:$0xe] }
 0x355   :  { %1535 = vmatprep.subr.mxu0 %v4845_v61  ;;  %1606 = vmatprep.subr.mxu1 %v4846_v15  ;;  %v4857_v15 = vld [vmem:[#allocation29_spill] sm:$0xff] }
 0x356   :  { %1536 = vmatpush1.msra.mxu0 %v4847_v17  ;;  %1607 = vmatpush1.msra.mxu1 %v4848_v39  ;;  %v4858_v39 = vld [vmem:[#allocation17_spill] sm:$0xff] }
 0x357   :  { %1537 = vmatprep.subr.mxu0 %v4849_v51  ;;  %1608 = vmatprep.subr.mxu1 %v4850_v5  ;;  %v4859_v51 = vld [vmem:[#allocation18_spill] sm:$0xff]  ;;  %v1303_v17 = vld [vmem:[#allocation3 + $0x8] sm:$0xe] }
 0x358   :  { %1538 = vmatpush1.msra.mxu0 %v4851_v52  ;;  %1609 = vmatpush1.msra.mxu1 %v4852_v12 }
 0x359   :  { %1539 = vmatprep.subr.mxu0 %v4853_v8  ;;  %1610 = vmatprep.subr.mxu1 %v4854_v32 }
 0x35a   :  { %1540 = vmatpush1.msra.mxu0 %v4855_v36  ;;  %1573 = vmatprep.mubr.f32.mxu0 %v4856_v22 }
 0x35b   :  { %1611 = vmatpush1.msra.mxu1 %v4857_v15  ;;  %1644 = vmatprep.mubr.f32.mxu1 %v4856_v22 }
 0x35c   :  { %1715 = vmatprep.subr.mxu0 %v4858_v39  ;;  %1786 = vmatprep.subr.mxu1 %v4859_v51  ;;  %v1306_v51 = vld [vmem:[#allocation3 + $0x40] sm:$0xe] }
 0x3fb   :  { %v1373_v5 = vpop.f32.mrf.mxu0  ;;  %v1444_v36 = vpop.f32.mrf.mxu1 }
 0x3fc   :  { %v1453_v52 = vrot.slane %v1373_v5, 7  ;;  %v1455_v15 = vrot.slane %v1444_v36, 7 }
 0x3fd   :  { %v1375_v12 = vpop.f32.mrf.mxu0  ;;  %v1446_v22 = vpop.f32.mrf.mxu1 }
 0x3fe   :  { %v1461_v61 = vadd.f32 %v1453_v52, %v1303_v17  ;;  %v1454_v8 = vrot.slane %v1375_v12, 7  ;;  %v1463_v27 = vadd.f32 %v1455_v15, %v1305_v28  ;;  %v1456_v39 = vrot.slane %v1446_v22, 7 }
 0x400   :  { %v2492_v32 = vmul.f32 -1.442695, %v1461_v61  ;;  %v1462_v25 = vadd.f32 %v1454_v8, %v1304_v10  ;;  %v2494_v30 = vmul.f32 -1.442695, %v1463_v27  ;;  %v1464_v5 = vadd.f32 %v1456_v39, %v1306_v51  ;;  %v1492_v8 = vld [vmem:[#allocation4 + $0x9] sm:$0x7] }
 0x401   :  { %vm1493_vm3 = vcmp.gt.f32.partialorder %v1492_v8, 0.0 }
 0x402   :  { %2646 = vpow2.f32 %v2492_v32  ;;  %v2493_v33 = vmul.f32 -1.442695, %v1462_v25 }
 0x404   :  { %2648 = vpow2.f32 %v2493_v33  ;;  %v1485_v33 = vrot.slane %v4116_v23, 7 }
 0x405   :  { %2650 = vpow2.f32 %v2494_v30 }
 0x40f   :  { %v2647_v26 = vpop.eup %2646 }
 0x410   :  { %v1474_v29 = vadd.f32 1.0, %v2647_v26 }
 0x411   :  { %v2649_v4 = vpop.eup %2648 }
 0x412   :  { %2652 = vrcp.f32 %v1474_v29  ;;  %v1475_v17 = vadd.f32 1.0, %v2649_v4  ;;  %v2651_v10 = vpop.eup %2650 }
 0x413   :  { %2654 = vtanh.f32 %v1464_v5  ;;  %v1476_v12 = vadd.f32 1.0, %v2651_v10 }
 0x414   :  { %2656 = vrcp.f32 %v1475_v17  ;;  %v1506_v17 = vld [vmem:[#allocation3 + $0x20] sm:$0x70] }
 0x415   :  { %2658 = vrcp.f32 %v1476_v12  ;;  %v1507_v12 = vld [vmem:[#allocation3 + $0x18] sm:$0x70] }
 0x41f   :  { %v2653_v61 = vpop.eup %2652 }
 0x420   :  { %v2655_v25 = vpop.eup %2654 }
 0x421   :  { %v2657_v52 = vpop.eup %2656  ;;  %v1488_v15 = vmul.f32 %v2655_v25, %v2653_v61 }
 0x422   :  { %v1487_v28 = vmul.f32 %v2657_v52, %v1485_v33  ;;  %v2659_v4 = vpop.eup %2658 }
 0x424   :  { %v1489_v27 = vadd.f32 %v1488_v15, %v1487_v28 }
 0x426   :  { %2660 = vtanh.f32 %v1489_v27  ;;  %v1500_v26 = vrot.slane %v1489_v27, 1 }
 0x428   :  { %v4193_v29 = vsel %vm1493_vm3, %v1500_v26, %v4116_v23  ;;  %v1508_v26 = vld [vmem:[#allocation3 + $0x40] sm:$0x70] }
 0x433   :  { %v2661_v30 = vpop.eup %2660 }
 0x434   :  { %v1491_v39 = vmul.f32 %v2661_v30, %v2659_v4 }
 0x436   :  { %v1495_v51 = vrot.slane %v1491_v39, 1 }
 0x438   :  { %v1497_v32 = vsel %vm1493_vm3, %v1495_v51, 0.0  ;;  %v4196_v36 = vsel %vm1493_vm3, %v1495_v51, %v4119_v13  ;;  %v1505_v13 = vld [vmem:[#allocation3 + $0x8] sm:$0x70] }
 0x439   :  { %1503 = vst.msk [vmem:[#allocation5 + $0x9] sm:$0x7] %vm856_vm14, %v1497_v32  ;;  %1574 = vmatmul.mubr.f32.vlgmr.msra.gmra.mxu0 %v4196_v36  ;;  %1645 = vmatmul.mubr.f32.vlgmr.msra.gmra.mxu1 %v4196_v36 }
 0x43a   :  { %1504 = vst.msk [vmem:[#allocation5 + $0xc] sm:$0x7] %vm858_vm15, %v1497_v32  ;;  %1716 = vmatpush1.msra.mxu0 %v3650_v42  ;;  %1787 = vmatpush1.msra.mxu1 %v3656_v1  ;;  %v4860_v42 = vld [vmem:[#allocation19_spill] sm:$0xff] }
 0x43b   :  { %1717 = vmatprep.subr.mxu0 %v3666_v59  ;;  %1788 = vmatprep.subr.mxu1 %v3672_v38  ;;  %v4861_v1 = vld [vmem:[#allocation7_spill] sm:$0xff]  ;;  %v4862_v59 = vld [vmem:[#allocation20_spill] sm:$0xff] }
 0x43c   :  { %1718 = vmatpush1.msra.mxu0 %v3678_v49  ;;  %1789 = vmatpush1.msra.mxu1 %v3684_v45  ;;  %v4863_v38 = vld [vmem:[#allocation8_spill] sm:$0xff]  ;;  %v4864_v49 = vld [vmem:[#allocation21_spill] sm:$0xff] }
 0x43d   :  { %1719 = vmatprep.subr.mxu0 %v3690_v53  ;;  %1790 = vmatprep.subr.mxu1 %v3696_v24  ;;  %v4865_v45 = vld [vmem:[#allocation9_spill] sm:$0xff]  ;;  %v4866_v53 = vld [vmem:[#allocation22_spill] sm:$0xff] }
 0x43e   :  { %1720 = vmatpush1.msra.mxu0 %v3702_v9  ;;  %1791 = vmatpush1.msra.mxu1 %v3708_v47  ;;  %v4867_v24 = vld [vmem:[#allocation10_spill] sm:$0xff]  ;;  %v4868_v9 = vld [vmem:[#allocation23_spill] sm:$0xff] }
 0x43f   :  { %1721 = vmatprep.subr.mxu0 %v3714_v3  ;;  %1792 = vmatprep.subr.mxu1 %v3932_v14  ;;  %v4869_v47 = vld [vmem:[#allocation11_spill] sm:$0xff]  ;;  %v4870_v3 = vld [vmem:[#allocation24_spill] sm:$0xff] }
 0x440   :  { %1722 = vmatpush1.msra.mxu0 %v3721_v48  ;;  %1793 = vmatpush1.msra.mxu1 %v3939_v7  ;;  %v4871_v48 = vld [vmem:[#allocation12_spill] sm:$0xff] }
 0x441   :  { %1723 = vmatprep.subr.mxu0 %v3728_v43  ;;  %1794 = vmatprep.subr.mxu1 %v3946_v57  ;;  %v4872_v43 = vld [vmem:[#allocation25_spill] sm:$0xff] }
 0x442   :  { %1724 = vmatpush1.msra.mxu0 %v3735_v54  ;;  %1795 = vmatpush1.msra.mxu1 %v3953_v44  ;;  %v4873_v54 = vld [vmem:[#allocation13_spill] sm:$0xff] }
 0x443   :  { %1725 = vmatprep.subr.mxu0 %v3742_v56  ;;  %1796 = vmatprep.subr.mxu1 %v3960_v21  ;;  %v4874_v56 = vld [vmem:[#allocation26_spill] sm:$0xff] }
 0x444   :  { %1726 = vmatpush1.msra.mxu0 %v3749_v58  ;;  %1797 = vmatpush1.msra.mxu1 %v3967_v35  ;;  %v4875_v58 = vld [vmem:[#allocation14_spill] sm:$0xff] }
 0x445   :  { %1727 = vmatprep.subr.mxu0 %v3756_v60  ;;  %1798 = vmatprep.subr.mxu1 %v3974_v63  ;;  %v4876_v60 = vld [vmem:[#allocation27_spill] sm:$0xff] }
 0x446   :  { %1728 = vmatpush1.msra.mxu0 %v3763_v62  ;;  %1799 = vmatpush1.msra.mxu1 %v3981_v37  ;;  %v4877_v62 = vld [vmem:[#allocation15_spill] sm:$0xff] }
 0x447   :  { %1729 = vmatprep.subr.mxu0 %v3770_v0  ;;  %1800 = vmatprep.subr.mxu1 %v3988_v46  ;;  %v4878_v0 = vld [vmem:[#allocation28_spill] sm:$0xff] }
 0x448   :  { %1730 = vmatpush1.msra.mxu0 %v3777_v2  ;;  %1801 = vmatpush1.msra.mxu1 %v3995_v31  ;;  %v4879_v2 = vld [vmem:[#allocation16_spill] sm:$0xff] }
 0x449   :  { %1731 = vmatprep.subr.mxu0 %v3784_v6  ;;  %1802 = vmatprep.subr.mxu1 %v4002_v19  ;;  %v4880_v6 = vmov 0.0  }
 0x44a   :  { %1732 = vmatpush1.msra.mxu0 %v3791_v11  ;;  %1803 = vmatpush1.msra.mxu1 %v4009_v34  ;;  %v4881_v11 = vld [vmem:[#allocation29_spill] sm:$0xff] }
 0x44b   :  { %1733 = vmatprep.subr.mxu0 %v3798_v16  ;;  %1804 = vmatprep.subr.mxu1 %v4016_v50  ;;  %v4882_v16 = vld [vmem:[#allocation17_spill] sm:$0xff] }
 0x44c   :  { %1734 = vmatpush1.msra.mxu0 %v3805_v18  ;;  %1805 = vmatpush1.msra.mxu1 %v4023_v55  ;;  %v4883_v18 = vld [vmem:[#allocation18_spill] sm:$0xff] }
 0x44d   :  { %1735 = vmatprep.subr.mxu0 %v3812_v20  ;;  %1806 = vmatprep.subr.mxu1 %v4030_v41 }
 0x44e   :  { %1736 = vmatpush1.msra.mxu0 %v4835_v40  ;;  %1807 = vmatpush1.msra.mxu1 %v4860_v42 }
 0x44f   :  { %1737 = vmatprep.subr.mxu0 %v4861_v1  ;;  %1808 = vmatprep.subr.mxu1 %v4862_v59 }
 0x450   :  { %1738 = vmatpush1.msra.mxu0 %v4863_v38  ;;  %1809 = vmatpush1.msra.mxu1 %v4864_v49 }
 0x451   :  { %1739 = vmatprep.subr.mxu0 %v4865_v45  ;;  %1810 = vmatprep.subr.mxu1 %v4866_v53 }
 0x452   :  { %1740 = vmatpush1.msra.mxu0 %v4867_v24  ;;  %1811 = vmatpush1.msra.mxu1 %v4868_v9  ;;  %v1687_v24 = vrot.slane %v4193_v29, 4 }
 0x453   :  { %1741 = vmatprep.subr.mxu0 %v4869_v47  ;;  %1812 = vmatprep.subr.mxu1 %v4870_v3 }
 0x454   :  { %1742 = vmatpush1.msra.mxu0 %v4871_v48  ;;  %1813 = vmatpush1.msra.mxu1 %v4872_v43 }
 0x455   :  { %1743 = vmatprep.subr.mxu0 %v4873_v54  ;;  %1814 = vmatprep.subr.mxu1 %v4874_v56 }
 0x456   :  { %1744 = vmatpush1.msra.mxu0 %v4875_v58  ;;  %1815 = vmatpush1.msra.mxu1 %v4876_v60 }
 0x457   :  { %1745 = vmatprep.subr.mxu0 %v4877_v62  ;;  %1816 = vmatprep.subr.mxu1 %v4878_v0 }
 0x458   :  { %1746 = vmatpush1.msra.mxu0 %v4879_v2  ;;  %1779 = vmatprep.mubr.f32.mxu0 %v4880_v6  ;;  %v1694_v2 = vld [vmem:[#allocation4 + $0xc] sm:$0x7] }
 0x459   :  { %1817 = vmatpush1.msra.mxu1 %v4881_v11  ;;  %1850 = vmatprep.mubr.f32.mxu1 %v4880_v6  ;;  %vm1695_vm4 = vcmp.gt.f32.partialorder %v1694_v2, 0.0 }
 0x45a   :  { %1951 = vmatprep.subr.mxu0 %v4882_v16  ;;  %2022 = vmatprep.subr.mxu1 %v4883_v18 }
 0x4f9   :  { %v1575_v20 = vpop.f32.mrf.mxu0  ;;  %v1646_v25 = vpop.f32.mrf.mxu1 }
 0x4fa   :  { %v1655_v23 = vrot.slane %v1575_v20, 4  ;;  %v1657_v52 = vrot.slane %v1646_v25, 4  ;;  %v4312_v25 = vld [vmem:[%s4751_s3 + $0x1d0] sm:$0xff] }
 0x4fb   :  { %v1577_v40 = vpop.f32.mrf.mxu0  ;;  %v1648_v28 = vpop.f32.mrf.mxu1 }
 0x4fc   :  { %v1663_v22 = vadd.f32 %v1655_v23, %v1505_v13  ;;  %v1656_v5 = vrot.slane %v1577_v40, 4  ;;  %v1665_v15 = vadd.f32 %v1657_v52, %v1507_v12  ;;  %v1658_v27 = vrot.slane %v1648_v28, 4  ;;  %v4324_v52 = vld [vmem:[%s4751_s3 + $0x1b8] sm:$0xff]  ;;  %v4330_v12 = vld [vmem:[%s4751_s3 + $0x1a0] sm:$0xff]  ;;  %v4336_v28 = vld [vmem:[%s4751_s3 + $0x1b0] sm:$0xff] }
 0x4fe   :  { %v2495_v10 = vmul.f32 -1.442695, %v1663_v22  ;;  %v1664_v61 = vadd.f32 %v1656_v5, %v1506_v17  ;;  %v2497_v8 = vmul.f32 -1.442695, %v1665_v15  ;;  %v1666_v30 = vadd.f32 %v1658_v27, %v1508_v26  ;;  %v4294_v17 = vld [vmem:[%s4751_s3 + $0x1c8] sm:$0xff]  ;;  %v4349_v27 = vld [vmem:[%s4751_s3 + $0x180] sm:$0xff] }
 0x4ff   :  { %v4342_v15 = vld [vmem:[%s4751_s3 + $0x188] sm:$0xff] }
 0x500   :  { %2662 = vpow2.f32 %v2495_v10  ;;  %v2496_v33 = vmul.f32 -1.442695, %v1664_v61  ;;  %v4300_v10 = vld [vmem:[%s4751_s3 + $0x1d8] sm:$0xff]  ;;  %v4306_v61 = vld [vmem:[%s4751_s3 + $0x1c0] sm:$0xff] }
 0x502   :  { %2664 = vpow2.f32 %v2496_v33  ;;  %v4318_v33 = vld [vmem:[%s4751_s3 + $0x1a8] sm:$0xff] }
 0x503   :  { %2666 = vpow2.f32 %v2497_v8  ;;  %v4356_v8 = vld [vmem:[%s4751_s3 + $0x168] sm:$0xff] }
 0x50d   :  { %v2663_v4 = vpop.eup %2662 }
 0x50e   :  { %v1676_v39 = vadd.f32 1.0, %v2663_v4 }
 0x50f   :  { %v2665_v51 = vpop.eup %2664 }
 0x510   :  { %2668 = vrcp.f32 %v1676_v39  ;;  %v1677_v32 = vadd.f32 1.0, %v2665_v51  ;;  %v2667_v1 = vpop.eup %2666  ;;  %v1711_v39 = vld [vmem:[#allocation3 + $0x38] sm:$0x3] }
 0x511   :  { %2670 = vtanh.f32 %v1666_v30  ;;  %v1678_v48 = vadd.f32 1.0, %v2667_v1  ;;  %v1707_v30 = vld [vmem:[#allocation3 + $0x8] sm:$0x80] }
 0x512   :  { %2672 = vrcp.f32 %v1677_v32 }
 0x513   :  { %2674 = vrcp.f32 %v1678_v48 }
 0x51d   :  { %v2669_v38 = vpop.eup %2668 }
 0x51e   :  { %v2671_v45 = vpop.eup %2670 }
 0x51f   :  { %v2673_v47 = vpop.eup %2672  ;;  %v1690_v58 = vmul.f32 %v2671_v45, %v2669_v38 }
 0x520   :  { %v1689_v54 = vmul.f32 %v2673_v47, %v1687_v24  ;;  %v2675_v20 = vpop.eup %2674  ;;  %v1712_v47 = vld [vmem:[#allocation3 + $0x28] sm:$0x3] }
 0x522   :  { %v1691_v62 = vadd.f32 %v1690_v58, %v1689_v54 }
 0x524   :  { %2676 = vtanh.f32 %v1691_v62  ;;  %v1702_v16 = vrot.slane %v1691_v62, 4 }
 0x526   :  { %v4270_v18 = vsel %vm1695_vm4, %v1702_v16, %v4193_v29  ;;  %v4282_v29 = vld [vmem:[%s4751_s3 + $0x1e0] sm:$0xff] }
 0x531   :  { %v2677_v23 = vpop.eup %2676 }
 0x532   :  { %v1693_v13 = vmul.f32 %v2677_v23, %v2675_v20  ;;  %v1709_v20 = vld [vmem:[#allocation3 + $0x18] sm:$0x80] }
 0x534   :  { %v1697_v40 = vrot.slane %v1693_v13, 4  ;;  %v1713_v13 = vld [vmem:[#allocation3 + $0x58] sm:$0x3] }
 0x536   :  { %v1699_v22 = vsel %vm1695_vm4, %v1697_v40, 0.0  ;;  %v4273_v5 = vsel %vm1695_vm4, %v1697_v40, %v4196_v36  ;;  %v4288_v36 = vld [vmem:[%s4751_s3 + $0x1f0] sm:$0xff] }
 0x537   :  { %1705 = vst.msk [vmem:[#allocation5 + $0xc] sm:$0x7] %vm856_vm14, %v1699_v22  ;;  %1780 = vmatmul.mubr.f32.vlgmr.msra.gmra.mxu0 %v4273_v5  ;;  %1851 = vmatmul.mubr.f32.vlgmr.msra.gmra.mxu1 %v4273_v5 }
 0x538   :  { %1706 = vst.msk [vmem:[#allocation5 + $0x9] sm:$0x7] %vm858_vm15, %v1699_v22  ;;  %1952 = vmatpush1.msra.mxu0 %v4282_v29  ;;  %2023 = vmatpush1.msra.mxu1 %v4288_v36 }
 0x539   :  { %1953 = vmatprep.subr.mxu0 %v4294_v17  ;;  %2024 = vmatprep.subr.mxu1 %v4300_v10 }
 0x53a   :  { %1954 = vmatpush1.msra.mxu0 %v4306_v61  ;;  %2025 = vmatpush1.msra.mxu1 %v4312_v25 }
 0x53b   :  { %1955 = vmatprep.subr.mxu0 %v4318_v33  ;;  %2026 = vmatprep.subr.mxu1 %v4324_v52 }
 0x53c   :  { %1956 = vmatpush1.msra.mxu0 %v4330_v12  ;;  %2027 = vmatpush1.msra.mxu1 %v4336_v28 }
 0x53d   :  { %1957 = vmatprep.subr.mxu0 %v4342_v15  ;;  %2028 = vmatprep.subr.mxu1 %v3932_v14  ;;  %v4363_v14 = vld [vmem:[%s4751_s3 + $0x160] sm:$0xff] }
 0x53e   :  { %1958 = vmatpush1.msra.mxu0 %v4349_v27  ;;  %2029 = vmatpush1.msra.mxu1 %v3939_v7  ;;  %v4370_v7 = vld [vmem:[%s4751_s3 + $0x148] sm:$0xff] }
 0x53f   :  { %1959 = vmatprep.subr.mxu0 %v4356_v8  ;;  %2030 = vmatprep.subr.mxu1 %v3946_v57  ;;  %v4377_v57 = vld [vmem:[%s4751_s3 + $0x140] sm:$0xff] }
 0x540   :  { %1960 = vmatpush1.msra.mxu0 %v4363_v14  ;;  %2031 = vmatpush1.msra.mxu1 %v3953_v44  ;;  %v4384_v44 = vld [vmem:[%s4751_s3 + $0x128] sm:$0xff] }
 0x541   :  { %1961 = vmatprep.subr.mxu0 %v4370_v7  ;;  %2032 = vmatprep.subr.mxu1 %v3960_v21  ;;  %v4391_v21 = vld [vmem:[%s4751_s3 + $0x120] sm:$0xff] }
 0x542   :  { %1962 = vmatpush1.msra.mxu0 %v4377_v57  ;;  %2033 = vmatpush1.msra.mxu1 %v3967_v35  ;;  %v4398_v35 = vld [vmem:[%s4751_s3 + $0x108] sm:$0xff] }
 0x543   :  { %1963 = vmatprep.subr.mxu0 %v4384_v44  ;;  %2034 = vmatprep.subr.mxu1 %v3974_v63  ;;  %v4405_v63 = vld [vmem:[%s4751_s3 + $0x100] sm:$0xff] }
 0x544   :  { %1964 = vmatpush1.msra.mxu0 %v4391_v21  ;;  %2035 = vmatpush1.msra.mxu1 %v3981_v37  ;;  %v4412_v37 = vld [vmem:[%s4751_s3 + $0xe8] sm:$0xff] }
 0x545   :  { %1965 = vmatprep.subr.mxu0 %v4398_v35  ;;  %2036 = vmatprep.subr.mxu1 %v3988_v46  ;;  %v4419_v46 = vld [vmem:[%s4751_s3 + $0xe0] sm:$0xff] }
 0x546   :  { %1966 = vmatpush1.msra.mxu0 %v4405_v63  ;;  %2037 = vmatpush1.msra.mxu1 %v3995_v31  ;;  %v4426_v31 = vld [vmem:[%s4751_s3 + $0xc8] sm:$0xff] }
 0x547   :  { %1967 = vmatprep.subr.mxu0 %v4412_v37  ;;  %2038 = vmatprep.subr.mxu1 %v4002_v19  ;;  %v4433_v19 = vld [vmem:[%s4751_s3 + $0xc0] sm:$0xff] }
 0x548   :  { %1968 = vmatpush1.msra.mxu0 %v4419_v46  ;;  %2039 = vmatpush1.msra.mxu1 %v4009_v34  ;;  %v4440_v34 = vld [vmem:[%s4751_s3 + $0xa8] sm:$0xff] }
 0x549   :  { %1969 = vmatprep.subr.mxu0 %v4426_v31  ;;  %2040 = vmatprep.subr.mxu1 %v4016_v50  ;;  %v4447_v50 = vld [vmem:[%s4751_s3 + $0xa0] sm:$0xff] }
 0x54a   :  { %1970 = vmatpush1.msra.mxu0 %v4433_v19  ;;  %2041 = vmatpush1.msra.mxu1 %v4023_v55  ;;  %v4454_v55 = vld [vmem:[%s4751_s3 + $0x88] sm:$0xff] }
 0x54b   :  { %1971 = vmatprep.subr.mxu0 %v4440_v34  ;;  %2042 = vmatprep.subr.mxu1 %v4030_v41  ;;  %v4461_v41 = vld [vmem:[%s4751_s3 + $0x80] sm:$0xff] }
 0x54c   :  { %1972 = vmatpush1.msra.mxu0 %v4447_v50  ;;  %2043 = vmatpush1.msra.mxu1 %v4860_v42  ;;  %v4468_v42 = vld [vmem:[%s4751_s3 + $0x68] sm:$0xff] }
 0x54d   :  { %1973 = vmatprep.subr.mxu0 %v4454_v55  ;;  %2044 = vmatprep.subr.mxu1 %v4862_v59  ;;  %v4475_v59 = vld [vmem:[%s4751_s3 + $0x60] sm:$0xff] }
 0x54e   :  { %1974 = vmatpush1.msra.mxu0 %v4461_v41  ;;  %2045 = vmatpush1.msra.mxu1 %v4864_v49  ;;  %v4482_v49 = vld [vmem:[%s4751_s3 + $0x48] sm:$0xff] }
 0x54f   :  { %1975 = vmatprep.subr.mxu0 %v4468_v42  ;;  %2046 = vmatprep.subr.mxu1 %v4866_v53  ;;  %v4489_v53 = vld [vmem:[%s4751_s3 + $0x40] sm:$0xff] }
 0x550   :  { %1976 = vmatpush1.msra.mxu0 %v4475_v59  ;;  %2047 = vmatpush1.msra.mxu1 %v4868_v9  ;;  %v4496_v9 = vld [vmem:[%s4751_s3 + $0x28] sm:$0xff] }
 0x551   :  { %1977 = vmatprep.subr.mxu0 %v4482_v49  ;;  %2048 = vmatprep.subr.mxu1 %v4870_v3  ;;  %v4503_v3 = vld [vmem:[%s4751_s3 + $0x20] sm:$0xff] }
 0x552   :  { %1978 = vmatpush1.msra.mxu0 %v4489_v53  ;;  %2049 = vmatpush1.msra.mxu1 %v4872_v43  ;;  %v4510_v43 = vld [vmem:[%s4751_s3 + $0x8] sm:$0xff] }
 0x553   :  { %1979 = vmatprep.subr.mxu0 %v4496_v9  ;;  %2050 = vmatprep.subr.mxu1 %v4874_v56  ;;  %v4517_v56 = vld [vmem:[%s4751_s3] sm:$0xff] }
 0x554   :  { %1980 = vmatpush1.msra.mxu0 %v4503_v3  ;;  %2051 = vmatpush1.msra.mxu1 %v4876_v60  ;;  %v2842_v60 = vld [vmem:[%s4751_s3 + $0x1e8] sm:$0xff] }
 0x555   :  { %1981 = vmatprep.subr.mxu0 %v4510_v43  ;;  %2052 = vmatprep.subr.mxu1 %v4878_v0  ;;  %v2843_v0 = vld [vmem:[%s4751_s3 + $0x1f8] sm:$0xff] }
 0x556   :  { %1982 = vmatpush1.msra.mxu0 %v4517_v56  ;;  %2015 = vmatprep.mubr.f32.mxu0 %v4880_v6 }
 0x557   :  { %2053 = vmatpush1.msra.mxu1 %v4881_v11  ;;  %2086 = vmatprep.mubr.f32.mxu1 %v4880_v6  ;;  %v1708_v11 = vld [vmem:[#allocation3 + $0x20] sm:$0x80] }
 0x558   :  { %2153 = vmatprep.subr.mxu0 %v2842_v60  ;;  %2224 = vmatprep.subr.mxu1 %v2843_v0 }
 0x5f7   :  { %v1781_v26 = vpop.f32.mrf.mxu0  ;;  %v1852_v48 = vpop.f32.mrf.mxu1 }
 0x5f8   :  { %v1861_v4 = vrot.slane %v1781_v26, 1  ;;  %v1863_v16 = vrot.slane %v1852_v48, 1 }
 0x5f9   :  { %v1783_v51 = vpop.f32.mrf.mxu0  ;;  %v1854_v23 = vpop.f32.mrf.mxu1 }
 0x5fa   :  { %v1869_v32 = vadd.f32 %v1861_v4, %v1707_v30  ;;  %v1873_v1 = vadd.f32 %v1861_v4, %v1711_v39  ;;  %v1862_v38 = vrot.slane %v1783_v51, 1  ;;  %v1871_v40 = vadd.f32 %v1863_v16, %v1709_v20  ;;  %v1710_v4 = vld [vmem:[#allocation3 + $0x40] sm:$0x80]  ;;  %v1714_v30 = vld [vmem:[#allocation3 + $0x10] sm:$0x3] }
 0x5fb   :  { %v1875_v22 = vadd.f32 %v1863_v16, %v1713_v13  ;;  %v1864_v60 = vrot.slane %v1854_v23, 1  ;;  %v1916_v23 = vrot.slane %v4270_v18, 1 }
 0x5fc   :  { %v2498_v45 = vmul.f32 -1.442695, %v1869_v32  ;;  %v2501_v24 = vmul.f32 -1.442695, %v1873_v1  ;;  %v1870_v54 = vadd.f32 %v1862_v38, %v1708_v11  ;;  %v1874_v58 = vadd.f32 %v1862_v38, %v1712_v47 }
 0x5fd   :  { %v2500_v0 = vmul.f32 -1.442695, %v1871_v40  ;;  %v2503_v26 = vmul.f32 -1.442695, %v1875_v22  ;;  %v1872_v39 = vadd.f32 %v1864_v60, %v1710_v4  ;;  %v1876_v32 = vadd.f32 %v1864_v60, %v1714_v30 }
 0x5fe   :  { %2678 = vpow2.f32 %v2498_v45  ;;  %v2499_v62 = vmul.f32 -1.442695, %v1870_v54  ;;  %v2502_v2 = vmul.f32 -1.442695, %v1874_v58 }
 0x5ff   :  { %2680 = vpow2.f32 %v2501_v24 }
 0x600   :  { %2682 = vpow2.f32 %v2499_v62 }
 0x601   :  { %2684 = vpow2.f32 %v2502_v2 }
 0x602   :  { %2686 = vpow2.f32 %v2500_v0 }
 0x603   :  { %2688 = vpow2.f32 %v2503_v26 }
 0x604   :  { %2690 = vtanh.f32 %v1872_v39 }
 0x605   :  { %2692 = vtanh.f32 %v1876_v32  ;;  %v1928_v32 = vld [vmem:[#allocation4 + $0xf] sm:$0x7] }
 0x606   :  { %vm1929_vm5 = vcmp.gt.f32.partialorder %v1928_v32, 0.0 }
 0x60b   :  { %v2679_v51 = vpop.eup %2678 }
 0x60c   :  { %v2681_v1 = vpop.eup %2680  ;;  %v1895_v11 = vadd.f32 1.0, %v2679_v51 }
 0x60d   :  { %v1898_v38 = vadd.f32 1.0, %v2681_v1  ;;  %v2683_v45 = vpop.eup %2682 }
 0x60e   :  { %v2685_v24 = vpop.eup %2684  ;;  %2694 = vrcp.f32 %v1895_v11  ;;  %v1896_v47 = vadd.f32 1.0, %v2683_v45 }
 0x60f   :  { %2696 = vrcp.f32 %v1898_v38  ;;  %v1899_v48 = vadd.f32 1.0, %v2685_v24  ;;  %v2687_v54 = vpop.eup %2686 }
 0x610   :  { %2698 = vrcp.f32 %v1896_v47  ;;  %v2689_v58 = vpop.eup %2688  ;;  %v1897_v13 = vadd.f32 1.0, %v2687_v54 }
 0x611   :  { %2700 = vrcp.f32 %v1899_v48  ;;  %v2691_v62 = vpop.eup %2690  ;;  %v1900_v22 = vadd.f32 1.0, %v2689_v58 }
 0x612   :  { %v2693_v2 = vpop.eup %2692  ;;  %2702 = vrcp.f32 %v1897_v13 }
 0x613   :  { %2704 = vrcp.f32 %v1900_v22 }
 0x61b   :  { %v2695_v16 = vpop.eup %2694 }
 0x61c   :  { %v2697_v20 = vpop.eup %2696  ;;  %v1920_v0 = vmul.f32 %v2695_v16, %v2691_v62 }
 0x61d   :  { %v2699_v40 = vpop.eup %2698  ;;  %v1921_v4 = vmul.f32 %v2697_v20, %v2693_v2 }
 0x61e   :  { %v2701_v60 = vpop.eup %2700  ;;  %v1918_v26 = vmul.f32 %v2699_v40, %v1916_v23  ;;  %v1949_v40 = vld [vmem:[#allocation3 + $0x58] sm:$0x1c] }
 0x61f   :  { %v1919_v30 = vmul.f32 %v2701_v60, %v1916_v23  ;;  %v2703_v24 = vpop.eup %2702 }
 0x620   :  { %v1922_v39 = vadd.f32 %v1920_v0, %v1918_v26  ;;  %v2705_v47 = vpop.eup %2704 }
 0x621   :  { %v1923_v51 = vadd.f32 %v1921_v4, %v1919_v30  ;;  %v1950_v4 = vld [vmem:[#allocation3 + $0x10] sm:$0x1c] }
 0x622   :  { %2706 = vtanh.f32 %v1922_v39  ;;  %v1940_v1 = vrot.slane %v1922_v39, 7 }
 0x623   :  { %2708 = vtanh.f32 %v1923_v51  ;;  %v1941_v11 = vrot.slane %v1923_v51, 7 }
 0x625   :  { %v1942_v38 = vsel %vm570_vm12, %v1940_v1, %v1941_v11 }
 0x626   :  { %v4532_v45 = vsel %vm1929_vm5, %v1942_v38, %v4270_v18  ;;  %v2844_v18 = vld [vmem:[%s4751_s3 + $0x198] sm:$0xff] }
 0x62f   :  { %v2707_v48 = vpop.eup %2706 }
 0x630   :  { %v2709_v54 = vpop.eup %2708  ;;  %v1926_v58 = vmul.f32 %v2707_v48, %v2703_v24 }
 0x631   :  { %v1927_v62 = vmul.f32 %v2709_v54, %v2705_v47  ;;  %v2129_v47 = vrot.slane %v4532_v45, 6 }
 0x632   :  { %v1932_v2 = vrot.slane %v1926_v58, 7 }
 0x633   :  { %v1933_v16 = vrot.slane %v1927_v62, 7 }
 0x635   :  { %v1934_v20 = vsel %vm570_vm12, %v1932_v2, %v1933_v16  ;;  %v2136_v16 = vld [vmem:[#allocation4 + $0x12] sm:$0x7] }
 0x636   :  { %v1936_v23 = vsel %vm1929_vm5, %v1934_v20, 0.0  ;;  %v4536_v13 = vsel %vm1929_vm5, %v1934_v20, %v4273_v5  ;;  %v2845_v5 = vld [vmem:[%s4751_s3 + $0x190] sm:$0xff]  ;;  %vm2137_vm6 = vcmp.gt.f32.partialorder %v2136_v16, 0.0 }
 0x637   :  { %1945 = vst.msk [vmem:[#allocation5 + $0xf] sm:$0x7] %vm856_vm14, %v1936_v23  ;;  %2016 = vmatmul.mubr.f32.vlgmr.msra.gmra.mxu0 %v4536_v13  ;;  %2087 = vmatmul.mubr.f32.vlgmr.msra.gmra.mxu1 %v4536_v13 }
 0x638   :  { %1946 = vst.msk [vmem:[#allocation5 + $0x6] sm:$0x7] %vm858_vm15, %v1936_v23  ;;  %2154 = vmatpush1.msra.mxu0 %v4282_v29  ;;  %2225 = vmatpush1.msra.mxu1 %v4288_v36  ;;  %v2846_v29 = vld [vmem:[%s4751_s3 + $0x178] sm:$0xff]  ;;  %v2847_v36 = vld [vmem:[%s4751_s3 + $0x170] sm:$0xff] }
 0x639   :  { %2155 = vmatprep.subr.mxu0 %v4294_v17  ;;  %2226 = vmatprep.subr.mxu1 %v4300_v10  ;;  %v2848_v17 = vld [vmem:[%s4751_s3 + $0x158] sm:$0xff]  ;;  %v2849_v10 = vld [vmem:[%s4751_s3 + $0x150] sm:$0xff] }
 0x63a   :  { %2156 = vmatpush1.msra.mxu0 %v4306_v61  ;;  %2227 = vmatpush1.msra.mxu1 %v4312_v25  ;;  %v2850_v61 = vld [vmem:[%s4751_s3 + $0x138] sm:$0xff]  ;;  %v2851_v25 = vld [vmem:[%s4751_s3 + $0x130] sm:$0xff] }
 0x63b   :  { %2157 = vmatprep.subr.mxu0 %v4318_v33  ;;  %2228 = vmatprep.subr.mxu1 %v4324_v52  ;;  %v2852_v33 = vld [vmem:[%s4751_s3 + $0x118] sm:$0xff]  ;;  %v2853_v52 = vld [vmem:[%s4751_s3 + $0x110] sm:$0xff] }
 0x63c   :  { %2158 = vmatpush1.msra.mxu0 %v4330_v12  ;;  %2229 = vmatpush1.msra.mxu1 %v4336_v28  ;;  %v2854_v12 = vld [vmem:[%s4751_s3 + $0xf8] sm:$0xff]  ;;  %v2855_v28 = vld [vmem:[%s4751_s3 + $0xf0] sm:$0xff] }
 0x63d   :  { %2159 = vmatprep.subr.mxu0 %v4342_v15  ;;  %2230 = vmatprep.subr.mxu1 %v2844_v18  ;;  %v2856_v15 = vld [vmem:[%s4751_s3 + $0xd8] sm:$0xff] }
 0x63e   :  { %2160 = vmatpush1.msra.mxu0 %v4349_v27  ;;  %2231 = vmatpush1.msra.mxu1 %v2845_v5  ;;  %v2857_v27 = vld [vmem:[%s4751_s3 + $0xd0] sm:$0xff] }
 0x63f   :  { %2161 = vmatprep.subr.mxu0 %v4356_v8  ;;  %2232 = vmatprep.subr.mxu1 %v2846_v29  ;;  %v2858_v8 = vld [vmem:[%s4751_s3 + $0xb8] sm:$0xff] }
 0x640   :  { %2162 = vmatpush1.msra.mxu0 %v4363_v14  ;;  %2233 = vmatpush1.msra.mxu1 %v2847_v36  ;;  %v2859_v14 = vld [vmem:[%s4751_s3 + $0xb0] sm:$0xff] }
 0x641   :  { %2163 = vmatprep.subr.mxu0 %v4370_v7  ;;  %2234 = vmatprep.subr.mxu1 %v2848_v17  ;;  %v2860_v7 = vld [vmem:[%s4751_s3 + $0x98] sm:$0xff] }
 0x642   :  { %2164 = vmatpush1.msra.mxu0 %v4377_v57  ;;  %2235 = vmatpush1.msra.mxu1 %v2849_v10  ;;  %v2861_v57 = vld [vmem:[%s4751_s3 + $0x90] sm:$0xff] }
 0x643   :  { %2165 = vmatprep.subr.mxu0 %v4384_v44  ;;  %2236 = vmatprep.subr.mxu1 %v2850_v61  ;;  %v2862_v44 = vld [vmem:[%s4751_s3 + $0x78] sm:$0xff] }
 0x644   :  { %2166 = vmatpush1.msra.mxu0 %v4391_v21  ;;  %2237 = vmatpush1.msra.mxu1 %v2851_v25  ;;  %v2863_v21 = vld [vmem:[%s4751_s3 + $0x70] sm:$0xff]  ;;  %v2364_v61 = vld [vmem:[%s4755_s5 + $0x78] sm:$0xff]  ;;  %v2361_v25 = vld [vmem:[%s4755_s5 + $0x60] sm:$0xff] }
 0x645   :  { %2167 = vmatprep.subr.mxu0 %v4398_v35  ;;  %2238 = vmatprep.subr.mxu1 %v2852_v33  ;;  %v2864_v35 = vld [vmem:[%s4751_s3 + $0x58] sm:$0xff] }
 0x646   :  { %2168 = vmatpush1.msra.mxu0 %v4405_v63  ;;  %2239 = vmatpush1.msra.mxu1 %v2853_v52  ;;  %v2865_v63 = vld [vmem:[%s4751_s3 + $0x50] sm:$0xff]  ;;  %v2360_v33 = vld [vmem:[%s4755_s5 + $0x58] sm:$0xff] }
 0x647   :  { %2169 = vmatprep.subr.mxu0 %v4412_v37  ;;  %2240 = vmatprep.subr.mxu1 %v2854_v12  ;;  %v2866_v37 = vld [vmem:[%s4751_s3 + $0x38] sm:$0xff]  ;;  %v2359_v52 = vld [vmem:[%s4755_s5 + $0x50] sm:$0xff]  ;;  %v2358_v12 = vld [vmem:[%s4755_s5 + $0x48] sm:$0xff] }
 0x648   :  { %2170 = vmatpush1.msra.mxu0 %v4419_v46  ;;  %2241 = vmatpush1.msra.mxu1 %v2855_v28  ;;  %v2867_v46 = vld [vmem:[%s4751_s3 + $0x30] sm:$0xff]  ;;  %v2357_v28 = vld [vmem:[%s4755_s5 + $0x40] sm:$0xff] }
 0x649   :  { %2171 = vmatprep.subr.mxu0 %v4426_v31  ;;  %2242 = vmatprep.subr.mxu1 %v2856_v15  ;;  %v2868_v31 = vld [vmem:[%s4751_s3 + $0x18] sm:$0xff] }
 0x64a   :  { %2172 = vmatpush1.msra.mxu0 %v4433_v19  ;;  %2243 = vmatpush1.msra.mxu1 %v2857_v27  ;;  %v2869_v19 = vld [vmem:[%s4751_s3 + $0x10] sm:$0xff]  ;;  %v2356_v15 = vld [vmem:[%s4755_s5 + $0x38] sm:$0xff] }
 0x64b   :  { %2173 = vmatprep.subr.mxu0 %v4440_v34  ;;  %2244 = vmatprep.subr.mxu1 %v2858_v8  ;;  %v2355_v27 = vld [vmem:[%s4755_s5 + $0x30] sm:$0xff]  ;;  %v2354_v8 = vld [vmem:[%s4755_s5 + $0x28] sm:$0xff] }
 0x64c   :  { %2174 = vmatpush1.msra.mxu0 %v4447_v50  ;;  %2245 = vmatpush1.msra.mxu1 %v2859_v14  ;;  %v2353_v14 = vld [vmem:[%s4755_s5 + $0x20] sm:$0xff] }
 0x64d   :  { %2175 = vmatprep.subr.mxu0 %v4454_v55  ;;  %2246 = vmatprep.subr.mxu1 %v2860_v7  ;;  %v1947_v55 = vld [vmem:[#allocation3 + $0x38] sm:$0x1c] }
 0x64e   :  { %2176 = vmatpush1.msra.mxu0 %v4461_v41  ;;  %2247 = vmatpush1.msra.mxu1 %v2861_v57  ;;  %v2352_v7 = vld [vmem:[%s4755_s5 + $0x18] sm:$0xff]  ;;  %v2351_v57 = vld [vmem:[%s4755_s5 + $0x10] sm:$0xff] }
 0x64f   :  { %2177 = vmatprep.subr.mxu0 %v4468_v42  ;;  %2248 = vmatprep.subr.mxu1 %v2862_v44  ;;  %v2350_v44 = vld [vmem:[%s4755_s5 + $0x8] sm:$0xff] }
 0x650   :  { %2178 = vmatpush1.msra.mxu0 %v4475_v59  ;;  %2249 = vmatpush1.msra.mxu1 %v2863_v21  ;;  %v2349_v21 = vld [vmem:[%s4755_s5] sm:$0xff] }
 0x651   :  { %2179 = vmatprep.subr.mxu0 %v4482_v49  ;;  %2250 = vmatprep.subr.mxu1 %v2864_v35  ;;  %v1948_v49 = vld [vmem:[#allocation3 + $0x28] sm:$0x1c] }
 0x652   :  { %2180 = vmatpush1.msra.mxu0 %v4489_v53  ;;  %2251 = vmatpush1.msra.mxu1 %v2865_v63 }
 0x653   :  { %2181 = vmatprep.subr.mxu0 %v4496_v9  ;;  %2252 = vmatprep.subr.mxu1 %v2866_v37  ;;  %v2149_v37 = vld [vmem:[#allocation3 + $0x38] sm:$0xe0] }
 0x654   :  { %2182 = vmatpush1.msra.mxu0 %v4503_v3  ;;  %2253 = vmatpush1.msra.mxu1 %v2867_v46 }
 0x655   :  { %2183 = vmatprep.subr.mxu0 %v4510_v43  ;;  %2254 = vmatprep.subr.mxu1 %v2868_v31 }
 0x656   :  { %2184 = vmatpush1.msra.mxu0 %v4517_v56  ;;  %2217 = vmatprep.mubr.f32.mxu0 %v4880_v6 }
 0x657   :  { %2255 = vmatpush1.msra.mxu1 %v2869_v19  ;;  %2288 = vmatprep.mubr.f32.mxu1 %v4880_v6 }
 0x658   :  { %2530 = vmatprep.subr.mxu0 %v4880_v6 }
 0x6f7   :  { %v2017_v34 = vpop.f32.mrf.mxu0  ;;  %v2088_v3 = vpop.f32.mrf.mxu1 }
 0x6f8   :  { %v2097_v50 = vrot.slane %v2017_v34, 6  ;;  %v2099_v56 = vrot.slane %v2088_v3, 6  ;;  %v2150_v34 = vld [vmem:[#allocation3 + $0x28] sm:$0xe0] }
 0x6f9   :  { %v2019_v41 = vpop.f32.mrf.mxu0  ;;  %v2090_v22 = vpop.f32.mrf.mxu1 }
 0x6fa   :  { %v2105_v42 = vadd.f32 %v2097_v50, %v1947_v55  ;;  %v2098_v59 = vrot.slane %v2019_v41, 6  ;;  %v2107_v60 = vadd.f32 %v2099_v56, %v1949_v40  ;;  %v2100_v0 = vrot.slane %v2090_v22, 6  ;;  %v2152_v56 = vld [vmem:[#allocation3 + $0x10] sm:$0xe0] }
 0x6fc   :  { %v2504_v53 = vmul.f32 -1.442695, %v2105_v42  ;;  %v2106_v9 = vadd.f32 %v2098_v59, %v1948_v49  ;;  %v2506_v26 = vmul.f32 -1.442695, %v2107_v60  ;;  %v2108_v39 = vadd.f32 %v2100_v0, %v1950_v4  ;;  %v2151_v49 = vld [vmem:[#allocation3 + $0x58] sm:$0xe0] }
 0x6fe   :  { %2710 = vpow2.f32 %v2504_v53  ;;  %v2505_v43 = vmul.f32 -1.442695, %v2106_v9 }
 0x700   :  { %2712 = vpow2.f32 %v2505_v43 }
 0x701   :  { %2714 = vpow2.f32 %v2506_v26 }
 0x70b   :  { %v2711_v30 = vpop.eup %2710 }
 0x70c   :  { %v2118_v51 = vadd.f32 1.0, %v2711_v30 }
 0x70d   :  { %v2713_v32 = vpop.eup %2712 }
 0x70e   :  { %2716 = vrcp.f32 %v2118_v51  ;;  %v2119_v1 = vadd.f32 1.0, %v2713_v32  ;;  %v2715_v11 = vpop.eup %2714 }
 0x70f   :  { %2718 = vtanh.f32 %v2108_v39  ;;  %v2120_v54 = vadd.f32 1.0, %v2715_v11 }
 0x710   :  { %2720 = vrcp.f32 %v2119_v1 }
 0x711   :  { %2722 = vrcp.f32 %v2120_v54 }
 0x71b   :  { %v2717_v38 = vpop.eup %2716 }
 0x71c   :  { %v2719_v24 = vpop.eup %2718 }
 0x71d   :  { %v2721_v48 = vpop.eup %2720  ;;  %v2132_v62 = vmul.f32 %v2719_v24, %v2717_v38 }
 0x71e   :  { %v2131_v58 = vmul.f32 %v2721_v48, %v2129_v47  ;;  %v2723_v18 = vpop.eup %2722 }
 0x720   :  { %v2133_v2 = vadd.f32 %v2132_v62, %v2131_v58  ;;  %v2338_v58 = vld [vmem:[#allocation4 + $0x15] sm:$0x7] }
 0x721   :  { %vm2339_vm8 = vcmp.gt.f32.partialorder %v2338_v58, 0.0 }
 0x722   :  { %2724 = vtanh.f32 %v2133_v2  ;;  %v2144_v20 = vrot.slane %v2133_v2, 2 }
 0x724   :  { %v4661_v23 = vsel %vm2137_vm6, %v2144_v20, %v4532_v45  ;;  %v2363_v45 = vld [vmem:[%s4755_s5 + $0x70] sm:$0xff]  ;;  %v2347_v20 = vld [vmem:[#allocation5 + $0x8] sm:$0xff] }
 0x725   :  { %v2331_v51 = vrot.slane %v4661_v23, 3 }
 0x72f   :  { %v2725_v5 = vpop.eup %2724 }
 0x730   :  { %v2135_v29 = vmul.f32 %v2725_v5, %v2723_v18  ;;  %v2510_v18 = vld [vmem:[%s4756_s6] ss:$0 sm:$0xff] }
 0x732   :  { %v2139_v36 = vrot.slane %v2135_v29, 2 }
 0x734   :  { %v2141_v17 = vsel %vm2137_vm6, %v2139_v36, 0.0  ;;  %v2142_v10 = vsel %vm2137_vm6, %v2139_v36, %v4536_v13  ;;  %v2362_v13 = vld [vmem:[%s4755_s5 + $0x68] sm:$0xff] }
 0x735   :  { %2147 = vst.msk [vmem:[#allocation5 + $0x12] sm:$0x7] %vm856_vm14, %v2141_v17  ;;  %2218 = vmatmul.mubr.f32.vlgmr.msra.gmra.mxu0 %v2142_v10  ;;  %2289 = vmatmul.mubr.f32.vlgmr.msra.gmra.mxu1 %v2142_v10 }
 0x736   :  { %2148 = vst.msk [vmem:[#allocation5 + $0x3] sm:$0x7] %vm858_vm15, %v2141_v17  ;;  %2531 = vmatpush3.msra.mxu0 %v2364_v61  ;;  %2562 = vmatprep.mubr.msk.f32.mxu0 %vm2879_vm7, %v4880_v6 }
 0x737   :  { %2532 = vmatprep.subr.mxu0 %v4880_v6 }
 0x738   :  { %2533 = vmatpush3.msra.mxu0 %v2363_v45 }
 0x739   :  { %2534 = vmatprep.subr.mxu0 %v4880_v6 }
 0x73a   :  { %2535 = vmatpush3.msra.mxu0 %v2362_v13 }
 0x73b   :  { %2536 = vmatprep.subr.mxu0 %v4880_v6 }
 0x73c   :  { %2537 = vmatpush3.msra.mxu0 %v2361_v25 }
 0x73d   :  { %2538 = vmatprep.subr.mxu0 %v4880_v6 }
 0x73e   :  { %2539 = vmatpush3.msra.mxu0 %v2360_v33 }
 0x73f   :  { %2540 = vmatprep.subr.mxu0 %v4880_v6 }
 0x740   :  { %2541 = vmatpush3.msra.mxu0 %v2359_v52 }
 0x741   :  { %2542 = vmatprep.subr.mxu0 %v4880_v6 }
 0x742   :  { %2543 = vmatpush3.msra.mxu0 %v2358_v12 }
 0x743   :  { %2544 = vmatprep.subr.mxu0 %v4880_v6 }
 0x744   :  { %2545 = vmatpush3.msra.mxu0 %v2357_v28 }
 0x745   :  { %2546 = vmatprep.subr.mxu0 %v4880_v6 }
 0x746   :  { %2547 = vmatpush3.msra.mxu0 %v2356_v15 }
 0x747   :  { %2548 = vmatprep.subr.mxu0 %v4880_v6 }
 0x748   :  { %2549 = vmatpush3.msra.mxu0 %v2355_v27 }
 0x749   :  { %2550 = vmatprep.subr.mxu0 %v4880_v6 }
 0x74a   :  { %2551 = vmatpush3.msra.mxu0 %v2354_v8 }
 0x74b   :  { %2552 = vmatprep.subr.mxu0 %v4880_v6 }
 0x74c   :  { %2553 = vmatpush3.msra.mxu0 %v2353_v14 }
 0x74d   :  { %2554 = vmatprep.subr.mxu0 %v4880_v6 }
 0x74e   :  { %2555 = vmatpush3.msra.mxu0 %v2352_v7 }
 0x74f   :  { %2556 = vmatprep.subr.mxu0 %v4880_v6 }
 0x750   :  { %2557 = vmatpush3.msra.mxu0 %v2351_v57 }
 0x751   :  { %2558 = vmatprep.subr.mxu0 %v4880_v6 }
 0x752   :  { %2559 = vmatpush3.msra.mxu0 %v2350_v44 }
 0x753   :  { %2560 = vmatprep.subr.mxu0 %v4880_v6 }
 0x754   :  { %2561 = vmatpush3.msra.mxu0 %v2349_v21 }
 0x7f5   :  { %v2219_v35 = vpop.f32.mrf.mxu0  ;;  %v2290_v41 = vpop.f32.mrf.mxu1 }
 0x7f6   :  { %v2299_v63 = vrot.slane %v2219_v35, 3  ;;  %v2301_v59 = vrot.slane %v2290_v41, 3 }
 0x7f7   :  { %v2221_v46 = vpop.f32.mrf.mxu0  ;;  %v2292_v53 = vpop.f32.mrf.mxu1 }
 0x7f8   :  { %v2307_v31 = vadd.f32 %v2299_v63, %v2149_v37  ;;  %v2300_v19 = vrot.slane %v2221_v46, 3  ;;  %v2309_v9 = vadd.f32 %v2301_v59, %v2151_v49  ;;  %v2302_v3 = vrot.slane %v2292_v53, 3 }
 0x7fa   :  { %v2507_v50 = vmul.f32 -1.442695, %v2307_v31  ;;  %v2308_v55 = vadd.f32 %v2300_v19, %v2150_v34  ;;  %v2509_v43 = vmul.f32 -1.442695, %v2309_v9  ;;  %v2310_v22 = vadd.f32 %v2302_v3, %v2152_v56 }
 0x7fc   :  { %2726 = vpow2.f32 %v2507_v50  ;;  %v2508_v42 = vmul.f32 -1.442695, %v2308_v55 }
 0x7fe   :  { %2728 = vpow2.f32 %v2508_v42 }
 0x7ff   :  { %2730 = vpow2.f32 %v2509_v43 }
 0x809   :  { %v2727_v40 = vpop.eup %2726 }
 0x80a   :  { %v2320_v60 = vadd.f32 1.0, %v2727_v40 }
 0x80b   :  { %v2729_v0 = vpop.eup %2728 }
 0x80c   :  { %2732 = vrcp.f32 %v2320_v60  ;;  %v2321_v26 = vadd.f32 1.0, %v2729_v0  ;;  %v2731_v4 = vpop.eup %2730 }
 0x80d   :  { %2734 = vtanh.f32 %v2310_v22  ;;  %v2322_v1 = vadd.f32 1.0, %v2731_v4 }
 0x80e   :  { %2736 = vrcp.f32 %v2321_v26 }
 0x80f   :  { %2738 = vrcp.f32 %v2322_v1 }
 0x819   :  { %v2733_v30 = vpop.eup %2732 }
 0x81a   :  { %v2735_v39 = vpop.eup %2734 }
 0x81b   :  { %v2737_v32 = vpop.eup %2736  ;;  %v2334_v38 = vmul.f32 %v2735_v39, %v2733_v30 }
 0x81c   :  { %v2333_v11 = vmul.f32 %v2737_v32, %v2331_v51  ;;  %v2739_v47 = vpop.eup %2738 }
 0x81e   :  { %v2335_v24 = vadd.f32 %v2334_v38, %v2333_v11 }
 0x820   :  { %2740 = vtanh.f32 %v2335_v24 }
 0x82d   :  { %v2741_v48 = vpop.eup %2740 }
 0x82e   :  { %v2337_v54 = vmul.f32 %v2741_v48, %v2739_v47 }
 0x830   :  { %v2341_v62 = vrot.slane %v2337_v54, 5 }
 0x832   :  { %v2343_v2 = vsel %vm2339_vm8, %v2341_v62, 0.0 }
 0x833   :  { %2344 = vst.msk [vmem:[#allocation5 + $0x15] sm:$0x7] %vm856_vm14, %v2343_v2 }
 0x834   :  { %2345 = vst.msk [vmem:[#allocation5] sm:$0x7] %vm858_vm15, %v2343_v2 }
 0x83a   :  { %v2348_v23 = vld [vmem:[#allocation5 + $0x10] sm:$0xff] }
 0x83b   :  { %v2346_v16 = vld [vmem:[#allocation5] sm:$0xff] }
 0x83c   :  { %2563 = vmatmul.mubr.f32.vlgmr.msra.gmra.mxu0 %v2346_v16 }
 0x83d   :  { %2565 = vmatprep.mubr.msk.f32.mxu0 %vm2879_vm7, %v4880_v6 }
 0x840   :  { %2566 = vmatmul.mubr.f32.gmra.mxu0 %v2347_v20 }
 0x841   :  { %2568 = vmatprep.mubr.msk.f32.mxu0 %vm2879_vm7, %v4880_v6 }
 0x844   :  { %2569 = vmatmul.mubr.f32.gmra.mxu0 %v2348_v23 }
 0x8fc   :  { %v2438_v5 = vpop.f32.mrf.mxu0 }
 0x8fd   :  { %v2439_v29 = vadd.f32 %v2510_v18, %v2438_v5 }
 0x8fe   :  { %v2564_v36 = vpop.f32.mrf.mxu0 }
 0x8ff   :  { %2453 = vst.msk [vmem:[%s4757_s7] sm:$0xff] %vm2452_vm9, %v2439_v29 }
 0x900   :  { %v2443_v17 = vpop.f32.mrf.mxu0 }
 0x901   :  { %v2444_v10 = vadd.f32 %v2510_v18, %v2443_v17 }
 0x902   :  { %v2567_v61 = vpop.f32.mrf.mxu0 }
 0x903   :  { %2454 = vst.msk [vmem:[%s4757_s7 + $0x8] sm:$0xff] %vm2452_vm9, %v2444_v10 }
 0x904   :  { %v2448_v6 = vpop.f32.mrf.mxu0 }
 0x905   :  { %v2449_v45 = vadd.f32 %v2510_v18, %v2448_v6 }
 0x906   :  { %v2570_v13 = vpop.f32.mrf.mxu0 }
 0x907   :  { %2455 = vst.msk [vmem:[%s4757_s7 + $0x10] sm:$0xff] %vm2452_vm9, %v2449_v45 }

</bundles_post_ra>
